<compile_context>
chip_gen: v5e
topology: v5e:2x2
jax: 0.10.0
libtpu: 0.0.40
codegen_flags: <defaults>
</compile_context>

<pallas_src>
import functools

import jax
import jax.numpy as jnp
from jax.experimental import pallas as pl
from jax.experimental.pallas import tpu as pltpu

BN_EPS = 1e-5
K_STEM = 10     # conv1 / conv2 kernel size
PHASES = 8      # conv1 output positions are phase-split mod 8 (total stem stride 16)


# ---------------------------------------------------------------------------
# The single fused Pallas kernel
# ---------------------------------------------------------------------------
def _network_kernel(a1_ref, w1t_ref, s1_ref, t1_ref, w2_ref, b2_ref,
                    i1w1, i1w2, i1w3, i1w4, i1s, i1t, i1sw1, i1sb1, i1sw2t, i1sb2,
                    i2w1, i2w2, i2w3, i2w4, i2s, i2t, i2sw1, i2sb1, i2sw2t, i2sb2,
                    f1w, f1s, f1t, f2w, f2b,
                    out_ref,
                    y1_s, p4_s, zp1_s, zp2_s,
                    *, batch, rows, l_out):
    B, R, L = batch, rows, l_out

    # ---- conv1 (k=10, s=2) + folded BN + ReLU: one matmul over all phase rows.
    # Row ((q*B)+b)*R + r of a1/y1_s <-> conv1 output position 8*r + q, batch b.
    y = jnp.dot(a1_ref[...], w1t_ref[...], preferred_element_type=jnp.float32)
    y1_s[...] = jnp.maximum(y * s1_ref[...] + t1_ref[...], 0.0)

    # Zero-padded (L+4)-row staging buffers for the inception branch taps.
    zp1_s[...] = jnp.zeros_like(zp1_s)
    zp2_s[...] = jnp.zeros_like(zp2_s)

    def inception(zp_ref, b, wb1, wb2, wb3, wb4, s_cat, t_cat, sw1, sb1, sw2t, sb2,
                  need_map):
        z   = zp_ref[b, pl.ds(2, L), :]          # x[l]
        tm1 = zp_ref[b, pl.ds(1, L), :]          # x[l-1] (zero at the edge)
        tp1 = zp_ref[b, pl.ds(3, L), :]          # x[l+1]
        tm2 = zp_ref[b, pl.ds(0, L), :]          # x[l-2]
        tp2 = zp_ref[b, pl.ds(4, L), :]          # x[l+2]
        p2 = jnp.concatenate([tm1, z, tp1], axis=-1)             # k=3, pad=1
        p3 = jnp.concatenate([tm2, z, tp2], axis=-1)             # k=3, dil=2, pad=2
        p4b = jnp.maximum(jnp.maximum(tm1, z), tp1)              # maxpool3 (x >= 0)
        raw = jnp.concatenate(
            [jnp.dot(z,   wb1[...], preferred_element_type=jnp.float32),
             jnp.dot(p2,  wb2[...], preferred_element_type=jnp.float32),
             jnp.dot(p3,  wb3[...], preferred_element_type=jnp.float32),
             jnp.dot(p4b, wb4[...], preferred_element_type=jnp.float32)], axis=-1)
        yb = jnp.maximum(raw * s_cat[...] + t_cat[...], 0.0)     # (L, Ctot)
        pooled = jnp.mean(yb, axis=0, keepdims=True)             # (1, Ctot)
        # SE block on VPU/XLU (broadcast-mul + lane/sublane reduces, no MXU).
        h = jnp.maximum(jnp.sum(sw1[...] * pooled, axis=1, keepdims=True)
                        + sb1[...], 0.0)                         # (H, 1)
        g = jax.nn.sigmoid(jnp.sum(sw2t[...] * h, axis=0, keepdims=True)
                           + sb2[...])                           # (1, Ctot)
        ymap = yb * g if need_map else None                      # skipped for inc2
        return ymap, pooled * g                                  # fused SE-scaled GAP

    for b in range(B):
        # ---- maxpool1d(2) on conv1 output, kept phase-resolved: p4[t][s] = p[4s+t]
        for t in range(4):
            ya = y1_s[pl.ds(((2 * t) * B + b) * R, R), :]
            yb_ = y1_s[pl.ds(((2 * t + 1) * B + b) * R, R), :]
            p4_s[pl.ds((b * 4 + t) * R, R), :] = jnp.maximum(ya, yb_)

        # ---- conv2 (k=10, s=2) + bias + ReLU, fused with the following maxpool1d(2)
        def c2(u):
            pieces = []
            for i in range(K_STEM):
                k = 2 * u + i
                a, t = k // 4, k % 4
                pieces.append(p4_s[pl.ds((b * 4 + t) * R + a, L), :])
            return jnp.dot(jnp.concatenate(pieces, axis=-1), w2_ref[...],
                           preferred_element_type=jnp.float32)
        r0 = jnp.maximum(c2(0) + b2_ref[...], 0.0)
        r1 = jnp.maximum(c2(1) + b2_ref[...], 0.0)
        zp1_s[b, pl.ds(2, L), :] = jnp.maximum(r0, r1)            # stem output (L, 32)

        # ---- inception1 + SE: feature map never leaves VMEM
        y1map, _ = inception(zp1_s, b, i1w1, i1w2, i1w3, i1w4, i1s, i1t,
                             i1sw1, i1sb1, i1sw2t, i1sb2, need_map=True)
        zp2_s[b, pl.ds(2, L), :] = y1map

        # ---- inception2 + SE: only the SE-scaled GAP is needed (dead map elided)
        _, gap = inception(zp2_s, b, i2w1, i2w2, i2w3, i2w4, i2s, i2t,
                           i2sw1, i2sb1, i2sw2t, i2sb2, need_map=False)

        # ---- head: fc1 + BN + ReLU, (dropout = identity), fc2, log_softmax
        hid = jnp.maximum(
            jnp.dot(gap, f1w[...], preferred_element_type=jnp.float32)
            * f1s[...] + f1t[...], 0.0)
        logits = jnp.dot(hid, f2w[...], preferred_element_type=jnp.float32) + f2b[...]
        logits = logits - jnp.max(logits, axis=-1, keepdims=True)
        out_ref[pl.ds(b, 1), :] = logits - jnp.log(
            jnp.sum(jnp.exp(logits), axis=-1, keepdims=True))


# ---------------------------------------------------------------------------
# Wrapper (only cheap XLA layout plumbing for the conv1 im2col phase packing)
# ---------------------------------------------------------------------------
def _conv1_phase_patches(x2d):
    """(B, L0) -> (PHASES*B*R, K_STEM) conv1 im2col patches, phase-major.

    Row ((q*B)+b)*R + r holds the k=10 stride-2 patch for conv1 output position
    8*r + q of batch b (positions beyond L1 are zero padding, never consumed).
    """
    b, l0 = x2d.shape
    l1 = (l0 - K_STEM) // 2 + 1
    taps = [x2d[:, i: i + 2 * (l1 - 1) + 1: 2] for i in range(K_STEM)]
    a1 = jnp.stack(taps, axis=-1)                                   # (B, L1, 10)
    r = -(-l1 // PHASES)
    a1 = jnp.pad(a1, ((0, 0), (0, PHASES * r - l1), (0, 0)))
    a1 = a1.reshape(b, r, PHASES, K_STEM).transpose(2, 0, 1, 3)     # (8, B, r, 10)
    return a1.reshape(PHASES * b * r, K_STEM), r


def inception_with_se_forward(x, p):
    """x: (B, 1, L0) float32 (PyTorch NCL layout); returns log-probs (B, num_classes)."""
    b, _, l0 = x.shape
    l1 = (l0 - K_STEM) // 2 + 1
    lp1 = l1 // 2
    l2 = (lp1 - K_STEM) // 2 + 1
    l3 = l2 // 2
    a1, rows = _conv1_phase_patches(x[:, 0, :])
    # The in-kernel phase decomposition needs every p4[t][s] it touches in range.
    assert l1 % 2 == 0 and 4 * (l3 + 1) + 3 <= lp1 - 1 and rows >= l3 + 2, \
        "unsupported input length for the fused stem"

    n_cls = p["fc2"]["wt"].shape[1]
    args = [a1,
            p["conv1"]["wt"], p["conv1"]["scale"], p["conv1"]["shift"],
            p["conv2"]["wt"], p["conv2"]["shift"]]
    for blk in ("inc1", "inc2"):
        q = p[blk]
        args += [q["w1"], q["w2"], q["w3"], q["w4"], q["scale"], q["shift"],
                 q["se_w1"], q["se_b1"], q["se_w2t"], q["se_b2"]]
    args += [p["fc1"]["wt"], p["fc1"]["scale"], p["fc1"]["shift"],
             p["fc2"]["wt"], p["fc2"]["shift"]]

    vmem = pl.BlockSpec(memory_space=pltpu.MemorySpace.VMEM)
    c1 = p["conv1"]["wt"].shape[1]          # 16
    c_stem = p["conv2"]["wt"].shape[1]      # 32
    c_inc1 = p["inc1"]["scale"].shape[1]    # 64

    return pl.pallas_call(
        functools.partial(_network_kernel, batch=b, rows=rows, l_out=l3),
        out_shape=jax.ShapeDtypeStruct((b, n_cls), jnp.float32),
        in_specs=[vmem] * len(args),
        out_specs=vmem,
        scratch_shapes=[
            pltpu.VMEM((PHASES * b * rows, c1), jnp.float32),   # conv1 phase rows
            pltpu.VMEM((4 * b * rows, c1), jnp.float32),        # pooled phases p4[t]
            pltpu.VMEM((b, l3 + 4, c_stem), jnp.float32),       # zero-padded stem out
            pltpu.VMEM((b, l3 + 4, c_inc1), jnp.float32),       # zero-padded inc1 out
        ],
        compiler_params=pltpu.CompilerParams(vmem_limit_bytes=32 * 1024 * 1024),
    )(*args)


# ---------------------------------------------------------------------------
# Parameters (PyTorch layout) + prep (fold BN, transpose, per-branch matrices)
# ---------------------------------------------------------------------------
def init_raw_params(key):
    keys = iter(jax.random.split(key, 96))
    nxt = lambda: next(keys)
    w = lambda shape, s=0.15: jax.random.normal(nxt(), shape, jnp.float32) * s

    def bn(c):
        return dict(g=jax.random.uniform(nxt(), (c,), jnp.float32, 0.7, 1.3),
                    beta=w((c,), 0.05), m=w((c,), 0.05),
                    v=jax.random.uniform(nxt(), (c,), jnp.float32, 0.5, 1.5))

    def convblock(ci, co, k):
        return dict(w=w((co, ci, k)), b=w((co,), 0.05), bn=bn(co))

    def inception(ci, o1, o2, o3, o4):
        ct = o1 + o2 + o3 + o4
        hh = ct // 16
        return dict(b1=convblock(ci, o1, 1), b2=convblock(ci, o2, 3),
                    b3=convblock(ci, o3, 3), b4=convblock(ci, o4, 1),
                    se=dict(w1=w((hh, ct)), b1=w((hh,), 0.05),
                            w2=w((ct, hh)), b2=w((ct,), 0.05)))

    return dict(conv1=convblock(1, 16, 10),
                conv2_w=w((32, 16, 10)), conv2_b=w((32,), 0.05),
                inc1=inception(32, 16, 16, 16, 16),
                inc2=inception(64, 32, 32, 32, 32),
                fc1_w=w((64, 128)), fc1_b=w((64,), 0.05), bn1=bn(64),
                fc2_w=w((2, 64)), fc2_b=w((2,), 0.05))


def _fold_bn(bias, bn):
    scale = bn["g"] / jnp.sqrt(bn["v"] + BN_EPS)
    return scale, (bias - bn["m"]) * scale + bn["beta"]


def _conv_w_to_mat(w):
    """(O, C, K) PyTorch conv weight -> (K*C, O) matrix, tap-major rows."""
    return jnp.transpose(w, (2, 1, 0)).reshape(-1, w.shape[0])


def prep_params(raw):
    s1, t1 = _fold_bn(raw["conv1"]["b"], raw["conv1"]["bn"])
    sf, tf = _fold_bn(raw["fc1_b"], raw["bn1"])

    def prep_inc(r):
        ws, scales, shifts = [], [], []
        for name in ("b1", "b2", "b3", "b4"):
            br = r[name]
            ws.append(_conv_w_to_mat(br["w"]))
            s, t = _fold_bn(br["b"], br["bn"])
            scales.append(s)
            shifts.append(t)
        ct = sum(m.shape[1] for m in ws)
        hh = r["se"]["w1"].shape[0]
        return dict(w1=ws[0], w2=ws[1], w3=ws[2], w4=ws[3],
                    scale=jnp.concatenate(scales).reshape(1, ct),
                    shift=jnp.concatenate(shifts).reshape(1, ct),
                    se_w1=r["se"]["w1"],
                    se_b1=r["se"]["b1"].reshape(hh, 1),
                    se_w2t=r["se"]["w2"].T,
                    se_b2=r["se"]["b2"].reshape(1, ct))

    return dict(
        conv1=dict(wt=_conv_w_to_mat(raw["conv1"]["w"]),
                   scale=s1.reshape(1, -1), shift=t1.reshape(1, -1)),
        conv2=dict(wt=_conv_w_to_mat(raw["conv2_w"]),
                   shift=raw["conv2_b"].reshape(1, -1)),
        inc1=prep_inc(raw["inc1"]),
        inc2=prep_inc(raw["inc2"]),
        fc1=dict(wt=raw["fc1_w"].T, scale=sf.reshape(1, -1), shift=tf.reshape(1, -1)),
        fc2=dict(wt=raw["fc2_w"].T, shift=raw["fc2_b"].reshape(1, -1)),
    )


# ---------------------------------------------------------------------------
# Pure-JAX reference (independent path: lax convs / reduce_window)
# ---------------------------------------------------------------------------
def ref_forward(x, raw):
    hp = jax.lax.Precision.HIGHEST

    def conv(y, w, bias, stride=1, dilation=1, padding=0):
        out = jax.lax.conv_general_dilated(
            y, w, (stride,), [(padding, padding)], rhs_dilation=(dilation,),
            dimension_numbers=("NCH", "OIH", "NCH"), precision=hp)
        return out + bias[None, :, None]

    def bn(y, p):
        return ((y - p["m"][None, :, None]) / jnp.sqrt(p["v"][None, :, None] + BN_EPS)
                * p["g"][None, :, None] + p["beta"][None, :, None])

    def convblock(y, p, **kw):
        return jax.nn.relu(bn(conv(y, p["w"], p["b"], **kw), p["bn"]))

    def maxpool(y, k, s, pad=0):
        return jax.lax.reduce_window(y, -jnp.inf, jax.lax.max, (1, 1, k), (1, 1, s),
                                     [(0, 0), (0, 0), (pad, pad)])

    def se(y, p):
        pooled = y.mean(-1)
        hh = jax.nn.relu(pooled @ p["w1"].T + p["b1"])
        s = jax.nn.sigmoid(hh @ p["w2"].T + p["b2"])
        return y * s[:, :, None]

    def inception(y, p):
        outs = [convblock(y, p["b1"]),
                convblock(y, p["b2"], padding=1),
                convblock(y, p["b3"], dilation=2, padding=2),
                convblock(maxpool(y, 3, 1, 1), p["b4"])]
        return se(jnp.concatenate(outs, axis=1), p["se"])

    y = convblock(x, raw["conv1"], stride=2)
    y = maxpool(y, 2, 2)
    y = jax.nn.relu(conv(y, raw["conv2_w"], raw["conv2_b"], stride=2))
    y = maxpool(y, 2, 2)
    y = inception(y, raw["inc1"])
    y = inception(y, raw["inc2"])
    y = y.mean(-1)
    y = y @ raw["fc1_w"].T + raw["fc1_b"]
    y = ((y - raw["bn1"]["m"]) / jnp.sqrt(raw["bn1"]["v"] + BN_EPS)
         * raw["bn1"]["g"] + raw["bn1"]["beta"])
    y = jax.nn.relu(y)
    y = y @ raw["fc2_w"].T + raw["fc2_b"]
    return jax.nn.log_softmax(y, axis=1)


if __name__ == "__main__":
    B, L0, NUM_CLASSES = 2, 256, 2      # (B, 1, L0) single-channel 1D signal
    key = jax.random.PRNGKey(0)
    kx, kp = jax.random.split(key)
    x = jax.random.normal(kx, (B, 1, L0), dtype=jnp.float32)

    raw = init_raw_params(kp)
    params = prep_params(raw)

    fwd = jax.jit(inception_with_se_forward)
    out = jax.block_until_ready(fwd(x, params))

    with jax.default_matmul_precision("float32"):
        ref = ref_forward(x, raw)

    assert out.shape == (B, NUM_CLASSES), out.shape
    assert bool(jnp.all(jnp.isfinite(out)))
    assert jnp.allclose(out, ref, atol=2e-3, rtol=2e-3), (out, ref)
    print("KERNEL_OK")
</pallas_src>

<mosaic_0001>
module attributes {stable_mosaic.version = 11 : i64} {
  func.func @_network_kernel(%arg0: memref<256x10xf32, #tpu.memory_space<vmem>>, %arg1: memref<10x16xf32, #tpu.memory_space<vmem>>, %arg2: memref<1x16xf32, #tpu.memory_space<vmem>>, %arg3: memref<1x16xf32, #tpu.memory_space<vmem>>, %arg4: memref<160x32xf32, #tpu.memory_space<vmem>>, %arg5: memref<1x32xf32, #tpu.memory_space<vmem>>, %arg6: memref<32x16xf32, #tpu.memory_space<vmem>>, %arg7: memref<96x16xf32, #tpu.memory_space<vmem>>, %arg8: memref<96x16xf32, #tpu.memory_space<vmem>>, %arg9: memref<32x16xf32, #tpu.memory_space<vmem>>, %arg10: memref<1x64xf32, #tpu.memory_space<vmem>>, %arg11: memref<1x64xf32, #tpu.memory_space<vmem>>, %arg12: memref<4x64xf32, #tpu.memory_space<vmem>>, %arg13: memref<4x1xf32, #tpu.memory_space<vmem>>, %arg14: memref<4x64xf32, #tpu.memory_space<vmem>>, %arg15: memref<1x64xf32, #tpu.memory_space<vmem>>, %arg16: memref<64x32xf32, #tpu.memory_space<vmem>>, %arg17: memref<192x32xf32, #tpu.memory_space<vmem>>, %arg18: memref<192x32xf32, #tpu.memory_space<vmem>>, %arg19: memref<64x32xf32, #tpu.memory_space<vmem>>, %arg20: memref<1x128xf32, #tpu.memory_space<vmem>>, %arg21: memref<1x128xf32, #tpu.memory_space<vmem>>, %arg22: memref<8x128xf32, #tpu.memory_space<vmem>>, %arg23: memref<8x1xf32, #tpu.memory_space<vmem>>, %arg24: memref<8x128xf32, #tpu.memory_space<vmem>>, %arg25: memref<1x128xf32, #tpu.memory_space<vmem>>, %arg26: memref<128x64xf32, #tpu.memory_space<vmem>>, %arg27: memref<1x64xf32, #tpu.memory_space<vmem>>, %arg28: memref<1x64xf32, #tpu.memory_space<vmem>>, %arg29: memref<64x2xf32, #tpu.memory_space<vmem>>, %arg30: memref<1x2xf32, #tpu.memory_space<vmem>>, %arg31: memref<2x2xf32, #tpu.memory_space<vmem>>, %arg32: memref<256x16xf32, #tpu.memory_space<vmem>>, %arg33: memref<128x16xf32, #tpu.memory_space<vmem>>, %arg34: memref<2x17x32xf32, #tpu.memory_space<vmem>>, %arg35: memref<2x17x64xf32, #tpu.memory_space<vmem>>) attributes {dimension_semantics = [], scalar_prefetch = 0 : i64, scratch_operands = 4 : i64, tpu.core_type = #tpu.core_type<tc>} {
    %c0 = arith.constant 0 : index
    %c0_0 = arith.constant 0 : index
    %0 = vector.load %arg0[%c0, %c0_0] : memref<256x10xf32, #tpu.memory_space<vmem>>, vector<256x10xf32>
    %c0_1 = arith.constant 0 : index
    %c0_2 = arith.constant 0 : index
    %1 = vector.load %arg1[%c0_1, %c0_2] : memref<10x16xf32, #tpu.memory_space<vmem>>, vector<10x16xf32>
    %cst = arith.constant dense<0.000000e+00> : vector<256x16xf32>
    %2 = tpu.matmul %0, %1, %cst {dimension_numbers = #tpu.dot_dimension_numbers<[1], [0], [0], [1], [0, 0, 1, 1], [], []>} : vector<256x10xf32>, vector<10x16xf32>, vector<256x16xf32> -> vector<256x16xf32>
    %c0_3 = arith.constant 0 : index
    %c0_4 = arith.constant 0 : index
    %3 = vector.load %arg2[%c0_3, %c0_4] : memref<1x16xf32, #tpu.memory_space<vmem>>, vector<1x16xf32>
    %4 = vector.broadcast %3 : vector<1x16xf32> to vector<256x16xf32>
    %5 = arith.mulf %2, %4 : vector<256x16xf32>
    %c0_5 = arith.constant 0 : index
    %c0_6 = arith.constant 0 : index
    %6 = vector.load %arg3[%c0_5, %c0_6] : memref<1x16xf32, #tpu.memory_space<vmem>>, vector<1x16xf32>
    %7 = vector.broadcast %6 : vector<1x16xf32> to vector<256x16xf32>
    %8 = arith.addf %5, %7 : vector<256x16xf32>
    %cst_7 = arith.constant 0.000000e+00 : f32
    %9 = vector.broadcast %cst_7 : f32 to vector<256x16xf32>
    %10 = arith.maximumf %8, %9 : vector<256x16xf32>
    %c0_8 = arith.constant 0 : index
    %c0_9 = arith.constant 0 : index
    %11 = vector.load %arg32[%c0_8, %c0_9] : memref<256x16xf32, #tpu.memory_space<vmem>>, vector<256x16xf32>
    tpu.vector_store %arg32[%c0_8, %c0_9], %10 {strides = array<i32>} : memref<256x16xf32, #tpu.memory_space<vmem>>, vector<256x16xf32>,
    %cst_10 = arith.constant 0.000000e+00 : f32
    %12 = vector.broadcast %cst_10 : f32 to vector<2x17x32xf32>
    %c0_11 = arith.constant 0 : index
    %c0_12 = arith.constant 0 : index
    %c0_13 = arith.constant 0 : index
    %13 = vector.load %arg34[%c0_11, %c0_12, %c0_13] : memref<2x17x32xf32, #tpu.memory_space<vmem>>, vector<2x17x32xf32>
    tpu.vector_store %arg34[%c0_11, %c0_12, %c0_13], %12 {strides = array<i32>} : memref<2x17x32xf32, #tpu.memory_space<vmem>>, vector<2x17x32xf32>,
    %cst_14 = arith.constant 0.000000e+00 : f32
    %14 = vector.broadcast %cst_14 : f32 to vector<2x17x64xf32>
    %c0_15 = arith.constant 0 : index
    %c0_16 = arith.constant 0 : index
    %c0_17 = arith.constant 0 : index
    %15 = vector.load %arg35[%c0_15, %c0_16, %c0_17] : memref<2x17x64xf32, #tpu.memory_space<vmem>>, vector<2x17x64xf32>
    tpu.vector_store %arg35[%c0_15, %c0_16, %c0_17], %14 {strides = array<i32>} : memref<2x17x64xf32, #tpu.memory_space<vmem>>, vector<2x17x64xf32>,
    %c0_18 = arith.constant 0 : index
    %c0_19 = arith.constant 0 : index
    %16 = vector.load %arg32[%c0_18, %c0_19] : memref<256x16xf32, #tpu.memory_space<vmem>>, vector<16x16xf32>
    %c32 = arith.constant 32 : index
    %c0_20 = arith.constant 0 : index
    %17 = vector.load %arg32[%c32, %c0_20] : memref<256x16xf32, #tpu.memory_space<vmem>>, vector<16x16xf32>
    %18 = arith.maximumf %16, %17 : vector<16x16xf32>
    %c0_21 = arith.constant 0 : index
    %c0_22 = arith.constant 0 : index
    %19 = vector.load %arg33[%c0_21, %c0_22] : memref<128x16xf32, #tpu.memory_space<vmem>>, vector<16x16xf32>
    tpu.vector_store %arg33[%c0_21, %c0_22], %18 {strides = array<i32>} : memref<128x16xf32, #tpu.memory_space<vmem>>, vector<16x16xf32>,
    %c64 = arith.constant 64 : index
    %c0_23 = arith.constant 0 : index
    %20 = vector.load %arg32[%c64, %c0_23] : memref<256x16xf32, #tpu.memory_space<vmem>>, vector<16x16xf32>
    %c96 = arith.constant 96 : index
    %c0_24 = arith.constant 0 : index
    %21 = vector.load %arg32[%c96, %c0_24] : memref<256x16xf32, #tpu.memory_space<vmem>>, vector<16x16xf32>
    %22 = arith.maximumf %20, %21 : vector<16x16xf32>
    %c16 = arith.constant 16 : index
    %c0_25 = arith.constant 0 : index
    %23 = vector.load %arg33[%c16, %c0_25] : memref<128x16xf32, #tpu.memory_space<vmem>>, vector<16x16xf32>
    tpu.vector_store %arg33[%c16, %c0_25], %22 {strides = array<i32>} : memref<128x16xf32, #tpu.memory_space<vmem>>, vector<16x16xf32>,
    %c128 = arith.constant 128 : index
    %c0_26 = arith.constant 0 : index
    %24 = vector.load %arg32[%c128, %c0_26] : memref<256x16xf32, #tpu.memory_space<vmem>>, vector<16x16xf32>
    %c160 = arith.constant 160 : index
    %c0_27 = arith.constant 0 : index
    %25 = vector.load %arg32[%c160, %c0_27] : memref<256x16xf32, #tpu.memory_space<vmem>>, vector<16x16xf32>
    %26 = arith.maximumf %24, %25 : vector<16x16xf32>
    %c32_28 = arith.constant 32 : index
    %c0_29 = arith.constant 0 : index
    %27 = vector.load %arg33[%c32_28, %c0_29] : memref<128x16xf32, #tpu.memory_space<vmem>>, vector<16x16xf32>
    tpu.vector_store %arg33[%c32_28, %c0_29], %26 {strides = array<i32>} : memref<128x16xf32, #tpu.memory_space<vmem>>, vector<16x16xf32>,
    %c192 = arith.constant 192 : index
    %c0_30 = arith.constant 0 : index
    %28 = vector.load %arg32[%c192, %c0_30] : memref<256x16xf32, #tpu.memory_space<vmem>>, vector<16x16xf32>
    %c224 = arith.constant 224 : index
    %c0_31 = arith.constant 0 : index
    %29 = vector.load %arg32[%c224, %c0_31] : memref<256x16xf32, #tpu.memory_space<vmem>>, vector<16x16xf32>
    %30 = arith.maximumf %28, %29 : vector<16x16xf32>
    %c48 = arith.constant 48 : index
    %c0_32 = arith.constant 0 : index
    %31 = vector.load %arg33[%c48, %c0_32] : memref<128x16xf32, #tpu.memory_space<vmem>>, vector<16x16xf32>
    tpu.vector_store %arg33[%c48, %c0_32], %30 {strides = array<i32>} : memref<128x16xf32, #tpu.memory_space<vmem>>, vector<16x16xf32>,
    %c0_33 = arith.constant 0 : index
    %c0_34 = arith.constant 0 : index
    %32 = vector.load %arg33[%c0_33, %c0_34] : memref<128x16xf32, #tpu.memory_space<vmem>>, vector<13x16xf32>
    %c16_35 = arith.constant 16 : index
    %c0_36 = arith.constant 0 : index
    %33 = vector.load %arg33[%c16_35, %c0_36] : memref<128x16xf32, #tpu.memory_space<vmem>>, vector<13x16xf32>
    %c32_37 = arith.constant 32 : index
    %c0_38 = arith.constant 0 : index
    %34 = vector.load %arg33[%c32_37, %c0_38] : memref<128x16xf32, #tpu.memory_space<vmem>>, vector<13x16xf32>
    %c48_39 = arith.constant 48 : index
    %c0_40 = arith.constant 0 : index
    %35 = vector.load %arg33[%c48_39, %c0_40] : memref<128x16xf32, #tpu.memory_space<vmem>>, vector<13x16xf32>
    %c1 = arith.constant 1 : index
    %c0_41 = arith.constant 0 : index
    %36 = vector.load %arg33[%c1, %c0_41] : memref<128x16xf32, #tpu.memory_space<vmem>>, vector<13x16xf32>
    %c17 = arith.constant 17 : index
    %c0_42 = arith.constant 0 : index
    %37 = vector.load %arg33[%c17, %c0_42] : memref<128x16xf32, #tpu.memory_space<vmem>>, vector<13x16xf32>
    %c33 = arith.constant 33 : index
    %c0_43 = arith.constant 0 : index
    %38 = vector.load %arg33[%c33, %c0_43] : memref<128x16xf32, #tpu.memory_space<vmem>>, vector<13x16xf32>
    %c49 = arith.constant 49 : index
    %c0_44 = arith.constant 0 : index
    %39 = vector.load %arg33[%c49, %c0_44] : memref<128x16xf32, #tpu.memory_space<vmem>>, vector<13x16xf32>
    %c2 = arith.constant 2 : index
    %c0_45 = arith.constant 0 : index
    %40 = vector.load %arg33[%c2, %c0_45] : memref<128x16xf32, #tpu.memory_space<vmem>>, vector<13x16xf32>
    %c18 = arith.constant 18 : index
    %c0_46 = arith.constant 0 : index
    %41 = vector.load %arg33[%c18, %c0_46] : memref<128x16xf32, #tpu.memory_space<vmem>>, vector<13x16xf32>
    %42 = tpu.concatenate %32, %33, %34, %35, %36, %37, %38, %39, %40, %41 in 1 : vector<13x16xf32>, vector<13x16xf32>, vector<13x16xf32>, vector<13x16xf32>, vector<13x16xf32>, vector<13x16xf32>, vector<13x16xf32>, vector<13x16xf32>, vector<13x16xf32>, vector<13x16xf32> -> vector<13x160xf32>
    %c0_47 = arith.constant 0 : index
    %c0_48 = arith.constant 0 : index
    %43 = vector.load %arg4[%c0_47, %c0_48] : memref<160x32xf32, #tpu.memory_space<vmem>>, vector<160x32xf32>
    %cst_49 = arith.constant dense<0.000000e+00> : vector<13x32xf32>
    %44 = tpu.matmul %42, %43, %cst_49 {dimension_numbers = #tpu.dot_dimension_numbers<[1], [0], [0], [1], [0, 0, 1, 1], [], []>} : vector<13x160xf32>, vector<160x32xf32>, vector<13x32xf32> -> vector<13x32xf32>
    %c0_50 = arith.constant 0 : index
    %c0_51 = arith.constant 0 : index
    %45 = vector.load %arg5[%c0_50, %c0_51] : memref<1x32xf32, #tpu.memory_space<vmem>>, vector<1x32xf32>
    %46 = vector.broadcast %45 : vector<1x32xf32> to vector<13x32xf32>
    %47 = arith.addf %44, %46 : vector<13x32xf32>
    %cst_52 = arith.constant 0.000000e+00 : f32
    %48 = vector.broadcast %cst_52 : f32 to vector<13x32xf32>
    %49 = arith.maximumf %47, %48 : vector<13x32xf32>
    %c32_53 = arith.constant 32 : index
    %c0_54 = arith.constant 0 : index
    %50 = vector.load %arg33[%c32_53, %c0_54] : memref<128x16xf32, #tpu.memory_space<vmem>>, vector<13x16xf32>
    %c48_55 = arith.constant 48 : index
    %c0_56 = arith.constant 0 : index
    %51 = vector.load %arg33[%c48_55, %c0_56] : memref<128x16xf32, #tpu.memory_space<vmem>>, vector<13x16xf32>
    %c1_57 = arith.constant 1 : index
    %c0_58 = arith.constant 0 : index
    %52 = vector.load %arg33[%c1_57, %c0_58] : memref<128x16xf32, #tpu.memory_space<vmem>>, vector<13x16xf32>
    %c17_59 = arith.constant 17 : index
    %c0_60 = arith.constant 0 : index
    %53 = vector.load %arg33[%c17_59, %c0_60] : memref<128x16xf32, #tpu.memory_space<vmem>>, vector<13x16xf32>
    %c33_61 = arith.constant 33 : index
    %c0_62 = arith.constant 0 : index
    %54 = vector.load %arg33[%c33_61, %c0_62] : memref<128x16xf32, #tpu.memory_space<vmem>>, vector<13x16xf32>
    %c49_63 = arith.constant 49 : index
    %c0_64 = arith.constant 0 : index
    %55 = vector.load %arg33[%c49_63, %c0_64] : memref<128x16xf32, #tpu.memory_space<vmem>>, vector<13x16xf32>
    %c2_65 = arith.constant 2 : index
    %c0_66 = arith.constant 0 : index
    %56 = vector.load %arg33[%c2_65, %c0_66] : memref<128x16xf32, #tpu.memory_space<vmem>>, vector<13x16xf32>
    %c18_67 = arith.constant 18 : index
    %c0_68 = arith.constant 0 : index
    %57 = vector.load %arg33[%c18_67, %c0_68] : memref<128x16xf32, #tpu.memory_space<vmem>>, vector<13x16xf32>
    %c34 = arith.constant 34 : index
    %c0_69 = arith.constant 0 : index
    %58 = vector.load %arg33[%c34, %c0_69] : memref<128x16xf32, #tpu.memory_space<vmem>>, vector<13x16xf32>
    %c50 = arith.constant 50 : index
    %c0_70 = arith.constant 0 : index
    %59 = vector.load %arg33[%c50, %c0_70] : memref<128x16xf32, #tpu.memory_space<vmem>>, vector<13x16xf32>
    %60 = tpu.concatenate %50, %51, %52, %53, %54, %55, %56, %57, %58, %59 in 1 : vector<13x16xf32>, vector<13x16xf32>, vector<13x16xf32>, vector<13x16xf32>, vector<13x16xf32>, vector<13x16xf32>, vector<13x16xf32>, vector<13x16xf32>, vector<13x16xf32>, vector<13x16xf32> -> vector<13x160xf32>
    %c0_71 = arith.constant 0 : index
    %c0_72 = arith.constant 0 : index
    %61 = vector.load %arg4[%c0_71, %c0_72] : memref<160x32xf32, #tpu.memory_space<vmem>>, vector<160x32xf32>
    %cst_73 = arith.constant dense<0.000000e+00> : vector<13x32xf32>
    %62 = tpu.matmul %60, %61, %cst_73 {dimension_numbers = #tpu.dot_dimension_numbers<[1], [0], [0], [1], [0, 0, 1, 1], [], []>} : vector<13x160xf32>, vector<160x32xf32>, vector<13x32xf32> -> vector<13x32xf32>
    %c0_74 = arith.constant 0 : index
    %c0_75 = arith.constant 0 : index
    %63 = vector.load %arg5[%c0_74, %c0_75] : memref<1x32xf32, #tpu.memory_space<vmem>>, vector<1x32xf32>
    %64 = vector.broadcast %63 : vector<1x32xf32> to vector<13x32xf32>
    %65 = arith.addf %62, %64 : vector<13x32xf32>
    %cst_76 = arith.constant 0.000000e+00 : f32
    %66 = vector.broadcast %cst_76 : f32 to vector<13x32xf32>
    %67 = arith.maximumf %65, %66 : vector<13x32xf32>
    %68 = arith.maximumf %49, %67 : vector<13x32xf32>
    %c0_77 = arith.constant 0 : index
    %c2_78 = arith.constant 2 : index
    %c0_79 = arith.constant 0 : index
    %69 = vector.load %arg34[%c0_77, %c2_78, %c0_79] : memref<2x17x32xf32, #tpu.memory_space<vmem>>, vector<1x13x32xf32>
    %70 = vector.shape_cast %69 : vector<1x13x32xf32> to vector<13x32xf32>
    %71 = vector.shape_cast %68 : vector<13x32xf32> to vector<1x13x32xf32>
    tpu.vector_store %arg34[%c0_77, %c2_78, %c0_79], %71 {strides = array<i32>} : memref<2x17x32xf32, #tpu.memory_space<vmem>>, vector<1x13x32xf32>,
    %c0_80 = arith.constant 0 : index
    %c2_81 = arith.constant 2 : index
    %c0_82 = arith.constant 0 : index
    %72 = vector.load %arg34[%c0_80, %c2_81, %c0_82] : memref<2x17x32xf32, #tpu.memory_space<vmem>>, vector<1x13x32xf32>
    %73 = vector.shape_cast %72 : vector<1x13x32xf32> to vector<13x32xf32>
    %c0_83 = arith.constant 0 : index
    %c1_84 = arith.constant 1 : index
    %c0_85 = arith.constant 0 : index
    %74 = vector.load %arg34[%c0_83, %c1_84, %c0_85] : memref<2x17x32xf32, #tpu.memory_space<vmem>>, vector<1x13x32xf32>
    %75 = vector.shape_cast %74 : vector<1x13x32xf32> to vector<13x32xf32>
    %c0_86 = arith.constant 0 : index
    %c3 = arith.constant 3 : index
    %c0_87 = arith.constant 0 : index
    %76 = vector.load %arg34[%c0_86, %c3, %c0_87] : memref<2x17x32xf32, #tpu.memory_space<vmem>>, vector<1x13x32xf32>
    %77 = vector.shape_cast %76 : vector<1x13x32xf32> to vector<13x32xf32>
    %c0_88 = arith.constant 0 : index
    %c0_89 = arith.constant 0 : index
    %c0_90 = arith.constant 0 : index
    %78 = vector.load %arg34[%c0_88, %c0_89, %c0_90] : memref<2x17x32xf32, #tpu.memory_space<vmem>>, vector<1x13x32xf32>
    %79 = vector.shape_cast %78 : vector<1x13x32xf32> to vector<13x32xf32>
    %c0_91 = arith.constant 0 : index
    %c4 = arith.constant 4 : index
    %c0_92 = arith.constant 0 : index
    %80 = vector.load %arg34[%c0_91, %c4, %c0_92] : memref<2x17x32xf32, #tpu.memory_space<vmem>>, vector<1x13x32xf32>
    %81 = vector.shape_cast %80 : vector<1x13x32xf32> to vector<13x32xf32>
    %82 = tpu.concatenate %75, %73, %77 in 1 : vector<13x32xf32>, vector<13x32xf32>, vector<13x32xf32> -> vector<13x96xf32>
    %83 = tpu.concatenate %79, %73, %81 in 1 : vector<13x32xf32>, vector<13x32xf32>, vector<13x32xf32> -> vector<13x96xf32>
    %84 = arith.maximumf %75, %73 : vector<13x32xf32>
    %85 = arith.maximumf %84, %77 : vector<13x32xf32>
    %c0_93 = arith.constant 0 : index
    %c0_94 = arith.constant 0 : index
    %86 = vector.load %arg6[%c0_93, %c0_94] : memref<32x16xf32, #tpu.memory_space<vmem>>, vector<32x16xf32>
    %cst_95 = arith.constant dense<0.000000e+00> : vector<13x16xf32>
    %87 = tpu.matmul %73, %86, %cst_95 {dimension_numbers = #tpu.dot_dimension_numbers<[1], [0], [0], [1], [0, 0, 1, 1], [], []>} : vector<13x32xf32>, vector<32x16xf32>, vector<13x16xf32> -> vector<13x16xf32>
    %c0_96 = arith.constant 0 : index
    %c0_97 = arith.constant 0 : index
    %88 = vector.load %arg7[%c0_96, %c0_97] : memref<96x16xf32, #tpu.memory_space<vmem>>, vector<96x16xf32>
    %cst_98 = arith.constant dense<0.000000e+00> : vector<13x16xf32>
    %89 = tpu.matmul %82, %88, %cst_98 {dimension_numbers = #tpu.dot_dimension_numbers<[1], [0], [0], [1], [0, 0, 1, 1], [], []>} : vector<13x96xf32>, vector<96x16xf32>, vector<13x16xf32> -> vector<13x16xf32>
    %c0_99 = arith.constant 0 : index
    %c0_100 = arith.constant 0 : index
    %90 = vector.load %arg8[%c0_99, %c0_100] : memref<96x16xf32, #tpu.memory_space<vmem>>, vector<96x16xf32>
    %cst_101 = arith.constant dense<0.000000e+00> : vector<13x16xf32>
    %91 = tpu.matmul %83, %90, %cst_101 {dimension_numbers = #tpu.dot_dimension_numbers<[1], [0], [0], [1], [0, 0, 1, 1], [], []>} : vector<13x96xf32>, vector<96x16xf32>, vector<13x16xf32> -> vector<13x16xf32>
    %c0_102 = arith.constant 0 : index
    %c0_103 = arith.constant 0 : index
    %92 = vector.load %arg9[%c0_102, %c0_103] : memref<32x16xf32, #tpu.memory_space<vmem>>, vector<32x16xf32>
    %cst_104 = arith.constant dense<0.000000e+00> : vector<13x16xf32>
    %93 = tpu.matmul %85, %92, %cst_104 {dimension_numbers = #tpu.dot_dimension_numbers<[1], [0], [0], [1], [0, 0, 1, 1], [], []>} : vector<13x32xf32>, vector<32x16xf32>, vector<13x16xf32> -> vector<13x16xf32>
    %94 = tpu.concatenate %87, %89, %91, %93 in 1 : vector<13x16xf32>, vector<13x16xf32>, vector<13x16xf32>, vector<13x16xf32> -> vector<13x64xf32>
    %c0_105 = arith.constant 0 : index
    %c0_106 = arith.constant 0 : index
    %95 = vector.load %arg10[%c0_105, %c0_106] : memref<1x64xf32, #tpu.memory_space<vmem>>, vector<1x64xf32>
    %96 = vector.broadcast %95 : vector<1x64xf32> to vector<13x64xf32>
    %97 = arith.mulf %94, %96 : vector<13x64xf32>
    %c0_107 = arith.constant 0 : index
    %c0_108 = arith.constant 0 : index
    %98 = vector.load %arg11[%c0_107, %c0_108] : memref<1x64xf32, #tpu.memory_space<vmem>>, vector<1x64xf32>
    %99 = vector.broadcast %98 : vector<1x64xf32> to vector<13x64xf32>
    %100 = arith.addf %97, %99 : vector<13x64xf32>
    %cst_109 = arith.constant 0.000000e+00 : f32
    %101 = vector.broadcast %cst_109 : f32 to vector<13x64xf32>
    %102 = arith.maximumf %100, %101 : vector<13x64xf32>
    %cst_110 = arith.constant dense<0.000000e+00> : vector<64xf32>
    %103 = vector.multi_reduction <add>, %102, %cst_110 [0] : vector<13x64xf32> to vector<64xf32>
    %104 = vector.shape_cast %103 : vector<64xf32> to vector<1x64xf32>
    %cst_111 = arith.constant 1.300000e+01 : f32
    %105 = vector.broadcast %cst_111 : f32 to vector<1x64xf32>
    %106 = arith.divf %104, %105 : vector<1x64xf32>
    %c0_112 = arith.constant 0 : index
    %c0_113 = arith.constant 0 : index
    %107 = vector.load %arg12[%c0_112, %c0_113] : memref<4x64xf32, #tpu.memory_space<vmem>>, vector<4x64xf32>
    %108 = vector.broadcast %106 : vector<1x64xf32> to vector<4x64xf32>
    %109 = arith.mulf %107, %108 : vector<4x64xf32>
    %cst_114 = arith.constant dense<0.000000e+00> : vector<4xf32>
    %110 = vector.multi_reduction <add>, %109, %cst_114 [1] : vector<4x64xf32> to vector<4xf32>
    %111 = vector.shape_cast %110 : vector<4xf32> to vector<4x1xf32>
    %c0_115 = arith.constant 0 : index
    %c0_116 = arith.constant 0 : index
    %112 = vector.load %arg13[%c0_115, %c0_116] : memref<4x1xf32, #tpu.memory_space<vmem>>, vector<4x1xf32>
    %113 = arith.addf %111, %112 : vector<4x1xf32>
    %cst_117 = arith.constant 0.000000e+00 : f32
    %114 = vector.broadcast %cst_117 : f32 to vector<4x1xf32>
    %115 = arith.maximumf %113, %114 : vector<4x1xf32>
    %c0_118 = arith.constant 0 : index
    %c0_119 = arith.constant 0 : index
    %116 = vector.load %arg14[%c0_118, %c0_119] : memref<4x64xf32, #tpu.memory_space<vmem>>, vector<4x64xf32>
    %117 = vector.broadcast %115 : vector<4x1xf32> to vector<4x64xf32>
    %118 = arith.mulf %116, %117 : vector<4x64xf32>
    %cst_120 = arith.constant dense<0.000000e+00> : vector<64xf32>
    %119 = vector.multi_reduction <add>, %118, %cst_120 [0] : vector<4x64xf32> to vector<64xf32>
    %120 = vector.shape_cast %119 : vector<64xf32> to vector<1x64xf32>
    %c0_121 = arith.constant 0 : index
    %c0_122 = arith.constant 0 : index
    %121 = vector.load %arg15[%c0_121, %c0_122] : memref<1x64xf32, #tpu.memory_space<vmem>>, vector<1x64xf32>
    %122 = arith.addf %120, %121 : vector<1x64xf32>
    %123 = arith.negf %122 : vector<1x64xf32>
    %124 = math.exp %123 : vector<1x64xf32>
    %cst_123 = arith.constant 1.000000e+00 : f32
    %125 = vector.broadcast %cst_123 : f32 to vector<1x64xf32>
    %126 = arith.addf %125, %124 : vector<1x64xf32>
    %127 = arith.divf %125, %126 : vector<1x64xf32>
    %128 = vector.broadcast %127 : vector<1x64xf32> to vector<13x64xf32>
    %129 = arith.mulf %102, %128 : vector<13x64xf32>
    %c0_124 = arith.constant 0 : index
    %c2_125 = arith.constant 2 : index
    %c0_126 = arith.constant 0 : index
    %130 = vector.load %arg35[%c0_124, %c2_125, %c0_126] : memref<2x17x64xf32, #tpu.memory_space<vmem>>, vector<1x13x64xf32>
    %131 = vector.shape_cast %130 : vector<1x13x64xf32> to vector<13x64xf32>
    %132 = vector.shape_cast %129 : vector<13x64xf32> to vector<1x13x64xf32>
    tpu.vector_store %arg35[%c0_124, %c2_125, %c0_126], %132 {strides = array<i32>} : memref<2x17x64xf32, #tpu.memory_space<vmem>>, vector<1x13x64xf32>,
    %c0_127 = arith.constant 0 : index
    %c2_128 = arith.constant 2 : index
    %c0_129 = arith.constant 0 : index
    %133 = vector.load %arg35[%c0_127, %c2_128, %c0_129] : memref<2x17x64xf32, #tpu.memory_space<vmem>>, vector<1x13x64xf32>
    %134 = vector.shape_cast %133 : vector<1x13x64xf32> to vector<13x64xf32>
    %c0_130 = arith.constant 0 : index
    %c1_131 = arith.constant 1 : index
    %c0_132 = arith.constant 0 : index
    %135 = vector.load %arg35[%c0_130, %c1_131, %c0_132] : memref<2x17x64xf32, #tpu.memory_space<vmem>>, vector<1x13x64xf32>
    %136 = vector.shape_cast %135 : vector<1x13x64xf32> to vector<13x64xf32>
    %c0_133 = arith.constant 0 : index
    %c3_134 = arith.constant 3 : index
    %c0_135 = arith.constant 0 : index
    %137 = vector.load %arg35[%c0_133, %c3_134, %c0_135] : memref<2x17x64xf32, #tpu.memory_space<vmem>>, vector<1x13x64xf32>
    %138 = vector.shape_cast %137 : vector<1x13x64xf32> to vector<13x64xf32>
    %c0_136 = arith.constant 0 : index
    %c0_137 = arith.constant 0 : index
    %c0_138 = arith.constant 0 : index
    %139 = vector.load %arg35[%c0_136, %c0_137, %c0_138] : memref<2x17x64xf32, #tpu.memory_space<vmem>>, vector<1x13x64xf32>
    %140 = vector.shape_cast %139 : vector<1x13x64xf32> to vector<13x64xf32>
    %c0_139 = arith.constant 0 : index
    %c4_140 = arith.constant 4 : index
    %c0_141 = arith.constant 0 : index
    %141 = vector.load %arg35[%c0_139, %c4_140, %c0_141] : memref<2x17x64xf32, #tpu.memory_space<vmem>>, vector<1x13x64xf32>
    %142 = vector.shape_cast %141 : vector<1x13x64xf32> to vector<13x64xf32>
    %143 = tpu.concatenate %136, %134, %138 in 1 : vector<13x64xf32>, vector<13x64xf32>, vector<13x64xf32> -> vector<13x192xf32>
    %144 = tpu.concatenate %140, %134, %142 in 1 : vector<13x64xf32>, vector<13x64xf32>, vector<13x64xf32> -> vector<13x192xf32>
    %145 = arith.maximumf %136, %134 : vector<13x64xf32>
    %146 = arith.maximumf %145, %138 : vector<13x64xf32>
    %c0_142 = arith.constant 0 : index
    %c0_143 = arith.constant 0 : index
    %147 = vector.load %arg16[%c0_142, %c0_143] : memref<64x32xf32, #tpu.memory_space<vmem>>, vector<64x32xf32>
    %cst_144 = arith.constant dense<0.000000e+00> : vector<13x32xf32>
    %148 = tpu.matmul %134, %147, %cst_144 {dimension_numbers = #tpu.dot_dimension_numbers<[1], [0], [0], [1], [0, 0, 1, 1], [], []>} : vector<13x64xf32>, vector<64x32xf32>, vector<13x32xf32> -> vector<13x32xf32>
    %c0_145 = arith.constant 0 : index
    %c0_146 = arith.constant 0 : index
    %149 = vector.load %arg17[%c0_145, %c0_146] : memref<192x32xf32, #tpu.memory_space<vmem>>, vector<192x32xf32>
    %cst_147 = arith.constant dense<0.000000e+00> : vector<13x32xf32>
    %150 = tpu.matmul %143, %149, %cst_147 {dimension_numbers = #tpu.dot_dimension_numbers<[1], [0], [0], [1], [0, 0, 1, 1], [], []>} : vector<13x192xf32>, vector<192x32xf32>, vector<13x32xf32> -> vector<13x32xf32>
    %c0_148 = arith.constant 0 : index
    %c0_149 = arith.constant 0 : index
    %151 = vector.load %arg18[%c0_148, %c0_149] : memref<192x32xf32, #tpu.memory_space<vmem>>, vector<192x32xf32>
    %cst_150 = arith.constant dense<0.000000e+00> : vector<13x32xf32>
    %152 = tpu.matmul %144, %151, %cst_150 {dimension_numbers = #tpu.dot_dimension_numbers<[1], [0], [0], [1], [0, 0, 1, 1], [], []>} : vector<13x192xf32>, vector<192x32xf32>, vector<13x32xf32> -> vector<13x32xf32>
    %c0_151 = arith.constant 0 : index
    %c0_152 = arith.constant 0 : index
    %153 = vector.load %arg19[%c0_151, %c0_152] : memref<64x32xf32, #tpu.memory_space<vmem>>, vector<64x32xf32>
    %cst_153 = arith.constant dense<0.000000e+00> : vector<13x32xf32>
    %154 = tpu.matmul %146, %153, %cst_153 {dimension_numbers = #tpu.dot_dimension_numbers<[1], [0], [0], [1], [0, 0, 1, 1], [], []>} : vector<13x64xf32>, vector<64x32xf32>, vector<13x32xf32> -> vector<13x32xf32>
    %155 = tpu.concatenate %148, %150, %152, %154 in 1 : vector<13x32xf32>, vector<13x32xf32>, vector<13x32xf32>, vector<13x32xf32> -> vector<13x128xf32>
    %c0_154 = arith.constant 0 : index
    %c0_155 = arith.constant 0 : index
    %156 = vector.load %arg20[%c0_154, %c0_155] : memref<1x128xf32, #tpu.memory_space<vmem>>, vector<1x128xf32>
    %157 = vector.broadcast %156 : vector<1x128xf32> to vector<13x128xf32>
    %158 = arith.mulf %155, %157 : vector<13x128xf32>
    %c0_156 = arith.constant 0 : index
    %c0_157 = arith.constant 0 : index
    %159 = vector.load %arg21[%c0_156, %c0_157] : memref<1x128xf32, #tpu.memory_space<vmem>>, vector<1x128xf32>
    %160 = vector.broadcast %159 : vector<1x128xf32> to vector<13x128xf32>
    %161 = arith.addf %158, %160 : vector<13x128xf32>
    %cst_158 = arith.constant 0.000000e+00 : f32
    %162 = vector.broadcast %cst_158 : f32 to vector<13x128xf32>
    %163 = arith.maximumf %161, %162 : vector<13x128xf32>
    %cst_159 = arith.constant dense<0.000000e+00> : vector<128xf32>
    %164 = vector.multi_reduction <add>, %163, %cst_159 [0] : vector<13x128xf32> to vector<128xf32>
    %165 = vector.shape_cast %164 : vector<128xf32> to vector<1x128xf32>
    %cst_160 = arith.constant 1.300000e+01 : f32
    %166 = vector.broadcast %cst_160 : f32 to vector<1x128xf32>
    %167 = arith.divf %165, %166 : vector<1x128xf32>
    %c0_161 = arith.constant 0 : index
    %c0_162 = arith.constant 0 : index
    %168 = vector.load %arg22[%c0_161, %c0_162] : memref<8x128xf32, #tpu.memory_space<vmem>>, vector<8x128xf32>
    %169 = vector.broadcast %167 : vector<1x128xf32> to vector<8x128xf32>
    %170 = arith.mulf %168, %169 : vector<8x128xf32>
    %cst_163 = arith.constant dense<0.000000e+00> : vector<8xf32>
    %171 = vector.multi_reduction <add>, %170, %cst_163 [1] : vector<8x128xf32> to vector<8xf32>
    %172 = vector.shape_cast %171 : vector<8xf32> to vector<8x1xf32>
    %c0_164 = arith.constant 0 : index
    %c0_165 = arith.constant 0 : index
    %173 = vector.load %arg23[%c0_164, %c0_165] : memref<8x1xf32, #tpu.memory_space<vmem>>, vector<8x1xf32>
    %174 = arith.addf %172, %173 : vector<8x1xf32>
    %cst_166 = arith.constant 0.000000e+00 : f32
    %175 = vector.broadcast %cst_166 : f32 to vector<8x1xf32>
    %176 = arith.maximumf %174, %175 : vector<8x1xf32>
    %c0_167 = arith.constant 0 : index
    %c0_168 = arith.constant 0 : index
    %177 = vector.load %arg24[%c0_167, %c0_168] : memref<8x128xf32, #tpu.memory_space<vmem>>, vector<8x128xf32>
    %178 = vector.broadcast %176 : vector<8x1xf32> to vector<8x128xf32>
    %179 = arith.mulf %177, %178 : vector<8x128xf32>
    %cst_169 = arith.constant dense<0.000000e+00> : vector<128xf32>
    %180 = vector.multi_reduction <add>, %179, %cst_169 [0] : vector<8x128xf32> to vector<128xf32>
    %181 = vector.shape_cast %180 : vector<128xf32> to vector<1x128xf32>
    %c0_170 = arith.constant 0 : index
    %c0_171 = arith.constant 0 : index
    %182 = vector.load %arg25[%c0_170, %c0_171] : memref<1x128xf32, #tpu.memory_space<vmem>>, vector<1x128xf32>
    %183 = arith.addf %181, %182 : vector<1x128xf32>
    %184 = arith.negf %183 : vector<1x128xf32>
    %185 = math.exp %184 : vector<1x128xf32>
    %cst_172 = arith.constant 1.000000e+00 : f32
    %186 = vector.broadcast %cst_172 : f32 to vector<1x128xf32>
    %187 = arith.addf %186, %185 : vector<1x128xf32>
    %188 = arith.divf %186, %187 : vector<1x128xf32>
    %189 = arith.mulf %167, %188 : vector<1x128xf32>
    %c0_173 = arith.constant 0 : index
    %c0_174 = arith.constant 0 : index
    %190 = vector.load %arg26[%c0_173, %c0_174] : memref<128x64xf32, #tpu.memory_space<vmem>>, vector<128x64xf32>
    %cst_175 = arith.constant dense<0.000000e+00> : vector<1x64xf32>
    %191 = tpu.matmul %189, %190, %cst_175 {dimension_numbers = #tpu.dot_dimension_numbers<[1], [0], [0], [1], [0, 0, 1, 1], [], []>} : vector<1x128xf32>, vector<128x64xf32>, vector<1x64xf32> -> vector<1x64xf32>
    %c0_176 = arith.constant 0 : index
    %c0_177 = arith.constant 0 : index
    %192 = vector.load %arg27[%c0_176, %c0_177] : memref<1x64xf32, #tpu.memory_space<vmem>>, vector<1x64xf32>
    %193 = arith.mulf %191, %192 : vector<1x64xf32>
    %c0_178 = arith.constant 0 : index
    %c0_179 = arith.constant 0 : index
    %194 = vector.load %arg28[%c0_178, %c0_179] : memref<1x64xf32, #tpu.memory_space<vmem>>, vector<1x64xf32>
    %195 = arith.addf %193, %194 : vector<1x64xf32>
    %cst_180 = arith.constant 0.000000e+00 : f32
    %196 = vector.broadcast %cst_180 : f32 to vector<1x64xf32>
    %197 = arith.maximumf %195, %196 : vector<1x64xf32>
    %c0_181 = arith.constant 0 : index
    %c0_182 = arith.constant 0 : index
    %198 = vector.load %arg29[%c0_181, %c0_182] : memref<64x2xf32, #tpu.memory_space<vmem>>, vector<64x2xf32>
    %cst_183 = arith.constant dense<0.000000e+00> : vector<1x2xf32>
    %199 = tpu.matmul %197, %198, %cst_183 {dimension_numbers = #tpu.dot_dimension_numbers<[1], [0], [0], [1], [0, 0, 1, 1], [], []>} : vector<1x64xf32>, vector<64x2xf32>, vector<1x2xf32> -> vector<1x2xf32>
    %c0_184 = arith.constant 0 : index
    %c0_185 = arith.constant 0 : index
    %200 = vector.load %arg30[%c0_184, %c0_185] : memref<1x2xf32, #tpu.memory_space<vmem>>, vector<1x2xf32>
    %201 = arith.addf %199, %200 : vector<1x2xf32>
    %cst_186 = arith.constant dense<0xFF800000> : vector<1xf32>
    %202 = vector.multi_reduction <maximumf>, %201, %cst_186 [1] : vector<1x2xf32> to vector<1xf32>
    %203 = vector.shape_cast %202 : vector<1xf32> to vector<1x1xf32>
    %204 = vector.broadcast %203 : vector<1x1xf32> to vector<1x2xf32>
    %205 = arith.subf %201, %204 : vector<1x2xf32>
    %206 = math.exp %205 : vector<1x2xf32>
    %cst_187 = arith.constant dense<0.000000e+00> : vector<1xf32>
    %207 = vector.multi_reduction <add>, %206, %cst_187 [1] : vector<1x2xf32> to vector<1xf32>
    %208 = vector.shape_cast %207 : vector<1xf32> to vector<1x1xf32>
    %209 = math.log %208 : vector<1x1xf32>
    %210 = vector.broadcast %209 : vector<1x1xf32> to vector<1x2xf32>
    %211 = arith.subf %205, %210 : vector<1x2xf32>
    %c0_188 = arith.constant 0 : index
    %c0_189 = arith.constant 0 : index
    %212 = vector.load %arg31[%c0_188, %c0_189] : memref<2x2xf32, #tpu.memory_space<vmem>>, vector<1x2xf32>
    tpu.vector_store %arg31[%c0_188, %c0_189], %211 {strides = array<i32>} : memref<2x2xf32, #tpu.memory_space<vmem>>, vector<1x2xf32>,
    %c16_190 = arith.constant 16 : index
    %c0_191 = arith.constant 0 : index
    %213 = vector.load %arg32[%c16_190, %c0_191] : memref<256x16xf32, #tpu.memory_space<vmem>>, vector<16x16xf32>
    %c48_192 = arith.constant 48 : index
    %c0_193 = arith.constant 0 : index
    %214 = vector.load %arg32[%c48_192, %c0_193] : memref<256x16xf32, #tpu.memory_space<vmem>>, vector<16x16xf32>
    %215 = arith.maximumf %213, %214 : vector<16x16xf32>
    %c64_194 = arith.constant 64 : index
    %c0_195 = arith.constant 0 : index
    %216 = vector.load %arg33[%c64_194, %c0_195] : memref<128x16xf32, #tpu.memory_space<vmem>>, vector<16x16xf32>
    tpu.vector_store %arg33[%c64_194, %c0_195], %215 {strides = array<i32>} : memref<128x16xf32, #tpu.memory_space<vmem>>, vector<16x16xf32>,
    %c80 = arith.constant 80 : index
    %c0_196 = arith.constant 0 : index
    %217 = vector.load %arg32[%c80, %c0_196] : memref<256x16xf32, #tpu.memory_space<vmem>>, vector<16x16xf32>
    %c112 = arith.constant 112 : index
    %c0_197 = arith.constant 0 : index
    %218 = vector.load %arg32[%c112, %c0_197] : memref<256x16xf32, #tpu.memory_space<vmem>>, vector<16x16xf32>
    %219 = arith.maximumf %217, %218 : vector<16x16xf32>
    %c80_198 = arith.constant 80 : index
    %c0_199 = arith.constant 0 : index
    %220 = vector.load %arg33[%c80_198, %c0_199] : memref<128x16xf32, #tpu.memory_space<vmem>>, vector<16x16xf32>
    tpu.vector_store %arg33[%c80_198, %c0_199], %219 {strides = array<i32>} : memref<128x16xf32, #tpu.memory_space<vmem>>, vector<16x16xf32>,
    %c144 = arith.constant 144 : index
    %c0_200 = arith.constant 0 : index
    %221 = vector.load %arg32[%c144, %c0_200] : memref<256x16xf32, #tpu.memory_space<vmem>>, vector<16x16xf32>
    %c176 = arith.constant 176 : index
    %c0_201 = arith.constant 0 : index
    %222 = vector.load %arg32[%c176, %c0_201] : memref<256x16xf32, #tpu.memory_space<vmem>>, vector<16x16xf32>
    %223 = arith.maximumf %221, %222 : vector<16x16xf32>
    %c96_202 = arith.constant 96 : index
    %c0_203 = arith.constant 0 : index
    %224 = vector.load %arg33[%c96_202, %c0_203] : memref<128x16xf32, #tpu.memory_space<vmem>>, vector<16x16xf32>
    tpu.vector_store %arg33[%c96_202, %c0_203], %223 {strides = array<i32>} : memref<128x16xf32, #tpu.memory_space<vmem>>, vector<16x16xf32>,
    %c208 = arith.constant 208 : index
    %c0_204 = arith.constant 0 : index
    %225 = vector.load %arg32[%c208, %c0_204] : memref<256x16xf32, #tpu.memory_space<vmem>>, vector<16x16xf32>
    %c240 = arith.constant 240 : index
    %c0_205 = arith.constant 0 : index
    %226 = vector.load %arg32[%c240, %c0_205] : memref<256x16xf32, #tpu.memory_space<vmem>>, vector<16x16xf32>
    %227 = arith.maximumf %225, %226 : vector<16x16xf32>
    %c112_206 = arith.constant 112 : index
    %c0_207 = arith.constant 0 : index
    %228 = vector.load %arg33[%c112_206, %c0_207] : memref<128x16xf32, #tpu.memory_space<vmem>>, vector<16x16xf32>
    tpu.vector_store %arg33[%c112_206, %c0_207], %227 {strides = array<i32>} : memref<128x16xf32, #tpu.memory_space<vmem>>, vector<16x16xf32>,
    %c64_208 = arith.constant 64 : index
    %c0_209 = arith.constant 0 : index
    %229 = vector.load %arg33[%c64_208, %c0_209] : memref<128x16xf32, #tpu.memory_space<vmem>>, vector<13x16xf32>
    %c80_210 = arith.constant 80 : index
    %c0_211 = arith.constant 0 : index
    %230 = vector.load %arg33[%c80_210, %c0_211] : memref<128x16xf32, #tpu.memory_space<vmem>>, vector<13x16xf32>
    %c96_212 = arith.constant 96 : index
    %c0_213 = arith.constant 0 : index
    %231 = vector.load %arg33[%c96_212, %c0_213] : memref<128x16xf32, #tpu.memory_space<vmem>>, vector<13x16xf32>
    %c112_214 = arith.constant 112 : index
    %c0_215 = arith.constant 0 : index
    %232 = vector.load %arg33[%c112_214, %c0_215] : memref<128x16xf32, #tpu.memory_space<vmem>>, vector<13x16xf32>
    %c65 = arith.constant 65 : index
    %c0_216 = arith.constant 0 : index
    %233 = vector.load %arg33[%c65, %c0_216] : memref<128x16xf32, #tpu.memory_space<vmem>>, vector<13x16xf32>
    %c81 = arith.constant 81 : index
    %c0_217 = arith.constant 0 : index
    %234 = vector.load %arg33[%c81, %c0_217] : memref<128x16xf32, #tpu.memory_space<vmem>>, vector<13x16xf32>
    %c97 = arith.constant 97 : index
    %c0_218 = arith.constant 0 : index
    %235 = vector.load %arg33[%c97, %c0_218] : memref<128x16xf32, #tpu.memory_space<vmem>>, vector<13x16xf32>
    %c113 = arith.constant 113 : index
    %c0_219 = arith.constant 0 : index
    %236 = vector.load %arg33[%c113, %c0_219] : memref<128x16xf32, #tpu.memory_space<vmem>>, vector<13x16xf32>
    %c66 = arith.constant 66 : index
    %c0_220 = arith.constant 0 : index
    %237 = vector.load %arg33[%c66, %c0_220] : memref<128x16xf32, #tpu.memory_space<vmem>>, vector<13x16xf32>
    %c82 = arith.constant 82 : index
    %c0_221 = arith.constant 0 : index
    %238 = vector.load %arg33[%c82, %c0_221] : memref<128x16xf32, #tpu.memory_space<vmem>>, vector<13x16xf32>
    %239 = tpu.concatenate %229, %230, %231, %232, %233, %234, %235, %236, %237, %238 in 1 : vector<13x16xf32>, vector<13x16xf32>, vector<13x16xf32>, vector<13x16xf32>, vector<13x16xf32>, vector<13x16xf32>, vector<13x16xf32>, vector<13x16xf32>, vector<13x16xf32>, vector<13x16xf32> -> vector<13x160xf32>
    %c0_222 = arith.constant 0 : index
    %c0_223 = arith.constant 0 : index
    %240 = vector.load %arg4[%c0_222, %c0_223] : memref<160x32xf32, #tpu.memory_space<vmem>>, vector<160x32xf32>
    %cst_224 = arith.constant dense<0.000000e+00> : vector<13x32xf32>
    %241 = tpu.matmul %239, %240, %cst_224 {dimension_numbers = #tpu.dot_dimension_numbers<[1], [0], [0], [1], [0, 0, 1, 1], [], []>} : vector<13x160xf32>, vector<160x32xf32>, vector<13x32xf32> -> vector<13x32xf32>
    %c0_225 = arith.constant 0 : index
    %c0_226 = arith.constant 0 : index
    %242 = vector.load %arg5[%c0_225, %c0_226] : memref<1x32xf32, #tpu.memory_space<vmem>>, vector<1x32xf32>
    %243 = vector.broadcast %242 : vector<1x32xf32> to vector<13x32xf32>
    %244 = arith.addf %241, %243 : vector<13x32xf32>
    %cst_227 = arith.constant 0.000000e+00 : f32
    %245 = vector.broadcast %cst_227 : f32 to vector<13x32xf32>
    %246 = arith.maximumf %244, %245 : vector<13x32xf32>
    %c96_228 = arith.constant 96 : index
    %c0_229 = arith.constant 0 : index
    %247 = vector.load %arg33[%c96_228, %c0_229] : memref<128x16xf32, #tpu.memory_space<vmem>>, vector<13x16xf32>
    %c112_230 = arith.constant 112 : index
    %c0_231 = arith.constant 0 : index
    %248 = vector.load %arg33[%c112_230, %c0_231] : memref<128x16xf32, #tpu.memory_space<vmem>>, vector<13x16xf32>
    %c65_232 = arith.constant 65 : index
    %c0_233 = arith.constant 0 : index
    %249 = vector.load %arg33[%c65_232, %c0_233] : memref<128x16xf32, #tpu.memory_space<vmem>>, vector<13x16xf32>
    %c81_234 = arith.constant 81 : index
    %c0_235 = arith.constant 0 : index
    %250 = vector.load %arg33[%c81_234, %c0_235] : memref<128x16xf32, #tpu.memory_space<vmem>>, vector<13x16xf32>
    %c97_236 = arith.constant 97 : index
    %c0_237 = arith.constant 0 : index
    %251 = vector.load %arg33[%c97_236, %c0_237] : memref<128x16xf32, #tpu.memory_space<vmem>>, vector<13x16xf32>
    %c113_238 = arith.constant 113 : index
    %c0_239 = arith.constant 0 : index
    %252 = vector.load %arg33[%c113_238, %c0_239] : memref<128x16xf32, #tpu.memory_space<vmem>>, vector<13x16xf32>
    %c66_240 = arith.constant 66 : index
    %c0_241 = arith.constant 0 : index
    %253 = vector.load %arg33[%c66_240, %c0_241] : memref<128x16xf32, #tpu.memory_space<vmem>>, vector<13x16xf32>
    %c82_242 = arith.constant 82 : index
    %c0_243 = arith.constant 0 : index
    %254 = vector.load %arg33[%c82_242, %c0_243] : memref<128x16xf32, #tpu.memory_space<vmem>>, vector<13x16xf32>
    %c98 = arith.constant 98 : index
    %c0_244 = arith.constant 0 : index
    %255 = vector.load %arg33[%c98, %c0_244] : memref<128x16xf32, #tpu.memory_space<vmem>>, vector<13x16xf32>
    %c114 = arith.constant 114 : index
    %c0_245 = arith.constant 0 : index
    %256 = vector.load %arg33[%c114, %c0_245] : memref<128x16xf32, #tpu.memory_space<vmem>>, vector<13x16xf32>
    %257 = tpu.concatenate %247, %248, %249, %250, %251, %252, %253, %254, %255, %256 in 1 : vector<13x16xf32>, vector<13x16xf32>, vector<13x16xf32>, vector<13x16xf32>, vector<13x16xf32>, vector<13x16xf32>, vector<13x16xf32>, vector<13x16xf32>, vector<13x16xf32>, vector<13x16xf32> -> vector<13x160xf32>
    %c0_246 = arith.constant 0 : index
    %c0_247 = arith.constant 0 : index
    %258 = vector.load %arg4[%c0_246, %c0_247] : memref<160x32xf32, #tpu.memory_space<vmem>>, vector<160x32xf32>
    %cst_248 = arith.constant dense<0.000000e+00> : vector<13x32xf32>
    %259 = tpu.matmul %257, %258, %cst_248 {dimension_numbers = #tpu.dot_dimension_numbers<[1], [0], [0], [1], [0, 0, 1, 1], [], []>} : vector<13x160xf32>, vector<160x32xf32>, vector<13x32xf32> -> vector<13x32xf32>
    %c0_249 = arith.constant 0 : index
    %c0_250 = arith.constant 0 : index
    %260 = vector.load %arg5[%c0_249, %c0_250] : memref<1x32xf32, #tpu.memory_space<vmem>>, vector<1x32xf32>
    %261 = vector.broadcast %260 : vector<1x32xf32> to vector<13x32xf32>
    %262 = arith.addf %259, %261 : vector<13x32xf32>
    %cst_251 = arith.constant 0.000000e+00 : f32
    %263 = vector.broadcast %cst_251 : f32 to vector<13x32xf32>
    %264 = arith.maximumf %262, %263 : vector<13x32xf32>
    %265 = arith.maximumf %246, %264 : vector<13x32xf32>
    %c1_252 = arith.constant 1 : index
    %c2_253 = arith.constant 2 : index
    %c0_254 = arith.constant 0 : index
    %266 = vector.load %arg34[%c1_252, %c2_253, %c0_254] : memref<2x17x32xf32, #tpu.memory_space<vmem>>, vector<1x13x32xf32>
    %267 = vector.shape_cast %266 : vector<1x13x32xf32> to vector<13x32xf32>
    %268 = vector.shape_cast %265 : vector<13x32xf32> to vector<1x13x32xf32>
    tpu.vector_store %arg34[%c1_252, %c2_253, %c0_254], %268 {strides = array<i32>} : memref<2x17x32xf32, #tpu.memory_space<vmem>>, vector<1x13x32xf32>,
    %c1_255 = arith.constant 1 : index
    %c2_256 = arith.constant 2 : index
    %c0_257 = arith.constant 0 : index
    %269 = vector.load %arg34[%c1_255, %c2_256, %c0_257] : memref<2x17x32xf32, #tpu.memory_space<vmem>>, vector<1x13x32xf32>
    %270 = vector.shape_cast %269 : vector<1x13x32xf32> to vector<13x32xf32>
    %c1_258 = arith.constant 1 : index
    %c1_259 = arith.constant 1 : index
    %c0_260 = arith.constant 0 : index
    %271 = vector.load %arg34[%c1_258, %c1_259, %c0_260] : memref<2x17x32xf32, #tpu.memory_space<vmem>>, vector<1x13x32xf32>
    %272 = vector.shape_cast %271 : vector<1x13x32xf32> to vector<13x32xf32>
    %c1_261 = arith.constant 1 : index
    %c3_262 = arith.constant 3 : index
    %c0_263 = arith.constant 0 : index
    %273 = vector.load %arg34[%c1_261, %c3_262, %c0_263] : memref<2x17x32xf32, #tpu.memory_space<vmem>>, vector<1x13x32xf32>
    %274 = vector.shape_cast %273 : vector<1x13x32xf32> to vector<13x32xf32>
    %c1_264 = arith.constant 1 : index
    %c0_265 = arith.constant 0 : index
    %c0_266 = arith.constant 0 : index
    %275 = vector.load %arg34[%c1_264, %c0_265, %c0_266] : memref<2x17x32xf32, #tpu.memory_space<vmem>>, vector<1x13x32xf32>
    %276 = vector.shape_cast %275 : vector<1x13x32xf32> to vector<13x32xf32>
    %c1_267 = arith.constant 1 : index
    %c4_268 = arith.constant 4 : index
    %c0_269 = arith.constant 0 : index
    %277 = vector.load %arg34[%c1_267, %c4_268, %c0_269] : memref<2x17x32xf32, #tpu.memory_space<vmem>>, vector<1x13x32xf32>
    %278 = vector.shape_cast %277 : vector<1x13x32xf32> to vector<13x32xf32>
    %279 = tpu.concatenate %272, %270, %274 in 1 : vector<13x32xf32>, vector<13x32xf32>, vector<13x32xf32> -> vector<13x96xf32>
    %280 = tpu.concatenate %276, %270, %278 in 1 : vector<13x32xf32>, vector<13x32xf32>, vector<13x32xf32> -> vector<13x96xf32>
    %281 = arith.maximumf %272, %270 : vector<13x32xf32>
    %282 = arith.maximumf %281, %274 : vector<13x32xf32>
    %c0_270 = arith.constant 0 : index
    %c0_271 = arith.constant 0 : index
    %283 = vector.load %arg6[%c0_270, %c0_271] : memref<32x16xf32, #tpu.memory_space<vmem>>, vector<32x16xf32>
    %cst_272 = arith.constant dense<0.000000e+00> : vector<13x16xf32>
    %284 = tpu.matmul %270, %283, %cst_272 {dimension_numbers = #tpu.dot_dimension_numbers<[1], [0], [0], [1], [0, 0, 1, 1], [], []>} : vector<13x32xf32>, vector<32x16xf32>, vector<13x16xf32> -> vector<13x16xf32>
    %c0_273 = arith.constant 0 : index
    %c0_274 = arith.constant 0 : index
    %285 = vector.load %arg7[%c0_273, %c0_274] : memref<96x16xf32, #tpu.memory_space<vmem>>, vector<96x16xf32>
    %cst_275 = arith.constant dense<0.000000e+00> : vector<13x16xf32>
    %286 = tpu.matmul %279, %285, %cst_275 {dimension_numbers = #tpu.dot_dimension_numbers<[1], [0], [0], [1], [0, 0, 1, 1], [], []>} : vector<13x96xf32>, vector<96x16xf32>, vector<13x16xf32> -> vector<13x16xf32>
    %c0_276 = arith.constant 0 : index
    %c0_277 = arith.constant 0 : index
    %287 = vector.load %arg8[%c0_276, %c0_277] : memref<96x16xf32, #tpu.memory_space<vmem>>, vector<96x16xf32>
    %cst_278 = arith.constant dense<0.000000e+00> : vector<13x16xf32>
    %288 = tpu.matmul %280, %287, %cst_278 {dimension_numbers = #tpu.dot_dimension_numbers<[1], [0], [0], [1], [0, 0, 1, 1], [], []>} : vector<13x96xf32>, vector<96x16xf32>, vector<13x16xf32> -> vector<13x16xf32>
    %c0_279 = arith.constant 0 : index
    %c0_280 = arith.constant 0 : index
    %289 = vector.load %arg9[%c0_279, %c0_280] : memref<32x16xf32, #tpu.memory_space<vmem>>, vector<32x16xf32>
    %cst_281 = arith.constant dense<0.000000e+00> : vector<13x16xf32>
    %290 = tpu.matmul %282, %289, %cst_281 {dimension_numbers = #tpu.dot_dimension_numbers<[1], [0], [0], [1], [0, 0, 1, 1], [], []>} : vector<13x32xf32>, vector<32x16xf32>, vector<13x16xf32> -> vector<13x16xf32>
    %291 = tpu.concatenate %284, %286, %288, %290 in 1 : vector<13x16xf32>, vector<13x16xf32>, vector<13x16xf32>, vector<13x16xf32> -> vector<13x64xf32>
    %c0_282 = arith.constant 0 : index
    %c0_283 = arith.constant 0 : index
    %292 = vector.load %arg10[%c0_282, %c0_283] : memref<1x64xf32, #tpu.memory_space<vmem>>, vector<1x64xf32>
    %293 = vector.broadcast %292 : vector<1x64xf32> to vector<13x64xf32>
    %294 = arith.mulf %291, %293 : vector<13x64xf32>
    %c0_284 = arith.constant 0 : index
    %c0_285 = arith.constant 0 : index
    %295 = vector.load %arg11[%c0_284, %c0_285] : memref<1x64xf32, #tpu.memory_space<vmem>>, vector<1x64xf32>
    %296 = vector.broadcast %295 : vector<1x64xf32> to vector<13x64xf32>
    %297 = arith.addf %294, %296 : vector<13x64xf32>
    %cst_286 = arith.constant 0.000000e+00 : f32
    %298 = vector.broadcast %cst_286 : f32 to vector<13x64xf32>
    %299 = arith.maximumf %297, %298 : vector<13x64xf32>
    %cst_287 = arith.constant dense<0.000000e+00> : vector<64xf32>
    %300 = vector.multi_reduction <add>, %299, %cst_287 [0] : vector<13x64xf32> to vector<64xf32>
    %301 = vector.shape_cast %300 : vector<64xf32> to vector<1x64xf32>
    %cst_288 = arith.constant 1.300000e+01 : f32
    %302 = vector.broadcast %cst_288 : f32 to vector<1x64xf32>
    %303 = arith.divf %301, %302 : vector<1x64xf32>
    %c0_289 = arith.constant 0 : index
    %c0_290 = arith.constant 0 : index
    %304 = vector.load %arg12[%c0_289, %c0_290] : memref<4x64xf32, #tpu.memory_space<vmem>>, vector<4x64xf32>
    %305 = vector.broadcast %303 : vector<1x64xf32> to vector<4x64xf32>
    %306 = arith.mulf %304, %305 : vector<4x64xf32>
    %cst_291 = arith.constant dense<0.000000e+00> : vector<4xf32>
    %307 = vector.multi_reduction <add>, %306, %cst_291 [1] : vector<4x64xf32> to vector<4xf32>
    %308 = vector.shape_cast %307 : vector<4xf32> to vector<4x1xf32>
    %c0_292 = arith.constant 0 : index
    %c0_293 = arith.constant 0 : index
    %309 = vector.load %arg13[%c0_292, %c0_293] : memref<4x1xf32, #tpu.memory_space<vmem>>, vector<4x1xf32>
    %310 = arith.addf %308, %309 : vector<4x1xf32>
    %cst_294 = arith.constant 0.000000e+00 : f32
    %311 = vector.broadcast %cst_294 : f32 to vector<4x1xf32>
    %312 = arith.maximumf %310, %311 : vector<4x1xf32>
    %c0_295 = arith.constant 0 : index
    %c0_296 = arith.constant 0 : index
    %313 = vector.load %arg14[%c0_295, %c0_296] : memref<4x64xf32, #tpu.memory_space<vmem>>, vector<4x64xf32>
    %314 = vector.broadcast %312 : vector<4x1xf32> to vector<4x64xf32>
    %315 = arith.mulf %313, %314 : vector<4x64xf32>
    %cst_297 = arith.constant dense<0.000000e+00> : vector<64xf32>
    %316 = vector.multi_reduction <add>, %315, %cst_297 [0] : vector<4x64xf32> to vector<64xf32>
    %317 = vector.shape_cast %316 : vector<64xf32> to vector<1x64xf32>
    %c0_298 = arith.constant 0 : index
    %c0_299 = arith.constant 0 : index
    %318 = vector.load %arg15[%c0_298, %c0_299] : memref<1x64xf32, #tpu.memory_space<vmem>>, vector<1x64xf32>
    %319 = arith.addf %317, %318 : vector<1x64xf32>
    %320 = arith.negf %319 : vector<1x64xf32>
    %321 = math.exp %320 : vector<1x64xf32>
    %cst_300 = arith.constant 1.000000e+00 : f32
    %322 = vector.broadcast %cst_300 : f32 to vector<1x64xf32>
    %323 = arith.addf %322, %321 : vector<1x64xf32>
    %324 = arith.divf %322, %323 : vector<1x64xf32>
    %325 = vector.broadcast %324 : vector<1x64xf32> to vector<13x64xf32>
    %326 = arith.mulf %299, %325 : vector<13x64xf32>
    %c1_301 = arith.constant 1 : index
    %c2_302 = arith.constant 2 : index
    %c0_303 = arith.constant 0 : index
    %327 = vector.load %arg35[%c1_301, %c2_302, %c0_303] : memref<2x17x64xf32, #tpu.memory_space<vmem>>, vector<1x13x64xf32>
    %328 = vector.shape_cast %327 : vector<1x13x64xf32> to vector<13x64xf32>
    %329 = vector.shape_cast %326 : vector<13x64xf32> to vector<1x13x64xf32>
    tpu.vector_store %arg35[%c1_301, %c2_302, %c0_303], %329 {strides = array<i32>} : memref<2x17x64xf32, #tpu.memory_space<vmem>>, vector<1x13x64xf32>,
    %c1_304 = arith.constant 1 : index
    %c2_305 = arith.constant 2 : index
    %c0_306 = arith.constant 0 : index
    %330 = vector.load %arg35[%c1_304, %c2_305, %c0_306] : memref<2x17x64xf32, #tpu.memory_space<vmem>>, vector<1x13x64xf32>
    %331 = vector.shape_cast %330 : vector<1x13x64xf32> to vector<13x64xf32>
    %c1_307 = arith.constant 1 : index
    %c1_308 = arith.constant 1 : index
    %c0_309 = arith.constant 0 : index
    %332 = vector.load %arg35[%c1_307, %c1_308, %c0_309] : memref<2x17x64xf32, #tpu.memory_space<vmem>>, vector<1x13x64xf32>
    %333 = vector.shape_cast %332 : vector<1x13x64xf32> to vector<13x64xf32>
    %c1_310 = arith.constant 1 : index
    %c3_311 = arith.constant 3 : index
    %c0_312 = arith.constant 0 : index
    %334 = vector.load %arg35[%c1_310, %c3_311, %c0_312] : memref<2x17x64xf32, #tpu.memory_space<vmem>>, vector<1x13x64xf32>
    %335 = vector.shape_cast %334 : vector<1x13x64xf32> to vector<13x64xf32>
    %c1_313 = arith.constant 1 : index
    %c0_314 = arith.constant 0 : index
    %c0_315 = arith.constant 0 : index
    %336 = vector.load %arg35[%c1_313, %c0_314, %c0_315] : memref<2x17x64xf32, #tpu.memory_space<vmem>>, vector<1x13x64xf32>
    %337 = vector.shape_cast %336 : vector<1x13x64xf32> to vector<13x64xf32>
    %c1_316 = arith.constant 1 : index
    %c4_317 = arith.constant 4 : index
    %c0_318 = arith.constant 0 : index
    %338 = vector.load %arg35[%c1_316, %c4_317, %c0_318] : memref<2x17x64xf32, #tpu.memory_space<vmem>>, vector<1x13x64xf32>
    %339 = vector.shape_cast %338 : vector<1x13x64xf32> to vector<13x64xf32>
    %340 = tpu.concatenate %333, %331, %335 in 1 : vector<13x64xf32>, vector<13x64xf32>, vector<13x64xf32> -> vector<13x192xf32>
    %341 = tpu.concatenate %337, %331, %339 in 1 : vector<13x64xf32>, vector<13x64xf32>, vector<13x64xf32> -> vector<13x192xf32>
    %342 = arith.maximumf %333, %331 : vector<13x64xf32>
    %343 = arith.maximumf %342, %335 : vector<13x64xf32>
    %c0_319 = arith.constant 0 : index
    %c0_320 = arith.constant 0 : index
    %344 = vector.load %arg16[%c0_319, %c0_320] : memref<64x32xf32, #tpu.memory_space<vmem>>, vector<64x32xf32>
    %cst_321 = arith.constant dense<0.000000e+00> : vector<13x32xf32>
    %345 = tpu.matmul %331, %344, %cst_321 {dimension_numbers = #tpu.dot_dimension_numbers<[1], [0], [0], [1], [0, 0, 1, 1], [], []>} : vector<13x64xf32>, vector<64x32xf32>, vector<13x32xf32> -> vector<13x32xf32>
    %c0_322 = arith.constant 0 : index
    %c0_323 = arith.constant 0 : index
    %346 = vector.load %arg17[%c0_322, %c0_323] : memref<192x32xf32, #tpu.memory_space<vmem>>, vector<192x32xf32>
    %cst_324 = arith.constant dense<0.000000e+00> : vector<13x32xf32>
    %347 = tpu.matmul %340, %346, %cst_324 {dimension_numbers = #tpu.dot_dimension_numbers<[1], [0], [0], [1], [0, 0, 1, 1], [], []>} : vector<13x192xf32>, vector<192x32xf32>, vector<13x32xf32> -> vector<13x32xf32>
    %c0_325 = arith.constant 0 : index
    %c0_326 = arith.constant 0 : index
    %348 = vector.load %arg18[%c0_325, %c0_326] : memref<192x32xf32, #tpu.memory_space<vmem>>, vector<192x32xf32>
    %cst_327 = arith.constant dense<0.000000e+00> : vector<13x32xf32>
    %349 = tpu.matmul %341, %348, %cst_327 {dimension_numbers = #tpu.dot_dimension_numbers<[1], [0], [0], [1], [0, 0, 1, 1], [], []>} : vector<13x192xf32>, vector<192x32xf32>, vector<13x32xf32> -> vector<13x32xf32>
    %c0_328 = arith.constant 0 : index
    %c0_329 = arith.constant 0 : index
    %350 = vector.load %arg19[%c0_328, %c0_329] : memref<64x32xf32, #tpu.memory_space<vmem>>, vector<64x32xf32>
    %cst_330 = arith.constant dense<0.000000e+00> : vector<13x32xf32>
    %351 = tpu.matmul %343, %350, %cst_330 {dimension_numbers = #tpu.dot_dimension_numbers<[1], [0], [0], [1], [0, 0, 1, 1], [], []>} : vector<13x64xf32>, vector<64x32xf32>, vector<13x32xf32> -> vector<13x32xf32>
    %352 = tpu.concatenate %345, %347, %349, %351 in 1 : vector<13x32xf32>, vector<13x32xf32>, vector<13x32xf32>, vector<13x32xf32> -> vector<13x128xf32>
    %c0_331 = arith.constant 0 : index
    %c0_332 = arith.constant 0 : index
    %353 = vector.load %arg20[%c0_331, %c0_332] : memref<1x128xf32, #tpu.memory_space<vmem>>, vector<1x128xf32>
    %354 = vector.broadcast %353 : vector<1x128xf32> to vector<13x128xf32>
    %355 = arith.mulf %352, %354 : vector<13x128xf32>
    %c0_333 = arith.constant 0 : index
    %c0_334 = arith.constant 0 : index
    %356 = vector.load %arg21[%c0_333, %c0_334] : memref<1x128xf32, #tpu.memory_space<vmem>>, vector<1x128xf32>
    %357 = vector.broadcast %356 : vector<1x128xf32> to vector<13x128xf32>
    %358 = arith.addf %355, %357 : vector<13x128xf32>
    %cst_335 = arith.constant 0.000000e+00 : f32
    %359 = vector.broadcast %cst_335 : f32 to vector<13x128xf32>
    %360 = arith.maximumf %358, %359 : vector<13x128xf32>
    %cst_336 = arith.constant dense<0.000000e+00> : vector<128xf32>
    %361 = vector.multi_reduction <add>, %360, %cst_336 [0] : vector<13x128xf32> to vector<128xf32>
    %362 = vector.shape_cast %361 : vector<128xf32> to vector<1x128xf32>
    %cst_337 = arith.constant 1.300000e+01 : f32
    %363 = vector.broadcast %cst_337 : f32 to vector<1x128xf32>
    %364 = arith.divf %362, %363 : vector<1x128xf32>
    %c0_338 = arith.constant 0 : index
    %c0_339 = arith.constant 0 : index
    %365 = vector.load %arg22[%c0_338, %c0_339] : memref<8x128xf32, #tpu.memory_space<vmem>>, vector<8x128xf32>
    %366 = vector.broadcast %364 : vector<1x128xf32> to vector<8x128xf32>
    %367 = arith.mulf %365, %366 : vector<8x128xf32>
    %cst_340 = arith.constant dense<0.000000e+00> : vector<8xf32>
    %368 = vector.multi_reduction <add>, %367, %cst_340 [1] : vector<8x128xf32> to vector<8xf32>
    %369 = vector.shape_cast %368 : vector<8xf32> to vector<8x1xf32>
    %c0_341 = arith.constant 0 : index
    %c0_342 = arith.constant 0 : index
    %370 = vector.load %arg23[%c0_341, %c0_342] : memref<8x1xf32, #tpu.memory_space<vmem>>, vector<8x1xf32>
    %371 = arith.addf %369, %370 : vector<8x1xf32>
    %cst_343 = arith.constant 0.000000e+00 : f32
    %372 = vector.broadcast %cst_343 : f32 to vector<8x1xf32>
    %373 = arith.maximumf %371, %372 : vector<8x1xf32>
    %c0_344 = arith.constant 0 : index
    %c0_345 = arith.constant 0 : index
    %374 = vector.load %arg24[%c0_344, %c0_345] : memref<8x128xf32, #tpu.memory_space<vmem>>, vector<8x128xf32>
    %375 = vector.broadcast %373 : vector<8x1xf32> to vector<8x128xf32>
    %376 = arith.mulf %374, %375 : vector<8x128xf32>
    %cst_346 = arith.constant dense<0.000000e+00> : vector<128xf32>
    %377 = vector.multi_reduction <add>, %376, %cst_346 [0] : vector<8x128xf32> to vector<128xf32>
    %378 = vector.shape_cast %377 : vector<128xf32> to vector<1x128xf32>
    %c0_347 = arith.constant 0 : index
    %c0_348 = arith.constant 0 : index
    %379 = vector.load %arg25[%c0_347, %c0_348] : memref<1x128xf32, #tpu.memory_space<vmem>>, vector<1x128xf32>
    %380 = arith.addf %378, %379 : vector<1x128xf32>
    %381 = arith.negf %380 : vector<1x128xf32>
    %382 = math.exp %381 : vector<1x128xf32>
    %cst_349 = arith.constant 1.000000e+00 : f32
    %383 = vector.broadcast %cst_349 : f32 to vector<1x128xf32>
    %384 = arith.addf %383, %382 : vector<1x128xf32>
    %385 = arith.divf %383, %384 : vector<1x128xf32>
    %386 = arith.mulf %364, %385 : vector<1x128xf32>
    %c0_350 = arith.constant 0 : index
    %c0_351 = arith.constant 0 : index
    %387 = vector.load %arg26[%c0_350, %c0_351] : memref<128x64xf32, #tpu.memory_space<vmem>>, vector<128x64xf32>
    %cst_352 = arith.constant dense<0.000000e+00> : vector<1x64xf32>
    %388 = tpu.matmul %386, %387, %cst_352 {dimension_numbers = #tpu.dot_dimension_numbers<[1], [0], [0], [1], [0, 0, 1, 1], [], []>} : vector<1x128xf32>, vector<128x64xf32>, vector<1x64xf32> -> vector<1x64xf32>
    %c0_353 = arith.constant 0 : index
    %c0_354 = arith.constant 0 : index
    %389 = vector.load %arg27[%c0_353, %c0_354] : memref<1x64xf32, #tpu.memory_space<vmem>>, vector<1x64xf32>
    %390 = arith.mulf %388, %389 : vector<1x64xf32>
    %c0_355 = arith.constant 0 : index
    %c0_356 = arith.constant 0 : index
    %391 = vector.load %arg28[%c0_355, %c0_356] : memref<1x64xf32, #tpu.memory_space<vmem>>, vector<1x64xf32>
    %392 = arith.addf %390, %391 : vector<1x64xf32>
    %cst_357 = arith.constant 0.000000e+00 : f32
    %393 = vector.broadcast %cst_357 : f32 to vector<1x64xf32>
    %394 = arith.maximumf %392, %393 : vector<1x64xf32>
    %c0_358 = arith.constant 0 : index
    %c0_359 = arith.constant 0 : index
    %395 = vector.load %arg29[%c0_358, %c0_359] : memref<64x2xf32, #tpu.memory_space<vmem>>, vector<64x2xf32>
    %cst_360 = arith.constant dense<0.000000e+00> : vector<1x2xf32>
    %396 = tpu.matmul %394, %395, %cst_360 {dimension_numbers = #tpu.dot_dimension_numbers<[1], [0], [0], [1], [0, 0, 1, 1], [], []>} : vector<1x64xf32>, vector<64x2xf32>, vector<1x2xf32> -> vector<1x2xf32>
    %c0_361 = arith.constant 0 : index
    %c0_362 = arith.constant 0 : index
    %397 = vector.load %arg30[%c0_361, %c0_362] : memref<1x2xf32, #tpu.memory_space<vmem>>, vector<1x2xf32>
    %398 = arith.addf %396, %397 : vector<1x2xf32>
    %cst_363 = arith.constant dense<0xFF800000> : vector<1xf32>
    %399 = vector.multi_reduction <maximumf>, %398, %cst_363 [1] : vector<1x2xf32> to vector<1xf32>
    %400 = vector.shape_cast %399 : vector<1xf32> to vector<1x1xf32>
    %401 = vector.broadcast %400 : vector<1x1xf32> to vector<1x2xf32>
    %402 = arith.subf %398, %401 : vector<1x2xf32>
    %403 = math.exp %402 : vector<1x2xf32>
    %cst_364 = arith.constant dense<0.000000e+00> : vector<1xf32>
    %404 = vector.multi_reduction <add>, %403, %cst_364 [1] : vector<1x2xf32> to vector<1xf32>
    %405 = vector.shape_cast %404 : vector<1xf32> to vector<1x1xf32>
    %406 = math.log %405 : vector<1x1xf32>
    %407 = vector.broadcast %406 : vector<1x1xf32> to vector<1x2xf32>
    %408 = arith.subf %402, %407 : vector<1x2xf32>
    %c1_365 = arith.constant 1 : index
    %c0_366 = arith.constant 0 : index
    %409 = vector.load %arg31[%c1_365, %c0_366] : memref<2x2xf32, #tpu.memory_space<vmem>>, vector<1x2xf32>
    tpu.vector_store %arg31[%c1_365, %c0_366], %408 {strides = array<i32>} : memref<2x2xf32, #tpu.memory_space<vmem>>, vector<1x2xf32>,
    return
  }
}

</mosaic_0001>

<bundles_post_ra>
// kernel: inception_with_se_forward.1
= control target key start
LH: loop header
LB: loop body
LE: loop exit
PB: predicated region body
PF: predicated region fallthrough
CT: control target
= control target key end

     0   :  { %s3046_s6 = smov 1   ;;  %s3047_s10 = smov 2   ;;  %s4224_s0 = inlined_call_operand.smem [shape: u32[32], index: -1, kind: input, shape index: {}] }
   0x1   :  { %s3096_s5 = sld [smem:[%s4224_s0]]   ;;  %s3048_s14 = smov 3  }
   0x2   :  { %s3101_s9 = sld [smem:[%s4224_s0 + %s3046_s6]]   ;;  %s3049_s18 = smov 4  }
   0x3   :  { %s3106_s13 = sld [smem:[%s4224_s0 + %s3047_s10]]   ;;  %s3050_s22 = smov 5  }
   0x4   :  { %s3111_s17 = sld [smem:[%s4224_s0 + %s3048_s14]]   ;;  %s3051_s26 = smov 6  }
   0x5   :  { %s3116_s21 = sld [smem:[%s4224_s0 + %s3049_s18]]   ;;  %s3052_s30 = smov 7  }
   0x6   :  { %s3121_s25 = sld [smem:[%s4224_s0 + %s3050_s22]]   ;;  %s3053_s4 = smov 8  }
   0x7   :  { %s3126_s29 = sld [smem:[%s4224_s0 + %s3051_s26]]   ;;  %s3054_s10 = smov 9  }
   0x8   :  { %s3131_s3 = sld [smem:[%s4224_s0 + %s3052_s30]]   ;;  %s3055_s15 = smov 10  }
   0x9   :  { %s3136_s8 = sld [smem:[%s4224_s0 + %s3053_s4]]   ;;  %s3056_s20 = smov 11  }
   0xa   :  { %s3141_s14 = sld [smem:[%s4224_s0 + %s3054_s10]]   ;;  %s3057_s26 = smov 12  }
   0xb   :  { %s3146_s19 = sld [smem:[%s4224_s0 + %s3055_s15]]   ;;  %s3058_s1 = smov 13  }
   0xc   :  { %s3151_s24 = sld [smem:[%s4224_s0 + %s3056_s20]]   ;;  %s3059_s7 = smov 14  }
   0xd   :  { %s3156_s30 = sld [smem:[%s4224_s0 + %s3057_s26]]   ;;  %s3060_s15 = smov 15  }
   0xe   :  { %s3161_s6 = sld [smem:[%s4224_s0 + %s3058_s1]]   ;;  %s3061_s22 = smov 16  }
   0xf   :  { %s3166_s12 = sld [smem:[%s4224_s0 + %s3059_s7]]   ;;  %s3062_s28 = smov 17  }
  0x10   :  { %s3171_s20 = sld [smem:[%s4224_s0 + %s3060_s15]]   ;;  %s3063_s7 = smov 18  }
  0x11   :  { %s3176_s27 = sld [smem:[%s4224_s0 + %s3061_s22]]   ;;  %s3064_s15 = smov 19  }
  0x12   :  { %s3181_s4 = sld [smem:[%s4224_s0 + %s3062_s28]]   ;;  %s3065_s22 = smov 20  }
  0x13   :  { %s3066_s28 = smov 21  }
  0x15   :  { %4243 = sst [smem:[#allocation9_spill]] %s3166_s12 }
  0x16   :  { %4244 = sst [smem:[#allocation10_spill]] %s3171_s20 }
  0x17   :  { %4245 = sst [smem:[#allocation11_spill]] %s3176_s27 }
  0x18   :  { %4246 = sst [smem:[#allocation12_spill]] %s3181_s4 }
  0x19   :  { %s3186_s12 = sld [smem:[%s4224_s0 + %s3063_s7]]   ;;  %s3067_s7 = smov 22  }
  0x1a   :  { %s3191_s20 = sld [smem:[%s4224_s0 + %s3064_s15]]   ;;  %s3068_s15 = smov 23  }
  0x1b   :  { %s3196_s27 = sld [smem:[%s4224_s0 + %s3065_s22]]   ;;  %s3069_s22 = smov 24  }
  0x1c   :  { %s3201_s4 = sld [smem:[%s4224_s0 + %s3066_s28]]   ;;  %s3070_s28 = smov 25  }
  0x1f   :  { %4247 = sst [smem:[#allocation13_spill]] %s3186_s12 }
  0x20   :  { %4248 = sst [smem:[#allocation14_spill]] %s3191_s20 }
  0x21   :  { %4249 = sst [smem:[#allocation15_spill]] %s3196_s27 }
  0x22   :  { %4250 = sst [smem:[#allocation16_spill]] %s3201_s4 }
  0x23   :  { %s3206_s12 = sld [smem:[%s4224_s0 + %s3067_s7]]   ;;  %s3071_s7 = smov 26  }
  0x24   :  { %s3211_s20 = sld [smem:[%s4224_s0 + %s3068_s15]]   ;;  %s3072_s15 = smov 27  }
  0x25   :  { %s3216_s27 = sld [smem:[%s4224_s0 + %s3069_s22]]   ;;  %s3073_s22 = smov 28  }
  0x26   :  { %s3221_s4 = sld [smem:[%s4224_s0 + %s3070_s28]]   ;;  %s3074_s28 = smov 29  }
  0x29   :  { %4251 = sst [smem:[#allocation17_spill]] %s3206_s12 }
  0x2a   :  { %4252 = sst [smem:[#allocation18_spill]] %s3211_s20 }
  0x2b   :  { %4253 = sst [smem:[#allocation19_spill]] %s3216_s27 }
  0x2c   :  { %4254 = sst [smem:[#allocation20_spill]] %s3221_s4 }
  0x2d   :  { %s3226_s12 = sld [smem:[%s4224_s0 + %s3071_s7]]   ;;  %s3075_s7 = smov 30  }
  0x2e   :  { %s3231_s20 = sld [smem:[%s4224_s0 + %s3072_s15]]   ;;  %s3076_s15 = smov 31  }
  0x2f   :  { %s3236_s27 = sld [smem:[%s4224_s0 + %s3073_s22]]  }
  0x30   :  { %s3241_s4 = sld [smem:[%s4224_s0 + %s3074_s28]]  }
  0x33   :  { %4255 = sst [smem:[#allocation21_spill]] %s3226_s12 }
  0x34   :  { %4256 = sst [smem:[#allocation22_spill]] %s3231_s20 }
  0x35   :  { %s3246_s12 = sld [smem:[%s4224_s0 + %s3075_s7]]  }
  0x36   :  { %s3251_s20 = sld [smem:[%s4224_s0 + %s3076_s15]]  }
  0x37   :  { %v164_v0 = vld [vmem:[%s3101_s9 + $0x8] sm:$0x3]  ;;  %vm262_vm0 = vcmask 1041408   ;;  %v163_v1 = vld [vmem:[%s3101_s9] sm:$0xff]  ;;  %vm165_vm1 = vcmask 80896  }
  0x38   :  { %2727 = vmatpush.msk.msra.mxu0 %vm262_vm0, %v164_v0  ;;  %v131_v2 = vld [vmem:[%s3096_s5] sm:$0xff] }
  0x3a   :  { %281 = vmatpush.msra.mxu0 %v163_v1 }
  0x3b   :  { %2728 = vmatmul.msk.f32.vlgmr.msra.gmra.mxu0 %vm165_vm1, %v131_v2 }
  0x3c   :  { %68 = vsyncpa [#allocation7], 0  ;;  %v132_v3 = vld [vmem:[%s3096_s5 + $0x8] sm:$0xff]  ;;  %v133_v4 = vld [vmem:[%s3096_s5 + $0x10] sm:$0xff]  ;;  %vm483_vm2 = vcmask 130048   ;;  %s3077_s0 = smov 16  }
  0x3d   :  { %v134_v5 = vld [vmem:[%s3096_s5 + $0x18] sm:$0xff]  ;;  %v135_v6 = vld [vmem:[%s3096_s5 + $0x20] sm:$0xff]  ;;  %v136_v7 = vld [vmem:[%s3096_s5 + $0x28] sm:$0xff]  ;;  %s4239_s9 = smov 96   ;;  %vm516_vm3 = vcmask 261120   ;;  %s3082_s22 = smov 112  }
  0x3e   :  { %v137_v8 = vld [vmem:[%s3096_s5 + $0x30] sm:$0xff]  ;;  %v138_v9 = vld [vmem:[%s3096_s5 + $0x38] sm:$0xff]  ;;  %v139_v10 = vld [vmem:[%s3096_s5 + $0x40] sm:$0xff]  ;;  %s3083_s23 = smov 80   ;;  %vm652_vm4 = vcmask 392192   ;;  %vm524_vm5 = vcmask 523264  }
  0x3f   :  { %v140_v11 = vld [vmem:[%s3096_s5 + $0x48] sm:$0xff]  ;;  %v141_v12 = vld [vmem:[%s3096_s5 + $0x50] sm:$0xff]  ;;  %v142_v13 = vld [vmem:[%s3096_s5 + $0x58] sm:$0xff]  ;;  %vm657_vm6 = vcmask 654336   ;;  %vm660_vm7 = vcmask 785408   ;;  %vm663_vm8 = vcmask 916480  }
  0x40   :  { %v143_v14 = vld [vmem:[%s3096_s5 + $0x60] sm:$0xff]  ;;  %v144_v15 = vld [vmem:[%s3096_s5 + $0x68] sm:$0xff]  ;;  %v145_v16 = vld [vmem:[%s3096_s5 + $0x70] sm:$0xff]  ;;  %vm519_vm9 = vcmask 253952   ;;  %vm875_vm10 = vcmask 258048   ;;  %vm1114_vm11 = vcmask 520192  }
  0x41   :  { %v146_v17 = vld [vmem:[%s3096_s5 + $0x78] sm:$0xff]  ;;  %v3288_v18 = vld [vmem:[%s3106_s13] ss:$0 sm:$0xff]  ;;  %v148_v26 = vld [vmem:[%s3096_s5 + $0x88] sm:$0xff]  ;;  %s3080_s13 = smov 64   ;;  %s4257_s26 = sld [smem:[#allocation9_spill]] }
  0x42   :  { %v3291_v19 = vld [vmem:[%s3111_s17] ss:$0 sm:$0xff]  ;;  %v149_v31 = vld [vmem:[%s3096_s5 + $0x90] sm:$0xff]  ;;  %v150_v36 = vld [vmem:[%s3096_s5 + $0x98] sm:$0xff]  ;;  %s4241_s17 = smov 48   ;;  %vm1133_vm13 = vcmask 519168  }
  0x43   :  { %2729 = vmatmul.msk.f32.gmra.mxu0 %vm165_vm1, %v132_v3  ;;  %v147_v21 = vld [vmem:[%s3096_s5 + $0x80] sm:$0xff]  ;;  %v152_v46 = vld [vmem:[%s3096_s5 + $0xa8] sm:$0xff]  ;;  %v153_v54 = vld [vmem:[%s3096_s5 + $0xb0] sm:$0xff]  ;;  %s4258_s28 = sld [smem:[#allocation11_spill]]  ;;  %vm527_vm14 = vcmask 516096  }
  0x44   :  { %v151_v41 = vld [vmem:[%s3096_s5 + $0xa0] sm:$0xff]  ;;  %v154_v62 = vld [vmem:[%s3096_s5 + $0xb8] sm:$0xff]  ;;  %s4259_s1 = sld [smem:[#allocation12_spill]] }
  0x45   :  { %s4260_s2 = sld [smem:[#allocation10_spill]] }
  0x46   :  { %s4261_s7 = sld [smem:[#allocation13_spill]] }
  0x47   :  { %s4262_s10 = sld [smem:[#allocation14_spill]] }
  0x48   :  { %s4263_s11 = sld [smem:[#allocation15_spill]] }
  0x49   :  { %s4264_s15 = sld [smem:[#allocation16_spill]] }
  0x4a   :  { %s4265_s16 = sld [smem:[#allocation17_spill]] }
  0x4b   :  { %2730 = vmatmul.msk.f32.gmra.mxu0 %vm165_vm1, %v133_v4  ;;  %s4266_s18 = sld [smem:[#allocation18_spill]] }
  0x53   :  { %2731 = vmatmul.msk.f32.gmra.mxu0 %vm165_vm1, %v134_v5 }
  0x5b   :  { %2732 = vmatmul.msk.f32.gmra.mxu0 %vm165_vm1, %v135_v6  ;;  %v155_v6 = vld [vmem:[%s3096_s5 + $0xc0] sm:$0xff] }
  0x63   :  { %2733 = vmatmul.msk.f32.gmra.mxu0 %vm165_vm1, %v136_v7 }
  0x6b   :  { %2734 = vmatmul.msk.f32.gmra.mxu0 %vm165_vm1, %v137_v8 }
  0x73   :  { %2735 = vmatmul.msk.f32.gmra.mxu0 %vm165_vm1, %v138_v9 }
  0x7b   :  { %2736 = vmatmul.msk.f32.gmra.mxu0 %vm165_vm1, %v139_v10 }
  0x83   :  { %2737 = vmatmul.msk.f32.gmra.mxu0 %vm165_vm1, %v140_v11 }
  0x8b   :  { %2738 = vmatmul.msk.f32.gmra.mxu0 %vm165_vm1, %v141_v12 }
  0x93   :  { %2739 = vmatmul.msk.f32.gmra.mxu0 %vm165_vm1, %v142_v13 }
  0x9b   :  { %2740 = vmatmul.msk.f32.gmra.mxu0 %vm165_vm1, %v143_v14  ;;  %v156_v14 = vld [vmem:[%s3096_s5 + $0xc8] sm:$0xff] }
  0xa3   :  { %2741 = vmatmul.msk.f32.gmra.mxu0 %vm165_vm1, %v144_v15 }
  0xab   :  { %2742 = vmatmul.msk.f32.gmra.mxu0 %vm165_vm1, %v145_v16 }
  0xb3   :  { %2743 = vmatmul.msk.f32.gmra.mxu0 %vm165_vm1, %v146_v17 }
  0xb8   :  { %v283_v20 = vpop.f32.mrf.mxu0 }
  0xb9   :  { %v383_v22 = vmul.f32 %v3288_v18, %v283_v20 }
  0xbb   :  { %v419_v23 = vadd.f32 %v3291_v19, %v383_v22  ;;  %2744 = vmatmul.msk.f32.gmra.mxu0 %vm165_vm1, %v147_v21  ;;  %v157_v21 = vld [vmem:[%s3096_s5 + $0xd0] sm:$0xff] }
  0xbd   :  { %v451_v24 = vmax.f32 %v419_v23, 0.0 }
  0xbf   :  { %484 = vst.msk [vmem:[#allocation2] sm:$0xff] %vm483_vm2, %v451_v24 }
  0xc0   :  { %v286_v25 = vpop.f32.mrf.mxu0 }
  0xc1   :  { %v384_v27 = vmul.f32 %v3288_v18, %v286_v25 }
  0xc3   :  { %v420_v28 = vadd.f32 %v3291_v19, %v384_v27  ;;  %2745 = vmatmul.msk.f32.gmra.mxu0 %vm165_vm1, %v148_v26  ;;  %v158_v26 = vld [vmem:[%s3096_s5 + $0xd8] sm:$0xff] }
  0xc5   :  { %v452_v29 = vmax.f32 %v420_v28, 0.0 }
  0xc6   :  { %v532_v50 = vld [vmem:[#allocation2] sm:$0xff] }
  0xc7   :  { %485 = vst.msk [vmem:[#allocation2 + $0x8] sm:$0xff] %vm483_vm2, %v452_v29 }
  0xc8   :  { %v289_v30 = vpop.f32.mrf.mxu0 }
  0xc9   :  { %v385_v32 = vmul.f32 %v3288_v18, %v289_v30 }
  0xcb   :  { %v421_v33 = vadd.f32 %v3291_v19, %v385_v32  ;;  %2746 = vmatmul.msk.f32.gmra.mxu0 %vm165_vm1, %v149_v31  ;;  %v159_v31 = vld [vmem:[%s3096_s5 + $0xe0] sm:$0xff] }
  0xcd   :  { %v453_v34 = vmax.f32 %v421_v33, 0.0 }
  0xce   :  { %v533_v58 = vld [vmem:[#allocation2 + $0x8] sm:$0xff] }
  0xcf   :  { %486 = vst.msk [vmem:[#allocation2 + $0x10] sm:$0xff] %vm483_vm2, %v453_v34 }
  0xd0   :  { %v292_v35 = vpop.f32.mrf.mxu0 }
  0xd1   :  { %v386_v37 = vmul.f32 %v3288_v18, %v292_v35 }
  0xd3   :  { %v422_v38 = vadd.f32 %v3291_v19, %v386_v37  ;;  %2747 = vmatmul.msk.f32.gmra.mxu0 %vm165_vm1, %v150_v36  ;;  %v160_v36 = vld [vmem:[%s3096_s5 + $0xe8] sm:$0xff] }
  0xd5   :  { %v454_v39 = vmax.f32 %v422_v38, 0.0 }
  0xd6   :  { %v1613_v2 = vld [vmem:[#allocation2 + $0x10] sm:$0xff] }
  0xd7   :  { %487 = vst.msk [vmem:[#allocation2 + $0x18] sm:$0xff] %vm483_vm2, %v454_v39 }
  0xd8   :  { %v295_v40 = vpop.f32.mrf.mxu0 }
  0xd9   :  { %v387_v42 = vmul.f32 %v3288_v18, %v295_v40 }
  0xdb   :  { %v423_v43 = vadd.f32 %v3291_v19, %v387_v42  ;;  %2748 = vmatmul.msk.f32.gmra.mxu0 %vm165_vm1, %v151_v41 }
  0xdd   :  { %v455_v44 = vmax.f32 %v423_v43, 0.0 }
  0xde   :  { %v1614_v10 = vld [vmem:[#allocation2 + $0x18] sm:$0xff] }
  0xdf   :  { %488 = vst.msk [vmem:[#allocation2 + $0x20] sm:$0xff] %vm483_vm2, %v455_v44  ;;  %v161_v44 = vld [vmem:[%s3096_s5 + $0xf0] sm:$0xff] }
  0xe0   :  { %v298_v45 = vpop.f32.mrf.mxu0 }
  0xe1   :  { %v388_v47 = vmul.f32 %v3288_v18, %v298_v45 }
  0xe3   :  { %v424_v48 = vadd.f32 %v3291_v19, %v388_v47  ;;  %2749 = vmatmul.msk.f32.gmra.mxu0 %vm165_vm1, %v152_v46 }
  0xe5   :  { %v456_v49 = vmax.f32 %v424_v48, 0.0 }
  0xe6   :  { %v534_v51 = vld [vmem:[#allocation2 + $0x20] sm:$0xff] }
  0xe7   :  { %489 = vst.msk [vmem:[#allocation2 + $0x28] sm:$0xff] %vm483_vm2, %v456_v49  ;;  %v536_v52 = vmax.f32 %v532_v50, %v534_v51 }
  0xe8   :  { %v301_v53 = vpop.f32.mrf.mxu0 }
  0xe9   :  { %v389_v55 = vmul.f32 %v3288_v18, %v301_v53  ;;  %538 = vst.msk [vmem:[#allocation3] sm:$0xff] %vm483_vm2, %v536_v52  ;;  %v162_v52 = vld [vmem:[%s3096_s5 + $0xf8] sm:$0xff]  ;;  %s3078_s5 = smov 32  }
  0xeb   :  { %v425_v56 = vadd.f32 %v3291_v19, %v389_v55  ;;  %2750 = vmatmul.msk.f32.gmra.mxu0 %vm165_vm1, %v153_v54 }
  0xed   :  { %v457_v57 = vmax.f32 %v425_v56, 0.0 }
  0xee   :  { %v535_v59 = vld [vmem:[#allocation2 + $0x28] sm:$0xff] }
  0xef   :  { %490 = vst.msk [vmem:[#allocation2 + $0x30] sm:$0xff] %vm483_vm2, %v457_v57  ;;  %v537_v60 = vmax.f32 %v533_v58, %v535_v59 }
  0xf0   :  { %v304_v61 = vpop.f32.mrf.mxu0 }
  0xf1   :  { %v390_v63 = vmul.f32 %v3288_v18, %v304_v61  ;;  %539 = vst.msk [vmem:[#allocation3 + $0x8] sm:$0xff] %vm483_vm2, %v537_v60 }
  0xf3   :  { %v426_v0 = vadd.f32 %v3291_v19, %v390_v63  ;;  %2751 = vmatmul.msk.f32.gmra.mxu0 %vm165_vm1, %v154_v62 }
  0xf5   :  { %v458_v1 = vmax.f32 %v426_v0, 0.0 }
  0xf6   :  { %v1615_v3 = vld [vmem:[#allocation2 + $0x30] sm:$0xff] }
  0xf7   :  { %491 = vst.msk [vmem:[#allocation2 + $0x38] sm:$0xff] %vm483_vm2, %v458_v1  ;;  %v1617_v4 = vmax.f32 %v1613_v2, %v1615_v3 }
  0xf8   :  { %v307_v5 = vpop.f32.mrf.mxu0 }
  0xf9   :  { %v391_v7 = vmul.f32 %v3288_v18, %v307_v5  ;;  %1619 = vst.msk [vmem:[#allocation3 + $0x40] sm:$0xff] %vm483_vm2, %v1617_v4 }
  0xfb   :  { %v427_v8 = vadd.f32 %v3291_v19, %v391_v7  ;;  %2752 = vmatmul.msk.f32.gmra.mxu0 %vm165_vm1, %v155_v6 }
  0xfd   :  { %v459_v9 = vmax.f32 %v427_v8, 0.0 }
  0xfe   :  { %v1616_v11 = vld [vmem:[#allocation2 + $0x38] sm:$0xff] }
  0xff   :  { %492 = vst.msk [vmem:[#allocation2 + $0x40] sm:$0xff] %vm483_vm2, %v459_v9  ;;  %v1618_v12 = vmax.f32 %v1614_v10, %v1616_v11 }
 0x100   :  { %v310_v13 = vpop.f32.mrf.mxu0 }
 0x101   :  { %v392_v15 = vmul.f32 %v3288_v18, %v310_v13  ;;  %1620 = vst.msk [vmem:[#allocation3 + $0x48] sm:$0xff] %vm483_vm2, %v1618_v12 }
 0x103   :  { %v428_v16 = vadd.f32 %v3291_v19, %v392_v15  ;;  %2753 = vmatmul.msk.f32.gmra.mxu0 %vm165_vm1, %v156_v14 }
 0x105   :  { %v460_v17 = vmax.f32 %v428_v16, 0.0 }
 0x106   :  { %v540_v40 = vld [vmem:[#allocation2 + $0x40] sm:$0xff] }
 0x107   :  { %493 = vst.msk [vmem:[#allocation2 + $0x48] sm:$0xff] %vm483_vm2, %v460_v17 }
 0x108   :  { %v313_v20 = vpop.f32.mrf.mxu0 }
 0x109   :  { %v393_v22 = vmul.f32 %v3288_v18, %v313_v20 }
 0x10b   :  { %v429_v23 = vadd.f32 %v3291_v19, %v393_v22  ;;  %2754 = vmatmul.msk.f32.gmra.mxu0 %vm165_vm1, %v157_v21 }
 0x10d   :  { %v461_v24 = vmax.f32 %v429_v23, 0.0 }
 0x10e   :  { %v541_v48 = vld [vmem:[#allocation2 + $0x48] sm:$0xff] }
 0x10f   :  { %494 = vst.msk [vmem:[#allocation2 + $0x50] sm:$0xff] %vm483_vm2, %v461_v24 }
 0x110   :  { %v316_v25 = vpop.f32.mrf.mxu0 }
 0x111   :  { %v394_v27 = vmul.f32 %v3288_v18, %v316_v25 }
 0x113   :  { %v430_v28 = vadd.f32 %v3291_v19, %v394_v27  ;;  %2755 = vmatmul.msk.f32.gmra.mxu0 %vm165_vm1, %v158_v26 }
 0x115   :  { %v462_v29 = vmax.f32 %v430_v28, 0.0 }
 0x116   :  { %v1621_v56 = vld [vmem:[#allocation2 + $0x50] sm:$0xff] }
 0x117   :  { %495 = vst.msk [vmem:[#allocation2 + $0x58] sm:$0xff] %vm483_vm2, %v462_v29 }
 0x118   :  { %v319_v30 = vpop.f32.mrf.mxu0 }
 0x119   :  { %v395_v32 = vmul.f32 %v3288_v18, %v319_v30 }
 0x11b   :  { %v431_v33 = vadd.f32 %v3291_v19, %v395_v32  ;;  %2756 = vmatmul.msk.f32.gmra.mxu0 %vm165_vm1, %v159_v31 }
 0x11d   :  { %v463_v34 = vmax.f32 %v431_v33, 0.0 }
 0x11e   :  { %v1622_v0 = vld [vmem:[#allocation2 + $0x58] sm:$0xff] }
 0x11f   :  { %496 = vst.msk [vmem:[#allocation2 + $0x60] sm:$0xff] %vm483_vm2, %v463_v34 }
 0x120   :  { %v322_v35 = vpop.f32.mrf.mxu0 }
 0x121   :  { %v396_v37 = vmul.f32 %v3288_v18, %v322_v35 }
 0x123   :  { %v432_v38 = vadd.f32 %v3291_v19, %v396_v37  ;;  %2757 = vmatmul.msk.f32.gmra.mxu0 %vm165_vm1, %v160_v36 }
 0x125   :  { %v464_v39 = vmax.f32 %v432_v38, 0.0  ;;  %v572_v38 = vld [vmem:[#allocation3 + $0x1] sm:$0xff] }
 0x126   :  { %v542_v41 = vld [vmem:[#allocation2 + $0x60] sm:$0xff] }
 0x127   :  { %497 = vst.msk [vmem:[#allocation2 + $0x68] sm:$0xff] %vm483_vm2, %v464_v39  ;;  %v544_v42 = vmax.f32 %v540_v40, %v542_v41 }
 0x128   :  { %v325_v43 = vpop.f32.mrf.mxu0 }
 0x129   :  { %v397_v45 = vmul.f32 %v3288_v18, %v325_v43  ;;  %546 = vst.msk [vmem:[#allocation3 + $0x10] sm:$0xff] %vm483_vm2, %v544_v42 }
 0x12b   :  { %v433_v46 = vadd.f32 %v3291_v19, %v397_v45  ;;  %2758 = vmatmul.msk.f32.gmra.mxu0 %vm165_vm1, %v161_v44 }
 0x12d   :  { %v465_v47 = vmax.f32 %v433_v46, 0.0 }
 0x12e   :  { %v543_v49 = vld [vmem:[#allocation2 + $0x68] sm:$0xff] }
 0x12f   :  { %498 = vst.msk [vmem:[#allocation2 + $0x70] sm:$0xff] %vm483_vm2, %v465_v47  ;;  %v545_v50 = vmax.f32 %v541_v48, %v543_v49  ;;  %v3419_v48 = vld [vmem:[#allocation3 + $0x2] sm:$0xff] }
 0x130   :  { %v328_v51 = vpop.f32.mrf.mxu0 }
 0x131   :  { %v398_v53 = vmul.f32 %v3288_v18, %v328_v51  ;;  %547 = vst.msk [vmem:[#allocation3 + $0x18] sm:$0xff] %vm483_vm2, %v545_v50 }
 0x133   :  { %v434_v54 = vadd.f32 %v3291_v19, %v398_v53  ;;  %2759 = vmatmul.msk.f32.gmra.mxu0 %vm165_vm1, %v162_v52 }
 0x135   :  { %v466_v55 = vmax.f32 %v434_v54, 0.0 }
 0x136   :  { %v1623_v57 = vld [vmem:[#allocation2 + $0x70] sm:$0xff] }
 0x137   :  { %499 = vst.msk [vmem:[#allocation2 + $0x78] sm:$0xff] %vm483_vm2, %v466_v55  ;;  %v1625_v58 = vmax.f32 %v1621_v56, %v1623_v57 }
 0x138   :  { %v331_v59 = vpop.f32.mrf.mxu0  ;;  %v3379_v60 = vld [vmem:[#allocation3 + $0x12] sm:$0xff]  ;;  %v3387_v4 = vld [vmem:[#allocation3 + $0x1a] sm:$0x1f] }
 0x139   :  { %v399_v61 = vmul.f32 %v3288_v18, %v331_v59  ;;  %642 = vrot.lane.b32.xlu0 %v3379_v60, %s3077_s0  ;;  %1627 = vst.msk [vmem:[#allocation3 + $0x50] sm:$0xff] %vm483_vm2, %v1625_v58 }
 0x13b   :  { %v435_v62 = vadd.f32 %v3291_v19, %v399_v61  ;;  %v573_v61 = vld [vmem:[#allocation3 + $0x9] sm:$0x1f] }
 0x13d   :  { %v467_v63 = vmax.f32 %v435_v62, 0.0 }
 0x13e   :  { %v1624_v1 = vld [vmem:[#allocation2 + $0x78] sm:$0xff] }
 0x13f   :  { %500 = vst.msk [vmem:[#allocation2 + $0x80] sm:$0xff] %vm483_vm2, %v467_v63  ;;  %v1626_v2 = vmax.f32 %v1622_v0, %v1624_v1 }
 0x140   :  { %v334_v3 = vpop.f32.mrf.mxu0 }
 0x141   :  { %v400_v5 = vmul.f32 %v3288_v18, %v334_v3  ;;  %644 = vrot.lane.b32.xlu0 %v3387_v4, %s3077_s0  ;;  %1628 = vst.msk [vmem:[#allocation3 + $0x58] sm:$0xff] %vm483_vm2, %v1626_v2  ;;  %v687_v3 = vld [vmem:[%s3116_s21 + $0x98] sm:$0xff] }
 0x142   :  { %733 = vmatpush.msra.mxu2 %v687_v3 }
 0x143   :  { %v436_v6 = vadd.f32 %v3291_v19, %v400_v5 }
 0x145   :  { %v468_v7 = vmax.f32 %v436_v6, 0.0  ;;  %v686_v6 = vld [vmem:[%s3116_s21 + $0x90] sm:$0xff] }
 0x146   :  { %v548_v26 = vld [vmem:[#allocation2 + $0x80] sm:$0xff]  ;;  %734 = vmatpush.msra.mxu2 %v686_v6 }
 0x147   :  { %501 = vst.msk [vmem:[#allocation2 + $0x88] sm:$0xff] %vm483_vm2, %v468_v7 }
 0x148   :  { %v337_v8 = vpop.f32.mrf.mxu0 }
 0x149   :  { %v401_v9 = vmul.f32 %v3288_v18, %v337_v8  ;;  %v3443_v8 = vld [vmem:[#allocation3 + $0x49] sm:$0x1f] }
 0x14b   :  { %v437_v10 = vadd.f32 %v3291_v19, %v401_v9 }
 0x14d   :  { %v469_v11 = vmax.f32 %v437_v10, 0.0  ;;  %v685_v10 = vld [vmem:[%s3116_s21 + $0x88] sm:$0xff] }
 0x14e   :  { %v549_v33 = vld [vmem:[#allocation2 + $0x88] sm:$0xff]  ;;  %735 = vmatpush.msra.mxu2 %v685_v10 }
 0x14f   :  { %502 = vst.msk [vmem:[#allocation2 + $0x90] sm:$0xff] %vm483_vm2, %v469_v11 }
 0x150   :  { %v340_v12 = vpop.f32.mrf.mxu0 }
 0x151   :  { %v402_v13 = vmul.f32 %v3288_v18, %v340_v12 }
 0x153   :  { %v438_v14 = vadd.f32 %v3291_v19, %v402_v13  ;;  %v684_v13 = vld [vmem:[%s3116_s21 + $0x80] sm:$0xff] }
 0x154   :  { %736 = vmatpush.msra.mxu2 %v684_v13 }
 0x155   :  { %v470_v15 = vmax.f32 %v438_v14, 0.0 }
 0x156   :  { %v1629_v43 = vld [vmem:[#allocation2 + $0x90] sm:$0xff]  ;;  %859 = vmatpush.msrb.mxu2 %v687_v3  ;;  %v575_v3 = vld [vmem:[#allocation3 + $0x19] sm:$0x1f] }
 0x157   :  { %503 = vst.msk [vmem:[#allocation2 + $0x98] sm:$0xff] %vm483_vm2, %v470_v15 }
 0x158   :  { %v343_v16 = vpop.f32.mrf.mxu0  ;;  %860 = vmatpush.msrb.mxu2 %v686_v6 }
 0x159   :  { %v403_v17 = vmul.f32 %v3288_v18, %v343_v16 }
 0x15a   :  { %861 = vmatpush.msrb.mxu2 %v685_v10 }
 0x15b   :  { %v439_v20 = vadd.f32 %v3291_v19, %v403_v17 }
 0x15c   :  { %862 = vmatpush.msrb.mxu2 %v684_v13  ;;  %v681_v13 = vld [vmem:[%s3116_s21 + $0x68] sm:$0xff] }
 0x15d   :  { %v471_v21 = vmax.f32 %v439_v20, 0.0 }
 0x15e   :  { %v1630_v53 = vld [vmem:[#allocation2 + $0x98] sm:$0xff] }
 0x15f   :  { %504 = vst.msk [vmem:[#allocation2 + $0xa0] sm:$0xff] %vm483_vm2, %v471_v21 }
 0x160   :  { %v346_v22 = vpop.f32.mrf.mxu0 }
 0x161   :  { %v404_v23 = vmul.f32 %v3288_v18, %v346_v22 }
 0x163   :  { %v440_v24 = vadd.f32 %v3291_v19, %v404_v23 }
 0x165   :  { %v472_v25 = vmax.f32 %v440_v24, 0.0 }
 0x166   :  { %v550_v27 = vld [vmem:[#allocation2 + $0xa0] sm:$0xff] }
 0x167   :  { %505 = vst.msk [vmem:[#allocation2 + $0xa8] sm:$0xff] %vm483_vm2, %v472_v25  ;;  %v552_v28 = vmax.f32 %v548_v26, %v550_v27 }
 0x168   :  { %v349_v29 = vpop.f32.mrf.mxu0 }
 0x169   :  { %v405_v30 = vmul.f32 %v3288_v18, %v349_v29  ;;  %554 = vst.msk [vmem:[#allocation3 + $0x20] sm:$0xff] %vm483_vm2, %v552_v28 }
 0x16b   :  { %v441_v31 = vadd.f32 %v3291_v19, %v405_v30 }
 0x16d   :  { %v473_v32 = vmax.f32 %v441_v31, 0.0 }
 0x16e   :  { %v551_v34 = vld [vmem:[#allocation2 + $0xa8] sm:$0xff] }
 0x16f   :  { %v553_v35 = vmax.f32 %v549_v33, %v551_v34  ;;  %506 = vst.msk [vmem:[#allocation2 + $0xb0] sm:$0xff] %vm483_vm2, %v473_v32 }
 0x170   :  { %v352_v36 = vpop.f32.mrf.mxu0  ;;  %v3411_v37 = vld [vmem:[#allocation3 + $0x20] sm:$0xff] }
 0x171   :  { %555 = vst.msk [vmem:[#allocation3 + $0x28] sm:$0xff] %vm483_vm2, %v553_v35  ;;  %v406_v39 = vmul.f32 %v3288_v18, %v352_v36  ;;  %v2848_v40 = vpack.i.bf16 %v3411_v37, %v572_v38 }
 0x173   :  { %v442_v41 = vadd.f32 %v3291_v19, %v406_v39  ;;  %2849 = vrot.lane.b32.xlu1 %v2848_v40, %s3078_s5 }
 0x175   :  { %v474_v42 = vmax.f32 %v442_v41, 0.0 }
 0x176   :  { %v1631_v44 = vld [vmem:[#allocation2 + $0xb0] sm:$0xff] }
 0x177   :  { %507 = vst.msk [vmem:[#allocation2 + $0xb8] sm:$0xff] %vm483_vm2, %v474_v42  ;;  %v1633_v45 = vmax.f32 %v1629_v43, %v1631_v44  ;;  %v574_v44 = vld [vmem:[#allocation3 + $0x11] sm:$0xff] }
 0x178   :  { %v355_v46 = vpop.f32.mrf.mxu0  ;;  %v576_v47 = vld [vmem:[#allocation3 + $0x21] sm:$0xff]  ;;  %v3427_v56 = vld [vmem:[#allocation3 + $0x29] sm:$0x1f] }
 0x179   :  { %v407_v49 = vmul.f32 %v3288_v18, %v355_v46  ;;  %v2858_v50 = vpack.i.bf16 %v576_v47, %v3419_v48  ;;  %v2853_v51 = vpack.i.bf16 %v572_v38, %v576_v47  ;;  %1635 = vst.msk [vmem:[#allocation3 + $0x60] sm:$0xff] %vm483_vm2, %v1633_v45  ;;  %v3429_v57 = vld [vmem:[#allocation3 + $0x28] sm:$0x1f]  ;;  %v2868_v63 = vpack.i.bf16 %v573_v61, %v3427_v56  ;;  %v566_v45 = vld [vmem:[#allocation3 + $0x10] sm:$0xff] }
 0x17a   :  { %v2863_v0 = vpack.i.bf16 %v3429_v57, %v573_v61 }
 0x17b   :  { %v443_v52 = vadd.f32 %v3291_v19, %v407_v49  ;;  %2859 = vrot.lane.b32.xlu1 %v2858_v50, %s4239_s9  ;;  %2854 = vrot.lane.b32.xlu2 %v2853_v51, %s3080_s13  ;;  %v581_v51 = vld [vmem:[#allocation3 + $0xa] sm:$0x1f] }
 0x17d   :  { %v475_v54 = vmax.f32 %v443_v52, 0.0 }
 0x17e   :  { %v1632_v55 = vld [vmem:[#allocation2 + $0xb8] sm:$0xff] }
 0x17f   :  { %v1634_v58 = vmax.f32 %v1630_v53, %v1632_v55  ;;  %508 = vst.msk [vmem:[#allocation2 + $0xc0] sm:$0xff] %vm483_vm2, %v475_v54 }
 0x180   :  { %v358_v59 = vpop.f32.mrf.mxu0 }
 0x181   :  { %1636 = vst.msk [vmem:[#allocation3 + $0x68] sm:$0xff] %vm483_vm2, %v1634_v58  ;;  %v408_v62 = vmul.f32 %v3288_v18, %v358_v59 }
 0x183   :  { %v444_v1 = vadd.f32 %v3291_v19, %v408_v62  ;;  %2869 = vrot.lane.b32.xlu1 %v2868_v63, %s3080_s13  ;;  %2864 = vrot.lane.b32.xlu2 %v2863_v0, %s3078_s5 }
 0x185   :  { %v476_v2 = vmax.f32 %v444_v1, 0.0 }
 0x186   :  { %v556_v29 = vld [vmem:[#allocation2 + $0xc0] sm:$0xff] }
 0x187   :  { %509 = vst.msk [vmem:[#allocation2 + $0xc8] sm:$0xff] %vm483_vm2, %v476_v2 }
 0x188   :  { %v361_v5 = vpop.f32.mrf.mxu0  ;;  %v3445_v9 = vld [vmem:[#allocation3 + $0x69] sm:$0x1f] }
 0x189   :  { %v409_v7 = vmul.f32 %v3288_v18, %v361_v5  ;;  %v2959_v11 = vpack.i.bf16 %v3445_v9, %v3443_v8  ;;  %v567_v5 = vld [vmem:[#allocation3 + $0x18] sm:$0x1f] }
 0x18a   :  { %v1756_v9 = vld [vmem:[%s3116_s21 + $0x58] sm:$0xff] }
 0x18b   :  { %v445_v12 = vadd.f32 %v3291_v19, %v409_v7 }
 0x18d   :  { %v477_v14 = vmax.f32 %v445_v12, 0.0  ;;  %v682_v12 = vld [vmem:[%s3116_s21 + $0x70] sm:$0xff] }
 0x18e   :  { %v557_v39 = vld [vmem:[#allocation2 + $0xc8] sm:$0xff] }
 0x18f   :  { %510 = vst.msk [vmem:[#allocation2 + $0xd0] sm:$0xff] %vm483_vm2, %v477_v14  ;;  %v680_v14 = vld [vmem:[%s3116_s21 + $0x60] sm:$0xff] }
 0x190   :  { %v364_v15 = vpop.f32.mrf.mxu0 }
 0x191   :  { %v410_v16 = vmul.f32 %v3288_v18, %v364_v15  ;;  %v679_v15 = vld [vmem:[%s3116_s21 + $0x58] sm:$0xff] }
 0x193   :  { %v446_v17 = vadd.f32 %v3291_v19, %v410_v16  ;;  %v677_v16 = vld [vmem:[%s3116_s21 + $0x48] sm:$0xff] }
 0x195   :  { %v478_v20 = vmax.f32 %v446_v17, 0.0  ;;  %v676_v17 = vld [vmem:[%s3116_s21 + $0x40] sm:$0xff] }
 0x196   :  { %v1637_v54 = vld [vmem:[#allocation2 + $0xd0] sm:$0xff] }
 0x197   :  { %511 = vst.msk [vmem:[#allocation2 + $0xd8] sm:$0xff] %vm483_vm2, %v478_v20  ;;  %v675_v20 = vld [vmem:[%s3116_s21 + $0x38] sm:$0xff] }
 0x198   :  { %v367_v21 = vpop.f32.mrf.mxu0 }
 0x199   :  { %v411_v22 = vmul.f32 %v3288_v18, %v367_v21 }
 0x19b   :  { %v447_v23 = vadd.f32 %v3291_v19, %v411_v22  ;;  %v674_v22 = vld [vmem:[%s3116_s21 + $0x30] sm:$0xff] }
 0x19d   :  { %v479_v24 = vmax.f32 %v447_v23, 0.0  ;;  %v673_v23 = vld [vmem:[%s3116_s21 + $0x28] sm:$0xff] }
 0x19e   :  { %v1638_v62 = vld [vmem:[#allocation2 + $0xd8] sm:$0xff] }
 0x19f   :  { %512 = vst.msk [vmem:[#allocation2 + $0xe0] sm:$0xff] %vm483_vm2, %v479_v24 }
 0x1a0   :  { %v370_v25 = vpop.f32.mrf.mxu0 }
 0x1a1   :  { %v412_v26 = vmul.f32 %v3288_v18, %v370_v25  ;;  %v672_v25 = vld [vmem:[%s3116_s21 + $0x20] sm:$0xff] }
 0x1a3   :  { %v448_v27 = vadd.f32 %v3291_v19, %v412_v26  ;;  %v671_v26 = vld [vmem:[%s3116_s21 + $0x18] sm:$0xff] }
 0x1a5   :  { %v480_v28 = vmax.f32 %v448_v27, 0.0 }
 0x1a6   :  { %v558_v30 = vld [vmem:[#allocation2 + $0xe0] sm:$0xff] }
 0x1a7   :  { %v560_v31 = vmax.f32 %v556_v29, %v558_v30  ;;  %513 = vst.msk [vmem:[#allocation2 + $0xe8] sm:$0xff] %vm483_vm2, %v480_v28  ;;  %v670_v28 = vld [vmem:[%s3116_s21 + $0x10] sm:$0xff]  ;;  %v669_v29 = vld [vmem:[%s3116_s21 + $0x8] sm:$0xff]  ;;  %v668_v30 = vld [vmem:[%s3116_s21] sm:$0xff] }
 0x1a8   :  { %v373_v32 = vpop.f32.mrf.mxu0 }
 0x1a9   :  { %562 = vst.msk [vmem:[#allocation3 + $0x30] sm:$0xff] %vm483_vm2, %v560_v31  ;;  %v413_v33 = vmul.f32 %v3288_v18, %v373_v32 }
 0x1ab   :  { %v449_v34 = vadd.f32 %v3291_v19, %v413_v33  ;;  %v643_v35 = vpop.permute.xlu0 %642 }
 0x1ac   :  { %v666_v36 = vsel %vm483_vm2, %v3419_v48, %v643_v35 }
 0x1ad   :  { %v481_v38 = vmax.f32 %v449_v34, 0.0  ;;  %2760 = vmatmul.msk.f32.vlgmr.msra.gmra.mxu2 %vm516_vm3, %v666_v36 }
 0x1ae   :  { %v559_v40 = vld [vmem:[#allocation2 + $0xe8] sm:$0xff] }
 0x1af   :  { %514 = vst.msk [vmem:[#allocation2 + $0xf0] sm:$0xff] %vm483_vm2, %v481_v38  ;;  %v561_v41 = vmax.f32 %v557_v39, %v559_v40  ;;  %v564_v39 = vld [vmem:[#allocation3] sm:$0xff] }
 0x1b0   :  { %v376_v42 = vpop.f32.mrf.mxu0  ;;  %v570_v43 = vld [vmem:[#allocation3 + $0x30] sm:$0xff] }
 0x1b1   :  { %v414_v46 = vmul.f32 %v3288_v18, %v376_v42  ;;  %v2878_v47 = vpack.i.bf16 %v570_v43, %v574_v44  ;;  %v2873_v49 = vpack.i.bf16 %v566_v45, %v570_v43  ;;  %563 = vst.msk [vmem:[#allocation3 + $0x38] sm:$0xff] %vm483_vm2, %v561_v41 }
 0x1b3   :  { %v450_v48 = vadd.f32 %v3291_v19, %v414_v46  ;;  %v645_v50 = vpop.permute.xlu0 %644  ;;  %2879 = vrot.lane.b32.xlu2 %v2878_v47, %s4241_s17  ;;  %2874 = vrot.lane.b32.xlu1 %v2873_v49, %s3077_s0 }
 0x1b4   :  { %v667_v52 = vsel %vm483_vm2, %v581_v51, %v645_v50 }
 0x1b5   :  { %v482_v53 = vmax.f32 %v450_v48, 0.0  ;;  %2761 = vmatmul.msk.f32.gmra.mxu2 %vm516_vm3, %v667_v52  ;;  %v746_v48 = vld [vmem:[#allocation3 + $0x22] sm:$0xff] }
 0x1b6   :  { %v1639_v18 = vld [vmem:[#allocation2 + $0xf0] sm:$0xff] }
 0x1b7   :  { %515 = vst.msk [vmem:[#allocation2 + $0xf8] sm:$0xff] %vm483_vm2, %v482_v53  ;;  %v1641_v55 = vmax.f32 %v1637_v54, %v1639_v18 }
 0x1b8   :  { %v578_v58 = vld [vmem:[#allocation3 + $0x31] sm:$0xff]  ;;  %v579_v0 = vld [vmem:[#allocation3 + $0x39] sm:$0x1f] }
 0x1b9   :  { %v2888_v19 = vpack.i.bf16 %v578_v58, %v3379_v60  ;;  %v2883_v59 = vpack.i.bf16 %v574_v44, %v578_v58  ;;  %1643 = vst.msk [vmem:[#allocation3 + $0x70] sm:$0xff] %vm483_vm2, %v1641_v55  ;;  %v748_v61 = vld [vmem:[#allocation3 + $0x32] sm:$0xff]  ;;  %v2903_v60 = vpack.i.bf16 %v575_v3, %v579_v0  ;;  %v749_v7 = vld [vmem:[#allocation3 + $0x3a] sm:$0x1f] }
 0x1ba   :  { %v571_v1 = vld [vmem:[#allocation3 + $0x38] sm:$0x1f] }
 0x1bb   :  { %796 = vrot.lane.b32.xlu1 %v748_v61, %s3077_s0  ;;  %2889 = vrot.lane.b32.xlu2 %v2888_v19, %s3082_s22  ;;  %v2893_v6 = vpack.i.bf16 %v567_v5, %v571_v1  ;;  %v2898_v10 = vpack.i.bf16 %v571_v1, %v575_v3 }
 0x1bc   :  { %2884 = vrot.lane.b32.xlu0 %v2883_v59, %s3083_s23 }
 0x1be   :  { %v1640_v63 = vld [vmem:[#allocation2 + $0xf8] sm:$0xff] }
 0x1bf   :  { %v1642_v2 = vmax.f32 %v1638_v62, %v1640_v63 }
 0x1c1   :  { %1644 = vst.msk [vmem:[#allocation3 + $0x78] sm:$0xff] %vm483_vm2, %v1642_v2 }
 0x1c3   :  { %790 = vrot.lane.b32.xlu1 %v3387_v4, %s3082_s22  ;;  %2904 = vrot.lane.b32.xlu2 %v2903_v60, %s3083_s23  ;;  %v683_v4 = vld [vmem:[%s3116_s21 + $0x78] sm:$0xff] }
 0x1c4   :  { %2894 = vrot.lane.b32.xlu0 %v2893_v6, %s3077_s0  ;;  %698 = vmatpush.msra.mxu1 %v683_v4 }
 0x1c5   :  { %824 = vmatpush.msra.mxu3 %v683_v4 }
 0x1c6   :  { %699 = vmatpush.msra.mxu1 %v682_v12 }
 0x1c7   :  { %825 = vmatpush.msra.mxu3 %v682_v12 }
 0x1c8   :  { %700 = vmatpush.msra.mxu1 %v681_v13 }
 0x1c9   :  { %826 = vmatpush.msra.mxu3 %v681_v13 }
 0x1ca   :  { %701 = vmatpush.msra.mxu1 %v680_v14 }
 0x1cb   :  { %636 = vrot.lane.b32.xlu1 %v579_v0, %s3082_s22  ;;  %798 = vrot.lane.b32.xlu2 %v749_v7, %s3077_s0 }
 0x1cc   :  { %2899 = vrot.lane.b32.xlu0 %v2898_v10, %s4241_s17  ;;  %827 = vmatpush.msra.mxu3 %v680_v14  ;;  %v747_v10 = vld [vmem:[#allocation3 + $0x2a] sm:$0x1f] }
 0x1cd   :  { %702 = vmatpush.msra.mxu1 %v679_v15 }
 0x1ce   :  { %828 = vmatpush.msra.mxu3 %v679_v15 }
 0x1d4   :  { %784 = vrot.lane.b32.xlu0 %v581_v51, %s4239_s9 }
 0x1d5   :  { %v3502_v21 = vpop.permute.xlu2 %2854 }
 0x1d6   :  { %v2857_v53 = vunpack.i.h.bf16 %v3502_v21 }
 0x1dc   :  { %628 = vrot.lane.b32.xlu0 %v3427_v56, %s4239_s9  ;;  %v678_v56 = vld [vmem:[%s3116_s21 + $0x50] sm:$0xff] }
 0x1dd   :  { %703 = vmatpush.msra.mxu1 %v678_v56  ;;  %829 = vmatpush.msra.mxu3 %v678_v56  ;;  %v3508_v27 = vpop.permute.xlu2 %2864 }
 0x1de   :  { %v2866_v15 = vunpack.i.l.bf16 %v3508_v27 }
 0x1df   :  { %704 = vmatpush.msra.mxu1 %v677_v16  ;;  %830 = vmatpush.msra.mxu3 %v677_v16 }
 0x1e1   :  { %705 = vmatpush.msra.mxu1 %v676_v17  ;;  %831 = vmatpush.msra.mxu3 %v676_v17 }
 0x1e3   :  { %706 = vmatpush.msra.mxu1 %v675_v20  ;;  %832 = vmatpush.msra.mxu3 %v675_v20 }
 0x1e5   :  { %707 = vmatpush.msra.mxu1 %v674_v22  ;;  %833 = vmatpush.msra.mxu3 %v674_v22  ;;  %v2850_v24 = vpop.permute.xlu1 %2849 }
 0x1e6   :  { %v2852_v40 = vunpack.i.h.bf16 %v2850_v24  ;;  %v2851_v41 = vunpack.i.l.bf16 %v2850_v24 }
 0x1e7   :  { %708 = vmatpush.msra.mxu1 %v673_v23  ;;  %834 = vmatpush.msra.mxu3 %v673_v23  ;;  %v565_v23 = vld [vmem:[#allocation3 + $0x8] sm:$0x1f] }
 0x1e9   :  { %709 = vmatpush.msra.mxu1 %v672_v25  ;;  %835 = vmatpush.msra.mxu3 %v672_v25 }
 0x1eb   :  { %710 = vmatpush.msra.mxu1 %v671_v26  ;;  %836 = vmatpush.msra.mxu3 %v671_v26 }
 0x1ed   :  { %711 = vmatpush.msra.mxu1 %v670_v28  ;;  %837 = vmatpush.msra.mxu3 %v670_v28  ;;  %v2860_v31 = vpop.permute.xlu1 %2859 }
 0x1ee   :  { %v2862_v55 = vunpack.i.h.bf16 %v2860_v31  ;;  %v2861_v59 = vunpack.i.l.bf16 %v2860_v31 }
 0x1ef   :  { %712 = vmatpush.msra.mxu1 %v669_v29  ;;  %838 = vmatpush.msra.mxu3 %v669_v29 }
 0x1f1   :  { %713 = vmatpush.msra.mxu1 %v668_v30  ;;  %839 = vmatpush.msra.mxu3 %v668_v30 }
 0x1f5   :  { %v3513_v33 = vpop.permute.xlu1 %2869 }
 0x20d   :  { %v2880_v32 = vpop.permute.xlu2 %2879 }
 0x20e   :  { %v2882_v47 = vunpack.i.h.bf16 %v2880_v32  ;;  %v2881_v49 = vunpack.i.l.bf16 %v2880_v32 }
 0x215   :  { %v2890_v34 = vpop.permute.xlu2 %2889 }
 0x216   :  { %v2892_v63 = vunpack.i.h.bf16 %v2890_v34  ;;  %v2891_v0 = vunpack.i.l.bf16 %v2890_v34 }
 0x21d   :  { %v3518_v44 = vpop.permute.xlu2 %2904 }
 0x21e   :  { %v2906_v25 = vunpack.i.l.bf16 %v3518_v44 }
 0x225   :  { %v2875_v35 = vpop.permute.xlu1 %2874  ;;  %v799_v5 = vpop.permute.xlu2 %798 }
 0x226   :  { %v2877_v36 = vunpack.i.h.bf16 %v2875_v35  ;;  %v2876_v38 = vunpack.i.l.bf16 %v2875_v35  ;;  %v817_v12 = vsel %vm483_vm2, %v747_v10, %v799_v5 }
 0x228   :  { %v648_v42 = vsel %vm483_vm2, %v564_v39, %v2877_v36  ;;  %v802_v43 = vsel %vm483_vm2, %v3411_v37, %v2876_v38  ;;  %v2856_v37 = vunpack.i.l.bf16 %v3502_v21  ;;  %v2871_v21 = vunpack.i.l.bf16 %v3513_v33 }
 0x229   :  { %v650_v45 = vsel %vm516_vm3, %v648_v42, %v2852_v40  ;;  %v804_v46 = vsel %vm516_vm3, %v802_v43, %v2851_v41  ;;  %v2872_v38 = vunpack.i.h.bf16 %v3513_v33  ;;  %v2907_v40 = vunpack.i.h.bf16 %v3518_v44  ;;  %v926_v33 = vld [vmem:[%s3126_s29 + $0x18] sm:$0xff]  ;;  %v925_v44 = vld [vmem:[%s3126_s29 + $0x10] sm:$0xff] }
 0x22a   :  { %v653_v51 = vsel %vm652_vm4, %v650_v45, %v2882_v47  ;;  %v806_v52 = vsel %vm652_vm4, %v804_v46, %v2881_v49  ;;  %v3084_v46 = vmov 0.0   ;;  %943 = vmatpush.msra.mxu2 %v926_v33  ;;  %v924_v47 = vld [vmem:[%s3126_s29 + $0x8] sm:$0xff]  ;;  %v923_v49 = vld [vmem:[%s3126_s29] sm:$0xff]  ;;  %v998_v33 = vld [vmem:[%s3136_s8 + $0x18] sm:$0xff] }
 0x22b   :  { %v655_v61 = vsel %vm524_vm5, %v653_v51, %v2857_v53  ;;  %v808_v62 = vsel %vm524_vm5, %v806_v52, %v2856_v37  ;;  %517 = vst.msk [vmem:[#allocation4] sm:$0xff] %vm516_vm3, %v3084_v46 }
 0x22c   :  { %518 = vst.msk [vmem:[#allocation4 + $0x8] sm:$0xff] %vm516_vm3, %v3084_v46  ;;  %944 = vmatpush.msra.mxu2 %v925_v44  ;;  %v956_v44 = vld [vmem:[%s3131_s3 + $0x10] sm:$0xff] }
 0x22d   :  { %v797_v50 = vpop.permute.xlu1 %796  ;;  %521 = vst.msk [vmem:[#allocation4 + $0x18] sm:$0xff] %vm516_vm3, %v3084_v46 }
 0x22e   :  { %v816_v54 = vsel %vm483_vm2, %v746_v48, %v797_v50  ;;  %v2885_v18 = vpop.permute.xlu0 %2884  ;;  %522 = vst.msk [vmem:[#allocation4 + $0x20] sm:$0xff] %vm516_vm3, %v3084_v46  ;;  %945 = vmatpush.msra.mxu2 %v924_v47  ;;  %v2982_v50 = vld [vmem:[%s3121_s25] ss:$0 sm:$0xff]  ;;  %v997_v47 = vld [vmem:[%s3136_s8 + $0x10] sm:$0xff] }
 0x22f   :  { %v2887_v58 = vunpack.i.h.bf16 %v2885_v18  ;;  %v2886_v19 = vunpack.i.l.bf16 %v2885_v18  ;;  %2762 = vmatmul.msk.f32.vlgmr.msrb.gmra.mxu2 %vm516_vm3, %v816_v54  ;;  %525 = vst.msk [vmem:[#allocation5] sm:$0xff] %vm524_vm5, %v3084_v46 }
 0x230   :  { %526 = vst.msk [vmem:[#allocation5 + $0x8] sm:$0xff] %vm524_vm5, %v3084_v46  ;;  %v738_v48 = vpop.f32.mrf.mxu2  ;;  %946 = vmatpush.msra.mxu2 %v923_v49  ;;  %v955_v49 = vld [vmem:[%s3131_s3 + $0x8] sm:$0xff] }
 0x231   :  { %v658_v1 = vsel %vm657_vm6, %v655_v61, %v2887_v58  ;;  %v810_v2 = vsel %vm657_vm6, %v808_v62, %v2886_v19  ;;  %529 = vst.msk [vmem:[#allocation5 + $0x18] sm:$0xff] %vm524_vm5, %v3084_v46  ;;  %v1039_v62 = vld [vmem:[%s3141_s14 + $0x18] sm:$0xff] }
 0x232   :  { %v661_v3 = vsel %vm660_vm7, %v658_v1, %v2862_v55  ;;  %v812_v60 = vsel %vm660_vm7, %v810_v2, %v2861_v59  ;;  %530 = vst.msk [vmem:[#allocation5 + $0x20] sm:$0xff] %vm524_vm5, %v3084_v46  ;;  %1058 = vmatpush.msrb.mxu2 %v1039_v62  ;;  %v1036_v1 = vld [vmem:[%s3141_s14] sm:$0xff] }
 0x233   :  { %v664_v6 = vsel %vm663_vm8, %v661_v3, %v2892_v63  ;;  %v814_v7 = vsel %vm663_vm8, %v812_v60, %v2891_v0  ;;  %520 = vst.msk [vmem:[#allocation4 + $0x10] sm:$0x1] %vm519_vm9, %v3084_v46  ;;  %v1038_v63 = vld [vmem:[%s3141_s14 + $0x10] sm:$0xff]  ;;  %v1037_v0 = vld [vmem:[%s3141_s14 + $0x8] sm:$0xff] }
 0x234   :  { %714 = vmatmul.f32.vlgmr.msra.gmra.mxu1 %v664_v6  ;;  %840 = vmatmul.f32.vlgmr.msra.gmra.mxu3 %v814_v7  ;;  %523 = vst.msk [vmem:[#allocation4 + $0x28] sm:$0x1] %vm519_vm9, %v3084_v46 }
 0x235   :  { %v791_v29 = vpop.permute.xlu1 %790  ;;  %1059 = vmatpush.msrb.mxu2 %v1038_v63  ;;  %528 = vst.msk [vmem:[#allocation5 + $0x10] sm:$0x1] %vm527_vm14, %v3084_v46 }
 0x236   :  { %v2895_v4 = vpop.permute.xlu0 %2894  ;;  %531 = vst.msk [vmem:[#allocation5 + $0x28] sm:$0x1] %vm527_vm14, %v3084_v46  ;;  %v1339_v46 = vld [vmem:[%s4261_s7 + $0xb0] sm:$0xff] }
 0x237   :  { %2763 = vmatmul.msk.f32.gmra.mxu2 %vm516_vm3, %v817_v12  ;;  %v2896_v13 = vunpack.i.l.bf16 %v2895_v4  ;;  %v2897_v17 = vunpack.i.h.bf16 %v2895_v4 }
 0x238   :  { %v741_v51 = vpop.f32.mrf.mxu2  ;;  %1060 = vmatpush.msrb.mxu2 %v1037_v0 }
 0x239   :  { %v803_v14 = vsel %vm483_vm2, %v3429_v57, %v2896_v13  ;;  %v649_v26 = vsel %vm483_vm2, %v565_v23, %v2897_v17  ;;  %v2867_v57 = vunpack.i.h.bf16 %v3508_v27 }
 0x23a   :  { %v805_v20 = vsel %vm516_vm3, %v803_v14, %v2866_v15  ;;  %1061 = vmatpush.msrb.mxu2 %v1036_v1 }
 0x23b   :  { %v651_v32 = vsel %vm516_vm3, %v649_v26, %v2867_v57  ;;  %v1006_v57 = vld [vmem:[%s3136_s8 + $0x58] sm:$0xff] }
 0x23c   :  { %1017 = vmatpush.msrb.mxu3 %v1006_v57 }
 0x23d   :  { %v637_v42 = vpop.permute.xlu1 %636 }
 0x23e   :  { %v2900_v56 = vpop.permute.xlu0 %2899 }
 0x23f   :  { %v2901_v16 = vunpack.i.l.bf16 %v2900_v56  ;;  %v2902_v28 = vunpack.i.h.bf16 %v2900_v56 }
 0x241   :  { %v807_v22 = vsel %vm652_vm4, %v805_v20, %v2901_v16  ;;  %v654_v35 = vsel %vm652_vm4, %v651_v32, %v2902_v28  ;;  %v965_v28 = vld [vmem:[%s3131_s3 + $0x58] sm:$0xff]  ;;  %v1004_v32 = vld [vmem:[%s3136_s8 + $0x48] sm:$0xff] }
 0x242   :  { %v809_v24 = vsel %vm524_vm5, %v807_v22, %v2871_v21  ;;  %v656_v39 = vsel %vm524_vm5, %v654_v35, %v2872_v38  ;;  %976 = vmatpush.msrb.mxu1 %v965_v28  ;;  %v1003_v35 = vld [vmem:[%s3136_s8 + $0x40] sm:$0xff]  ;;  %v1002_v38 = vld [vmem:[%s3136_s8 + $0x38] sm:$0xff] }
 0x243   :  { %v811_v31 = vsel %vm657_vm6, %v809_v24, %v2906_v25  ;;  %v659_v41 = vsel %vm657_vm6, %v656_v39, %v2907_v40  ;;  %v960_v39 = vld [vmem:[%s3131_s3 + $0x30] sm:$0xff] }
 0x244   :  { %v1001_v40 = vld [vmem:[%s3136_s8 + $0x30] sm:$0xff] }
 0x246   :  { %v785_v30 = vpop.permute.xlu0 %784 }
 0x247   :  { %v813_v34 = vsel %vm660_vm7, %v811_v31, %v785_v30  ;;  %v1005_v30 = vld [vmem:[%s3136_s8 + $0x50] sm:$0xff]  ;;  %v963_v31 = vld [vmem:[%s3131_s3 + $0x48] sm:$0xff] }
 0x248   :  { %v815_v36 = vsel %vm663_vm8, %v813_v34, %v791_v29  ;;  %v964_v29 = vld [vmem:[%s3131_s3 + $0x50] sm:$0xff]  ;;  %1018 = vmatpush.msrb.mxu3 %v1005_v30  ;;  %v962_v34 = vld [vmem:[%s3131_s3 + $0x40] sm:$0xff] }
 0x249   :  { %843 = vmatmul.f32.gmra.mxu3 %v815_v36  ;;  %977 = vmatpush.msrb.mxu1 %v964_v29  ;;  %v961_v36 = vld [vmem:[%s3131_s3 + $0x38] sm:$0xff] }
 0x24a   :  { %1019 = vmatpush.msrb.mxu3 %v1004_v32 }
 0x24b   :  { %978 = vmatpush.msrb.mxu1 %v963_v31 }
 0x24c   :  { %1020 = vmatpush.msrb.mxu3 %v1003_v35 }
 0x24d   :  { %979 = vmatpush.msrb.mxu1 %v962_v34 }
 0x24e   :  { %v629_v27 = vpop.permute.xlu0 %628  ;;  %1021 = vmatpush.msrb.mxu3 %v1002_v38 }
 0x24f   :  { %v662_v43 = vsel %vm660_vm7, %v659_v41, %v629_v27  ;;  %980 = vmatpush.msrb.mxu1 %v961_v36  ;;  %v959_v27 = vld [vmem:[%s3131_s3 + $0x28] sm:$0xff] }
 0x250   :  { %v665_v45 = vsel %vm663_vm8, %v662_v43, %v637_v42  ;;  %v1000_v41 = vld [vmem:[%s3136_s8 + $0x28] sm:$0xff]  ;;  %1022 = vmatpush.msrb.mxu3 %v1001_v40  ;;  %v958_v42 = vld [vmem:[%s3131_s3 + $0x20] sm:$0xff] }
 0x251   :  { %717 = vmatmul.f32.gmra.mxu1 %v665_v45  ;;  %v999_v43 = vld [vmem:[%s3136_s8 + $0x20] sm:$0xff]  ;;  %v957_v45 = vld [vmem:[%s3131_s3 + $0x18] sm:$0xff] }
 0x252   :  { %981 = vmatpush.msrb.mxu1 %v960_v39  ;;  %1023 = vmatpush.msrb.mxu3 %v1000_v41 }
 0x254   :  { %982 = vmatpush.msrb.mxu1 %v959_v27  ;;  %1024 = vmatpush.msrb.mxu3 %v999_v43 }
 0x256   :  { %983 = vmatpush.msrb.mxu1 %v958_v42  ;;  %1025 = vmatpush.msrb.mxu3 %v998_v33 }
 0x258   :  { %984 = vmatpush.msrb.mxu1 %v957_v45  ;;  %1026 = vmatpush.msrb.mxu3 %v997_v47 }
 0x25a   :  { %985 = vmatpush.msrb.mxu1 %v956_v44 }
 0x25c   :  { %986 = vmatpush.msrb.mxu1 %v955_v49 }
 0x2b1   :  { %v715_v52 = vpop.f32.mrf.mxu1 }
 0x2b2   :  { %v716_v53 = vadd.f32 %v2982_v50, %v715_v52  ;;  %v864_v55 = vpop.f32.mrf.mxu2 }
 0x2b4   :  { %v739_v54 = vadd.f32 %v738_v48, %v716_v53  ;;  %v996_v48 = vld [vmem:[%s3136_s8 + $0x8] sm:$0xff] }
 0x2b5   :  { %1027 = vmatpush.msrb.mxu3 %v996_v48 }
 0x2b6   :  { %v744_v19 = vmax.f32 %v739_v54, 0.0 }
 0x2b7   :  { %v841_v37 = vpop.f32.mrf.mxu3 }
 0x2b8   :  { %v842_v18 = vadd.f32 %v2982_v50, %v841_v37 }
 0x2ba   :  { %v865_v58 = vadd.f32 %v864_v55, %v842_v18  ;;  %v867_v5 = vpop.f32.mrf.mxu2 }
 0x2bc   :  { %v870_v59 = vmax.f32 %v865_v58, 0.0 }
 0x2be   :  { %v872_v61 = vmax.f32 %v744_v19, %v870_v59 }
 0x2c0   :  { %874 = vst.msk [vmem:[#allocation4 + $0x2] sm:$0xff] %vm516_vm3, %v872_v61 }
 0x2c7   :  { %v877_v2 = vld [vmem:[#allocation4 + $0x2] sm:$0xff] }
 0x2c8   :  { %889 = vrot.lane.b32.xlu2 %v877_v2, %s3078_s5  ;;  %2764 = vmatmul.msk.f32.vlgmr.msra.gmra.mxu2 %vm516_vm3, %v877_v2  ;;  %v3594_v17 = vld [vmem:[#allocation4 + $0x1] sm:$0xff] }
 0x2c9   :  { %v919_v20 = vmax.f32 %v3594_v17, %v877_v2  ;;  %v883_v53 = vld [vmem:[#allocation4] sm:$0xff] }
 0x2cc   :  { %v844_v3 = vpop.f32.mrf.mxu3 }
 0x2cd   :  { %v845_v60 = vadd.f32 %v2982_v50, %v844_v3 }
 0x2ce   :  { %v718_v6 = vpop.f32.mrf.mxu1 }
 0x2cf   :  { %v868_v7 = vadd.f32 %v867_v5, %v845_v60  ;;  %v719_v10 = vadd.f32 %v2982_v50, %v718_v6  ;;  %v954_v50 = vld [vmem:[%s3131_s3] sm:$0xff] }
 0x2d0   :  { %987 = vmatpush.msrb.mxu1 %v954_v50 }
 0x2d1   :  { %v742_v4 = vadd.f32 %v741_v51, %v719_v10  ;;  %v871_v12 = vmax.f32 %v868_v7, 0.0  ;;  %v995_v51 = vld [vmem:[%s3136_s8] sm:$0xff] }
 0x2d2   :  { %1028 = vmatpush.msrb.mxu3 %v995_v51 }
 0x2d3   :  { %v745_v13 = vmax.f32 %v742_v4, 0.0 }
 0x2d5   :  { %v873_v14 = vmax.f32 %v745_v13, %v871_v12 }
 0x2d7   :  { %876 = vst.msk [vmem:[#allocation4 + $0xa] sm:$0x1f] %vm875_vm10, %v873_v14 }
 0x2de   :  { %v885_v15 = vld [vmem:[#allocation4 + $0x4] sm:$0xff]  ;;  %v886_v22 = vld [vmem:[#allocation4 + $0xc] sm:$0x1f] }
 0x2df   :  { %v881_v56 = vld [vmem:[#allocation4 + $0x3] sm:$0xff]  ;;  %909 = vrot.lane.b32.xlu0 %v885_v15, %s3080_s13  ;;  %v882_v23 = vld [vmem:[#allocation4 + $0xb] sm:$0x1f] }
 0x2e0   :  { %v878_v16 = vld [vmem:[#allocation4 + $0xa] sm:$0x1f]  ;;  %897 = vrot.lane.b32.xlu1 %v881_v56, %s3080_s13  ;;  %v921_v21 = vmax.f32 %v919_v20, %v881_v56  ;;  %v2983_v20 = vld [vmem:[%s3146_s19] ss:$0 sm:$0xff] }
 0x2e1   :  { %891 = vrot.lane.b32.xlu2 %v878_v16, %s3078_s5  ;;  %2765 = vmatmul.msk.f32.gmra.mxu2 %vm516_vm3, %v878_v16  ;;  %v3597_v24 = vld [vmem:[#allocation4 + $0x9] sm:$0x1f] }
 0x2e2   :  { %v920_v25 = vmax.f32 %v3597_v24, %v878_v16  ;;  %v884_v61 = vld [vmem:[#allocation4 + $0x8] sm:$0x1f] }
 0x2e4   :  { %v922_v26 = vmax.f32 %v920_v25, %v882_v23 }
 0x2e7   :  { %911 = vrot.lane.b32.xlu0 %v886_v22, %s3080_s13 }
 0x2e8   :  { %899 = vrot.lane.b32.xlu1 %v882_v23, %s3080_s13  ;;  %v2984_v23 = vld [vmem:[%s3151_s24] ss:$0 sm:$0xff] }
 0x2e9   :  { %2770 = vmatmul.msk.f32.vlgmr.msrb.gmra.mxu2 %vm516_vm3, %v921_v21 }
 0x2f1   :  { %2771 = vmatmul.msk.f32.gmra.mxu2 %vm516_vm3, %v922_v26 }
 0x322   :  { %v890_v52 = vpop.permute.xlu2 %889 }
 0x323   :  { %v903_v37 = vsel %vm516_vm3, %v3594_v17, %v890_v52  ;;  %v915_v54 = vsel %vm516_vm3, %v883_v53, %v890_v52  ;;  %v3085_v17 = vmov 13.0   ;;  %v1131_v52 = vld [vmem:[%s3156_s30] sm:$0xf] }
 0x324   :  { %2992 = vrcp.f32 %v3085_v17  ;;  %v1210_v17 = vld [vmem:[%s4258_s28 + $0x20] sm:$0xff] }
 0x32a   :  { %v2993_v30 = vpop.eup %2992 }
 0x32b   :  { %v1124_v38 = vmul.f32 13.0, %v2993_v30  ;;  %vm1128_vm12 = vweird.f32 %v2993_v30 }
 0x32d   :  { %v1125_v41 = vsub.f32 1.0, %v1124_v38  ;;  %v1337_v38 = vld [vmem:[%s4261_s7 + $0xa0] sm:$0xff] }
 0x32f   :  { %v1126_v45 = vmul.f32 %v2993_v30, %v1125_v41  ;;  %v1336_v41 = vld [vmem:[%s4261_s7 + $0x98] sm:$0xff] }
 0x331   :  { %v1127_v47 = vadd.f32 %v2993_v30, %v1126_v45  ;;  %v1334_v45 = vld [vmem:[%s4261_s7 + $0x88] sm:$0xff] }
 0x333   :  { %v3668_v50 = vsel %vm1128_vm12, %v2993_v30, %v1127_v47  ;;  %vm1474_vm12 = vcmask 1044480  }
 0x33b   :  { %v892_v59 = vpop.permute.xlu2 %891 }
 0x33c   :  { %v904_v62 = vsel %vm516_vm3, %v3597_v24, %v892_v59  ;;  %v916_v63 = vsel %vm516_vm3, %v884_v61, %v892_v59  ;;  %v1140_v61 = vld [vmem:[%s4257_s26] sm:$0xf] }
 0x34b   :  { %v948_v60 = vpop.f32.mrf.mxu2 }
 0x351   :  { %v910_v18 = vpop.permute.xlu0 %909 }
 0x352   :  { %v898_v55 = vpop.permute.xlu1 %897  ;;  %v917_v58 = vsel %vm524_vm5, %v915_v54, %v910_v18  ;;  %v3086_v18 = vmov 0  }
 0x353   :  { %v905_v19 = vsel %vm524_vm5, %v903_v37, %v898_v55  ;;  %2768 = vmatmul.msk.f32.vlgmr.msrb.gmra.mxu3 %vm660_vm7, %v917_v58  ;;  %2908 = vset.pattern.permute.xlu0 %v3086_v18  ;;  %v1137_v55 = vld [vmem:[%s3161_s6] sm:$0xf] }
 0x354   :  { %2766 = vmatmul.msk.f32.vlgmr.msrb.gmra.mxu1 %vm660_vm7, %v905_v19  ;;  %2979 = vset.pattern.permute.xlu1 %v3086_v18 }
 0x359   :  { %v912_v0 = vpop.permute.xlu0 %911 }
 0x35a   :  { %v900_v1 = vpop.permute.xlu1 %899  ;;  %v918_v3 = vsel %vm524_vm5, %v916_v63, %v912_v0 }
 0x35b   :  { %v906_v2 = vsel %vm524_vm5, %v904_v62, %v900_v1  ;;  %2769 = vmatmul.msk.f32.gmra.mxu3 %vm660_vm7, %v918_v3 }
 0x35c   :  { %2767 = vmatmul.msk.f32.gmra.mxu1 %vm660_vm7, %v906_v2 }
 0x364   :  { %v951_v5 = vpop.f32.mrf.mxu2 }
 0x36c   :  { %v1063_v7 = vpop.f32.mrf.mxu2 }
 0x374   :  { %v1066_v12 = vpop.f32.mrf.mxu2 }
 0x3d1   :  { %v989_v6 = vpop.f32.mrf.mxu1 }
 0x3d2   :  { %1071 = vrot.lane.b32.xlu2 %v989_v6, %s3077_s0  ;;  %v1213_v6 = vld [vmem:[%s4258_s28 + $0x38] sm:$0xff] }
 0x3d3   :  { %1226 = vmatpush.msra.mxu1 %v1213_v6 }
 0x3d6   :  { %v1030_v10 = vpop.f32.mrf.mxu3 }
 0x3d7   :  { %1079 = vrot.lane.b32.xlu1 %v1030_v10, %s3078_s5  ;;  %v1154_v10 = vld [vmem:[%s4260_s2] sm:$0x1] }
 0x3d9   :  { %v992_v4 = vpop.f32.mrf.mxu1 }
 0x3da   :  { %1073 = vrot.lane.b32.xlu0 %v992_v4, %s3077_s0 }
 0x3de   :  { %v1033_v13 = vpop.f32.mrf.mxu3 }
 0x3df   :  { %1081 = vrot.lane.b32.xlu2 %v1033_v13, %s3078_s5  ;;  %1089 = vrot.lane.b32.xlu1 %v1066_v12, %s4241_s17  ;;  %v1212_v12 = vld [vmem:[%s4258_s28 + $0x30] sm:$0xff] }
 0x3e0   :  { %v1263_v13 = vld [vmem:[%s4259_s1 + $0xb0] sm:$0xff]  ;;  %1227 = vmatpush.msra.mxu1 %v1212_v12 }
 0x3e2   :  { %1087 = vrot.lane.b32.xlu0 %v1063_v7, %s4241_s17  ;;  %v1264_v7 = vld [vmem:[%s4259_s1 + $0xb8] sm:$0xff] }
 0x3e3   :  { %1302 = vmatpush.msra.mxu3 %v1264_v7  ;;  %v1250_v7 = vld [vmem:[%s4259_s1 + $0x48] sm:$0xff] }
 0x3e5   :  { %1303 = vmatpush.msra.mxu3 %v1263_v13 }
 0x42c   :  { %v1072_v14 = vpop.permute.xlu2 %1071 }
 0x42d   :  { %v1093_v25 = vsel %vm483_vm2, %v948_v60, %v1072_v14 }
 0x439   :  { %v1082_v21 = vpop.permute.xlu2 %1081 }
 0x449   :  { %v1080_v15 = vpop.permute.xlu1 %1079 }
 0x44a   :  { %v1095_v28 = vsel %vm516_vm3, %v1093_v25, %v1080_v15  ;;  %v1211_v15 = vld [vmem:[%s4258_s28 + $0x28] sm:$0xff] }
 0x44b   :  { %1228 = vmatpush.msra.mxu1 %v1211_v15  ;;  %v1207_v25 = vld [vmem:[%s4258_s28 + $0x8] sm:$0xff]  ;;  %v1248_v15 = vld [vmem:[%s4259_s1 + $0x38] sm:$0xff] }
 0x44c   :  { %v1074_v56 = vpop.permute.xlu0 %1073 }
 0x44d   :  { %v1094_v16 = vsel %vm483_vm2, %v951_v5, %v1074_v56  ;;  %v1262_v56 = vld [vmem:[%s4259_s1 + $0xa8] sm:$0xff]  ;;  %1229 = vmatpush.msra.mxu1 %v1210_v17  ;;  %v1247_v17 = vld [vmem:[%s4259_s1 + $0x30] sm:$0xff] }
 0x44e   :  { %v1096_v22 = vsel %vm516_vm3, %v1094_v16, %v1082_v21  ;;  %1304 = vmatpush.msra.mxu3 %v1262_v56  ;;  %v1209_v21 = vld [vmem:[%s4258_s28 + $0x18] sm:$0xff]  ;;  %v1325_v56 = vld [vmem:[%s4261_s7 + $0x40] sm:$0xff] }
 0x44f   :  { %1230 = vmatpush.msra.mxu1 %v1209_v21  ;;  %v1246_v21 = vld [vmem:[%s4259_s1 + $0x28] sm:$0xff] }
 0x451   :  { %v1090_v24 = vpop.permute.xlu1 %1089 }
 0x452   :  { %v1098_v26 = vsel %vm652_vm4, %v1096_v22, %v1090_v24  ;;  %v1260_v22 = vld [vmem:[%s4259_s1 + $0x98] sm:$0xff]  ;;  %v1259_v24 = vld [vmem:[%s4259_s1 + $0x90] sm:$0xff] }
 0x453   :  { %v1104_v57 = vmul.f32 %v2983_v20, %v1098_v26  ;;  %v1258_v26 = vld [vmem:[%s4259_s1 + $0x88] sm:$0xff] }
 0x454   :  { %v1088_v29 = vpop.permute.xlu0 %1087 }
 0x455   :  { %v1097_v31 = vsel %vm652_vm4, %v1095_v28, %v1088_v29  ;;  %v3656_v32 = vadd.f32 %v2984_v23, %v1104_v57  ;;  %v1206_v28 = vld [vmem:[%s4258_s28] sm:$0xff] }
 0x456   :  { %v1103_v34 = vmul.f32 %v2983_v20, %v1097_v31  ;;  %v1261_v20 = vld [vmem:[%s4259_s1 + $0xa0] sm:$0xff]  ;;  %v1340_v31 = vld [vmem:[%s4261_s7 + $0xb8] sm:$0xff] }
 0x457   :  { %v1112_v35 = vmax.f32 %v3656_v32, 0.0  ;;  %1305 = vmatpush.msra.mxu3 %v1261_v20  ;;  %v1257_v57 = vld [vmem:[%s4259_s1 + $0x80] sm:$0xff]  ;;  %v1324_v20 = vld [vmem:[%s4261_s7 + $0x38] sm:$0xff] }
 0x458   :  { %v3659_v36 = vadd.f32 %v2984_v23, %v1103_v34  ;;  %v1208_v23 = vld [vmem:[%s4258_s28 + $0x10] sm:$0xff]  ;;  %v1338_v34 = vld [vmem:[%s4261_s7 + $0xa8] sm:$0xff]  ;;  %v1329_v32 = vld [vmem:[%s4261_s7 + $0x60] sm:$0xff] }
 0x459   :  { %v1115_v40 = vsel %vm1114_vm11, %v1112_v35, 0.0  ;;  %1306 = vmatpush.msra.mxu3 %v1260_v22  ;;  %1231 = vmatpush.msra.mxu1 %v1208_v23  ;;  %v1323_v22 = vld [vmem:[%s4261_s7 + $0x30] sm:$0xff]  ;;  %v1245_v23 = vld [vmem:[%s4259_s1 + $0x20] sm:$0xff] }
 0x45a   :  { %v1111_v39 = vmax.f32 %v3659_v36, 0.0  ;;  %v1253_v36 = vld [vmem:[%s4259_s1 + $0x60] sm:$0xff] }
 0x45b   :  { %1307 = vmatpush.msra.mxu3 %v1259_v24  ;;  %1232 = vmatpush.msra.mxu1 %v1207_v25  ;;  %v1322_v24 = vld [vmem:[%s4261_s7 + $0x28] sm:$0xff]  ;;  %v1244_v25 = vld [vmem:[%s4259_s1 + $0x18] sm:$0xff] }
 0x45c   :  { %v1113_v27 = vsel %vm524_vm5, %v1111_v39, 0.0 }
 0x45d   :  { %v1116_v42 = vadd.f32 %v1115_v40, %v1113_v27  ;;  %1308 = vmatpush.msra.mxu3 %v1258_v26  ;;  %1233 = vmatpush.msra.mxu1 %v1206_v28  ;;  %v1321_v28 = vld [vmem:[%s4261_s7 + $0x20] sm:$0xff] }
 0x45f   :  { %v1117_v43 = vrot.slane %v1116_v42, 4  ;;  %1309 = vmatpush.msra.mxu3 %v1257_v57  ;;  %v1243_v57 = vld [vmem:[%s4259_s1 + $0x10] sm:$0xff] }
 0x461   :  { %v1118_v33 = vadd.f32 %v1117_v43, %v1116_v42  ;;  %1378 = vmatpush.msrb.mxu3 %v1340_v31  ;;  %v1335_v42 = vld [vmem:[%s4261_s7 + $0x90] sm:$0xff] }
 0x462   :  { %v1319_v31 = vld [vmem:[%s4261_s7 + $0x10] sm:$0xff] }
 0x463   :  { %v1119_v44 = vrot.slane %v1118_v33, 2  ;;  %1379 = vmatpush.msrb.mxu3 %v1339_v46  ;;  %v1318_v46 = vld [vmem:[%s4261_s7 + $0x8] sm:$0xff] }
 0x465   :  { %v1120_v49 = vadd.f32 %v1119_v44, %v1118_v33  ;;  %1380 = vmatpush.msrb.mxu3 %v1338_v34 }
 0x467   :  { %v1121_v48 = vrot.slane %v1120_v49, 1  ;;  %1381 = vmatpush.msrb.mxu3 %v1337_v38  ;;  %v1241_v38 = vld [vmem:[%s4259_s1] sm:$0xff] }
 0x469   :  { %v1122_v51 = vadd.f32 %v1121_v48, %v1120_v49  ;;  %1382 = vmatpush.msrb.mxu3 %v1336_v41  ;;  %v1333_v49 = vld [vmem:[%s4261_s7 + $0x80] sm:$0xff]  ;;  %v1399_v41 = vld [vmem:[%s4262_s10 + $0x30] sm:$0xff] }
 0x46b   :  { %v1130_v53 = vmul.f32 %v3668_v50, %v1122_v51  ;;  %1383 = vmatpush.msrb.mxu3 %v1335_v42  ;;  %v1398_v42 = vld [vmem:[%s4262_s10 + $0x28] sm:$0xff] }
 0x46d   :  { %v1132_v37 = vmul.f32 %v1131_v52, %v1130_v53  ;;  %1384 = vmatpush.msrb.mxu3 %v1334_v45  ;;  %v1396_v45 = vld [vmem:[%s4262_s10 + $0x18] sm:$0xff] }
 0x46f   :  { %v1134_v54 = vsel %vm1133_vm13, %v1132_v37, 0.0  ;;  %1385 = vmatpush.msrb.mxu3 %v1333_v49 }
 0x470   :  { %1135 = vadd.xlane.f32.xlu2 %v1134_v54 }
 0x4e3   :  { %v1136_v58 = vpop.xlane.xlu2 %1135 }
 0x4e4   :  { %v1138_v19 = vadd.f32 %v1137_v55, %v1136_v58  ;;  %v1256_v55 = vld [vmem:[%s4259_s1 + $0x78] sm:$0xff] }
 0x4e5   :  { %v1332_v58 = vld [vmem:[%s4261_s7 + $0x78] sm:$0xff]  ;;  %1271 = vmatpush.msra.mxu2 %v1256_v55 }
 0x4e6   :  { %v1139_v59 = vmax.f32 %v1138_v19, 0.0  ;;  %v1255_v19 = vld [vmem:[%s4259_s1 + $0x70] sm:$0xff]  ;;  %1347 = vmatpush.msrb.mxu1 %v1332_v58 }
 0x4e7   :  { %1272 = vmatpush.msra.mxu2 %v1255_v19 }
 0x4e8   :  { %1143 = vperm.xlu0 %2908, %v1139_v59   ;;  %v1331_v59 = vld [vmem:[%s4261_s7 + $0x70] sm:$0xff] }
 0x4e9   :  { %1348 = vmatpush.msrb.mxu1 %v1331_v59 }
 0x55a   :  { %v1144_v62 = vpop.permute.xlu0 %1143 }
 0x55b   :  { %v1146_v63 = vmul.f32 %v1144_v62, %v1140_v61  ;;  %v1254_v61 = vld [vmem:[%s4259_s1 + $0x68] sm:$0xff] }
 0x55c   :  { %v1330_v62 = vld [vmem:[%s4261_s7 + $0x68] sm:$0xff]  ;;  %1273 = vmatpush.msra.mxu2 %v1254_v61 }
 0x55d   :  { %v1147_v0 = vsel %vm1133_vm13, %v1146_v63, 0.0  ;;  %1349 = vmatpush.msrb.mxu1 %v1330_v62 }
 0x55e   :  { %v1148_v1 = vrot.slane %v1147_v0, 4  ;;  %1274 = vmatpush.msra.mxu2 %v1253_v36 }
 0x55f   :  { %1350 = vmatpush.msrb.mxu1 %v1329_v32 }
 0x560   :  { %v1149_v2 = vadd.f32 %v1148_v1, %v1147_v0 }
 0x562   :  { %v1150_v3 = vrot.slane %v1149_v2, 2 }
 0x564   :  { %v1151_v60 = vadd.f32 %v1150_v3, %v1149_v2  ;;  %v1251_v3 = vld [vmem:[%s4259_s1 + $0x50] sm:$0xff] }
 0x566   :  { %v1152_v5 = vrot.slane %v1151_v60, 1 }
 0x568   :  { %v1153_v4 = vadd.f32 %v1152_v5, %v1151_v60  ;;  %v1327_v60 = vld [vmem:[%s4261_s7 + $0x50] sm:$0xff] }
 0x56a   :  { %v1155_v14 = vadd.f32 %v1154_v10, %v1153_v4  ;;  %v1326_v10 = vld [vmem:[%s4261_s7 + $0x48] sm:$0xff]  ;;  %v1249_v4 = vld [vmem:[%s4259_s1 + $0x40] sm:$0xff] }
 0x56c   :  { %v2772_v16 = vmul.f32 -1.442695, %v1155_v14 }
 0x56e   :  { %2994 = vpow2.f32 %v2772_v16 }
 0x574   :  { %v2995_v29 = vpop.eup %2994 }
 0x575   :  { %v1159_v30 = vadd.f32 1.0, %v2995_v29  ;;  %v1320_v29 = vld [vmem:[%s4261_s7 + $0x18] sm:$0xff] }
 0x577   :  { %2996 = vrcp.f32 %v1159_v30  ;;  %v1171_v33 = vand.u32 2147483648, %v1159_v30  ;;  %v1169_v47 = vand.u32 2147483647, %v1159_v30  ;;  %vm1165_vm0 = vweird.f32 %v1159_v30 }
 0x579   :  { %v1172_v51 = vor.u32 1.1754944e-38, %v1171_v33  ;;  %vm1170_vm9 = vcmp.eq.f32.partialorder %v1169_v47, 8.507059e+37  ;;  %v1395_v33 = vld [vmem:[%s4262_s10 + $0x10] sm:$0xff]  ;;  %v1393_v47 = vld [vmem:[%s4262_s10] sm:$0xff] }
 0x57d   :  { %v2997_v40 = vpop.eup %2996 }
 0x57e   :  { %v1161_v27 = vmul.f32 %v2997_v40, %v1159_v30  ;;  %vm1166_vm15 = vweird.f32 %v2997_v40  ;;  %v1242_v30 = vld [vmem:[%s4259_s1 + $0x8] sm:$0xff] }
 0x57f   :  { %vm1167_vm1 = vmor %vm1165_vm0, %vm1166_vm15 }
 0x580   :  { %v1162_v43 = vsub.f32 1.0, %v1161_v27  ;;  %v1400_v27 = vld [vmem:[%s4262_s10 + $0x38] sm:$0xff] }
 0x582   :  { %v1163_v44 = vmul.f32 %v2997_v40, %v1162_v43  ;;  %v1397_v43 = vld [vmem:[%s4262_s10 + $0x20] sm:$0xff] }
 0x584   :  { %v1164_v48 = vadd.f32 %v2997_v40, %v1163_v44  ;;  %v1394_v44 = vld [vmem:[%s4262_s10 + $0x8] sm:$0xff] }
 0x586   :  { %v1168_v52 = vsel %vm1167_vm1, %v2997_v40, %v1164_v48  ;;  %v1317_v40 = vld [vmem:[%s4261_s7] sm:$0xff] }
 0x587   :  { %v1173_v53 = vsel %vm1170_vm9, %v1172_v51, %v1168_v52 }
 0x588   :  { %v1175_v37 = vperm.slane %v1173_v53, 0 }
 0x58a   :  { %v1176_v54 = vmul.f32 %v1175_v37, %v1111_v39  ;;  %v1177_v18 = vmul.f32 %v1175_v37, %v1112_v35  ;;  %v1252_v35 = vld [vmem:[%s4259_s1 + $0x58] sm:$0xff] }
 0x58b   :  { %v1328_v39 = vld [vmem:[%s4261_s7 + $0x58] sm:$0xff]  ;;  %1275 = vmatpush.msra.mxu2 %v1252_v35 }
 0x58c   :  { %1179 = vst.msk [vmem:[#allocation5 + $0xa] sm:$0x1f] %vm1114_vm11, %v1177_v18  ;;  %1351 = vmatpush.msrb.mxu1 %v1328_v39 }
 0x58d   :  { %1178 = vst.msk [vmem:[#allocation5 + $0x2] sm:$0xff] %vm524_vm5, %v1176_v54  ;;  %1276 = vmatpush.msra.mxu2 %v1251_v3 }
 0x58e   :  { %1352 = vmatpush.msrb.mxu1 %v1327_v60 }
 0x58f   :  { %1277 = vmatpush.msra.mxu2 %v1250_v7  ;;  %v1655_v7 = vld [vmem:[#allocation3 + $0x51] sm:$0xff] }
 0x590   :  { %1353 = vmatpush.msrb.mxu1 %v1326_v10 }
 0x591   :  { %1278 = vmatpush.msra.mxu2 %v1249_v4  ;;  %v1659_v4 = vld [vmem:[#allocation3 + $0x71] sm:$0xff] }
 0x592   :  { %1354 = vmatpush.msrb.mxu1 %v1325_v56 }
 0x593   :  { %v1181_v6 = vld [vmem:[#allocation5 + $0xa] sm:$0x1f]  ;;  %1279 = vmatpush.msra.mxu2 %v1248_v15  ;;  %v3018_v15 = vld [vmem:[#allocation3 + $0x49] sm:$0x1f] }
 0x594   :  { %v1184_v63 = vld [vmem:[#allocation5 + $0x3] sm:$0xff]  ;;  %v1185_v14 = vld [vmem:[#allocation5 + $0xb] sm:$0x1f]  ;;  %1355 = vmatpush.msrb.mxu1 %v1324_v20 }
 0x595   :  { %v1180_v0 = vld [vmem:[#allocation5 + $0x2] sm:$0xff]  ;;  %2775 = vmatmul.msk.f32.vlgmr.msra.gmra.mxu3 %vm524_vm5, %v1184_v63  ;;  %1280 = vmatpush.msra.mxu2 %v1247_v17  ;;  %v1189_v34 = vld [vmem:[#allocation5 + $0xc] sm:$0x1f] }
 0x596   :  { %v3719_v1 = vld [vmem:[#allocation5 + $0x1] sm:$0xff]  ;;  %1192 = vrot.lane.b32.xlu1 %v1180_v0, %s3080_s13  ;;  %2773 = vmatmul.msk.f32.vlgmr.msra.gmra.mxu1 %vm524_vm5, %v1180_v0  ;;  %v3732_v12 = vld [vmem:[#allocation5 + $0x9] sm:$0x1f] }
 0x597   :  { %v1202_v2 = vmax.f32 %v3719_v1, %v1180_v0  ;;  %v1203_v13 = vmax.f32 %v3732_v12, %v1181_v6  ;;  %1281 = vmatpush.msra.mxu2 %v1246_v21  ;;  %1356 = vmatpush.msrb.mxu1 %v1323_v22  ;;  %v1188_v26 = vld [vmem:[#allocation5 + $0x4] sm:$0xff] }
 0x598   :  { %v1186_v49 = vld [vmem:[#allocation5] sm:$0xff]  ;;  %v1187_v37 = vld [vmem:[#allocation5 + $0x8] sm:$0x1f] }
 0x599   :  { %v3727_v5 = vmax.f32 %v1202_v2, %v1184_v63  ;;  %v3737_v16 = vmax.f32 %v1203_v13, %v1185_v14  ;;  %1282 = vmatpush.msra.mxu2 %v1245_v23  ;;  %1357 = vmatpush.msrb.mxu1 %v1322_v24  ;;  %v1656_v17 = vld [vmem:[#allocation3 + $0x59] sm:$0x1f] }
 0x59a   :  { %v1825_v21 = vld [vmem:[#allocation3 + $0x72] sm:$0xff] }
 0x59b   :  { %1283 = vmatpush.msra.mxu2 %v1244_v25  ;;  %1358 = vmatpush.msrb.mxu1 %v1321_v28 }
 0x59d   :  { %2776 = vmatmul.msk.f32.gmra.mxu3 %vm524_vm5, %v1185_v14  ;;  %1284 = vmatpush.msra.mxu2 %v1243_v57  ;;  %v3787_v14 = vld [vmem:[#allocation3 + $0x68] sm:$0x1f] }
 0x59e   :  { %1194 = vrot.lane.b32.xlu1 %v1181_v6, %s3080_s13  ;;  %2774 = vmatmul.msk.f32.gmra.mxu1 %vm524_vm5, %v1181_v6  ;;  %v1651_v6 = vld [vmem:[#allocation3 + $0x70] sm:$0xff]  ;;  %v2949_v56 = vpack.i.bf16 %v3018_v15, %v3787_v14 }
 0x59f   :  { %1359 = vmatpush.msrb.mxu1 %v1320_v29  ;;  %1285 = vmatpush.msra.mxu2 %v1242_v30  ;;  %v2919_v10 = vpack.i.bf16 %v1655_v7, %v1651_v6  ;;  %v2985_v29 = vld [vmem:[%s4263_s11] ss:$0 sm:$0xff] }
 0x5a1   :  { %1360 = vmatpush.msrb.mxu1 %v1319_v31  ;;  %1286 = vmatpush.msra.mxu2 %v1241_v38 }
 0x5a3   :  { %1361 = vmatpush.msrb.mxu1 %v1318_v46  ;;  %1415 = vmatpush.msrb.mxu2 %v1400_v27  ;;  %v2986_v46 = vld [vmem:[%s4264_s15] ss:$0 sm:$0xff] }
 0x5a5   :  { %2777 = vmatmul.msk.f32.vlgmr.msrb.gmra.mxu3 %vm524_vm5, %v1188_v26  ;;  %1362 = vmatpush.msrb.mxu1 %v1317_v40 }
 0x5a6   :  { %1416 = vmatpush.msrb.mxu2 %v1399_v41 }
 0x5a8   :  { %1417 = vmatpush.msrb.mxu2 %v1398_v42 }
 0x5aa   :  { %1418 = vmatpush.msrb.mxu2 %v1397_v43 }
 0x5ac   :  { %1419 = vmatpush.msrb.mxu2 %v1396_v45 }
 0x5ad   :  { %2778 = vmatmul.msk.f32.gmra.mxu3 %vm524_vm5, %v1189_v34 }
 0x5ae   :  { %1420 = vmatpush.msrb.mxu2 %v1395_v33 }
 0x5b0   :  { %1421 = vmatpush.msrb.mxu2 %v1394_v44 }
 0x5b2   :  { %1422 = vmatpush.msrb.mxu2 %v1393_v47 }
 0x608   :  { %v1193_v48 = vpop.permute.xlu1 %1192 }
 0x609   :  { %v1198_v51 = vsel %vm524_vm5, %v3719_v1, %v1193_v48  ;;  %v1200_v52 = vsel %vm524_vm5, %v1186_v49, %v1193_v48 }
 0x60a   :  { %1287 = vmatmul.f32.vlgmr.msra.gmra.mxu2 %v1198_v51  ;;  %1363 = vmatmul.f32.vlgmr.msrb.gmra.mxu1 %v1200_v52 }
 0x610   :  { %v1195_v53 = vpop.permute.xlu1 %1194 }
 0x611   :  { %v1199_v54 = vsel %vm524_vm5, %v3732_v12, %v1195_v53  ;;  %v1201_v18 = vsel %vm524_vm5, %v1187_v37, %v1195_v53  ;;  %v2929_v12 = vpack.i.bf16 %v1659_v4, %v1655_v7 }
 0x612   :  { %1290 = vmatmul.f32.gmra.mxu2 %v1199_v54  ;;  %1366 = vmatmul.f32.gmra.mxu1 %v1201_v18  ;;  %v1484_v54 = vld [vmem:[%s4265_s16] sm:$0xff] }
 0x613   :  { %v1235_v58 = vpop.f32.mrf.mxu1 }
 0x618   :  { %v1311_v55 = vpop.f32.mrf.mxu3 }
 0x61a   :  { %2779 = vmatmul.msk.f32.vlgmr.msrb.gmra.mxu2 %vm524_vm5, %v3727_v5  ;;  %v1663_v5 = vld [vmem:[#allocation3 + $0x52] sm:$0xff] }
 0x61b   :  { %v1238_v59 = vpop.f32.mrf.mxu1  ;;  %v2939_v13 = vpack.i.bf16 %v1663_v5, %v1659_v4 }
 0x620   :  { %v1314_v19 = vpop.f32.mrf.mxu3 }
 0x622   :  { %2780 = vmatmul.msk.f32.gmra.mxu2 %vm524_vm5, %v3737_v16  ;;  %v3791_v16 = vld [vmem:[#allocation3 + $0x79] sm:$0x1f] }
 0x623   :  { %v2964_v20 = vpack.i.bf16 %v3791_v16, %v1656_v17 }
 0x628   :  { %v1387_v61 = vpop.f32.mrf.mxu3 }
 0x630   :  { %v1390_v35 = vpop.f32.mrf.mxu3 }
 0x687   :  { %v1364_v62 = vpop.f32.mrf.mxu1 }
 0x688   :  { %v1388_v36 = vadd.f32 %v1387_v61, %v1364_v62  ;;  %v1652_v61 = vld [vmem:[#allocation3 + $0x78] sm:$0x1f] }
 0x689   :  { %v2954_v62 = vpack.i.bf16 %v1656_v17, %v1652_v61  ;;  %v3836_v17 = vld [vmem:[#allocation3 + $0x42] sm:$0xff] }
 0x68a   :  { %1440 = vrot.lane.b32.xlu1 %v1388_v36, %s3080_s13  ;;  %v3813_v36 = vld [vmem:[#allocation3 + $0x4a] sm:$0x1f] }
 0x68d   :  { %v1288_v32 = vpop.f32.mrf.mxu2 }
 0x68e   :  { %v1312_v63 = vadd.f32 %v1311_v55, %v1288_v32  ;;  %v3019_v32 = vld [vmem:[#allocation3 + $0x69] sm:$0x1f] }
 0x68f   :  { %v1367_v39 = vpop.f32.mrf.mxu1 }
 0x690   :  { %v1391_v0 = vadd.f32 %v1390_v35, %v1367_v39  ;;  %v2969_v35 = vpack.i.bf16 %v3813_v36, %v3019_v32  ;;  %v1826_v39 = vld [vmem:[#allocation3 + $0x7a] sm:$0x1f] }
 0x692   :  { %1432 = vrot.lane.b32.xlu1 %v1312_v63, %s3078_s5  ;;  %1442 = vrot.lane.b32.xlu0 %v1391_v0, %s3080_s13  ;;  %v1488_v63 = vld [vmem:[%s4266_s18] sm:$0xff] }
 0x695   :  { %v1291_v1 = vpop.f32.mrf.mxu2 }
 0x696   :  { %v1315_v2 = vadd.f32 %v1314_v19, %v1291_v1 }
 0x69a   :  { %1434 = vrot.lane.b32.xlu0 %v1315_v2, %s3078_s5 }
 0x69d   :  { %v1424_v3 = vpop.f32.mrf.mxu2 }
 0x69e   :  { %1448 = vrot.lane.b32.xlu1 %v1424_v3, %s4239_s9  ;;  %v3819_v3 = vld [vmem:[#allocation3 + $0x60] sm:$0xff] }
 0x6a5   :  { %v1427_v60 = vpop.f32.mrf.mxu2 }
 0x6a6   :  { %1723 = vrot.lane.b32.xlu1 %v1663_v5, %s3077_s0  ;;  %1450 = vrot.lane.b32.xlu0 %v1427_v60, %s4239_s9  ;;  %v1653_v60 = vld [vmem:[#allocation3 + $0x41] sm:$0xff] }
 0x6a7   :  { %v2914_v5 = vpack.i.bf16 %v1653_v60, %v3819_v3 }
 0x6ae   :  { %2920 = vrot.lane.b32.xlu1 %v2919_v10, %s4241_s17 }
 0x6b6   :  { %2930 = vrot.lane.b32.xlu1 %v2929_v12, %s3083_s23  ;;  %v3827_v12 = vld [vmem:[%s3116_s21 + $0x78] sm:$0xff] }
 0x6b7   :  { %1775 = vmatpush.msra.mxu2 %v3827_v12 }
 0x6be   :  { %2940 = vrot.lane.b32.xlu1 %v2939_v13, %s3082_s22  ;;  %v3830_v13 = vld [vmem:[%s3116_s21 + $0x70] sm:$0xff] }
 0x6bf   :  { %1776 = vmatpush.msra.mxu2 %v3830_v13 }
 0x6c6   :  { %2950 = vrot.lane.b32.xlu1 %v2949_v56, %s3078_s5 }
 0x6ce   :  { %2965 = vrot.lane.b32.xlu1 %v2964_v20, %s3083_s23  ;;  %s4267_s23 = sld [smem:[#allocation21_spill]] }
 0x6d4   :  { %v1541_v10 = vld [vmem:[%s4267_s23 + $0x78] sm:$0xff]  ;;  %v1540_v4 = vld [vmem:[%s4267_s23 + $0x70] sm:$0xff]  ;;  %v1539_v15 = vld [vmem:[%s4267_s23 + $0x68] sm:$0xff] }
 0x6d5   :  { %1542 = vmatpush.msra.mxu3 %v1541_v10  ;;  %v1538_v56 = vld [vmem:[%s4267_s23 + $0x60] sm:$0xff]  ;;  %v1535_v8 = vld [vmem:[%s4267_s23 + $0x48] sm:$0xff] }
 0x6d6   :  { %1873 = vrot.lane.b32.xlu1 %v1825_v21, %s3077_s0  ;;  %v1648_v21 = vld [vmem:[#allocation3 + $0x58] sm:$0x1f] }
 0x6d7   :  { %1543 = vmatpush.msra.mxu3 %v1540_v4 }
 0x6d9   :  { %1544 = vmatpush.msra.mxu3 %v1539_v15 }
 0x6db   :  { %1545 = vmatpush.msra.mxu3 %v1538_v56 }
 0x6fc   :  { %v1441_v22 = vpop.permute.xlu1 %1440 }
 0x704   :  { %v1443_v23 = vpop.permute.xlu0 %1442  ;;  %v1433_v24 = vpop.permute.xlu1 %1432 }
 0x705   :  { %v1454_v25 = vsel %vm516_vm3, %v1235_v58, %v1433_v24  ;;  %v1647_v58 = vld [vmem:[#allocation3 + $0x50] sm:$0xff]  ;;  %v1537_v24 = vld [vmem:[%s4267_s23 + $0x58] sm:$0xff] }
 0x706   :  { %v1456_v57 = vsel %vm524_vm5, %v1454_v25, %v1441_v22  ;;  %v2909_v19 = vpack.i.bf16 %v1651_v6, %v1647_v58  ;;  %v1657_v6 = vld [vmem:[#allocation3 + $0x61] sm:$0xff]  ;;  %v2944_v22 = vpack.i.bf16 %v1652_v61, %v1648_v21  ;;  %1546 = vmatpush.msra.mxu3 %v1537_v24 }
 0x707   :  { %v2924_v7 = vpack.i.bf16 %v1657_v6, %v1653_v60  ;;  %v2934_v20 = vpack.i.bf16 %v3836_v17, %v1657_v6  ;;  %v1758_v25 = vld [vmem:[%s3116_s21 + $0x68] sm:$0xff] }
 0x708   :  { %1777 = vmatpush.msra.mxu2 %v1758_v25 }
 0x70c   :  { %v1435_v26 = vpop.permute.xlu0 %1434 }
 0x70d   :  { %v1455_v31 = vsel %vm516_vm3, %v1238_v59, %v1435_v26  ;;  %v1664_v59 = vld [vmem:[#allocation3 + $0x5a] sm:$0x1f]  ;;  %v1536_v26 = vld [vmem:[%s4267_s23 + $0x50] sm:$0xff] }
 0x70e   :  { %v1457_v38 = vsel %vm524_vm5, %v1455_v31, %v1443_v23  ;;  %v2974_v23 = vpack.i.bf16 %v1664_v59, %v3791_v16  ;;  %1547 = vmatpush.msra.mxu3 %v1536_v26  ;;  %v1755_v16 = vld [vmem:[%s3116_s21 + $0x50] sm:$0xff]  ;;  %v1753_v31 = vld [vmem:[%s3116_s21 + $0x40] sm:$0xff] }
 0x710   :  { %v1449_v28 = vpop.permute.xlu1 %1448  ;;  %1548 = vmatpush.msra.mxu3 %v1535_v8 }
 0x711   :  { %v1458_v30 = vsel %vm660_vm7, %v1456_v57, %v1449_v28  ;;  %v1757_v28 = vld [vmem:[%s3116_s21 + $0x60] sm:$0xff]  ;;  %v1533_v57 = vld [vmem:[%s4267_s23 + $0x38] sm:$0xff] }
 0x712   :  { %v1464_v34 = vmul.f32 %v2985_v29, %v1458_v30  ;;  %1778 = vmatpush.msra.mxu2 %v1757_v28  ;;  %v1532_v30 = vld [vmem:[%s4267_s23 + $0x30] sm:$0xff] }
 0x714   :  { %v1470_v42 = vadd.f32 %v2986_v46, %v1464_v34  ;;  %1779 = vmatpush.msra.mxu2 %v1756_v9  ;;  %v1752_v34 = vld [vmem:[%s3116_s21 + $0x38] sm:$0xff] }
 0x716   :  { %v1472_v33 = vmax.f32 %v1470_v42, 0.0  ;;  %1780 = vmatpush.msra.mxu2 %v1755_v16 }
 0x718   :  { %v1451_v40 = vpop.permute.xlu0 %1450  ;;  %v3865_v42 = vpop.permute.xlu1 %1723 }
 0x719   :  { %v1459_v27 = vsel %vm660_vm7, %v1457_v38, %v1451_v40  ;;  %v1530_v38 = vld [vmem:[%s4267_s23 + $0x20] sm:$0xff]  ;;  %v1751_v40 = vld [vmem:[%s3116_s21 + $0x30] sm:$0xff] }
 0x71a   :  { %v1465_v41 = vmul.f32 %v2985_v29, %v1459_v27  ;;  %v1754_v29 = vld [vmem:[%s3116_s21 + $0x48] sm:$0xff]  ;;  %v1529_v27 = vld [vmem:[%s4267_s23 + $0x18] sm:$0xff] }
 0x71b   :  { %1781 = vmatpush.msra.mxu2 %v1754_v29 }
 0x71c   :  { %v1471_v43 = vadd.f32 %v2986_v46, %v1465_v41  ;;  %v1531_v46 = vld [vmem:[%s4267_s23 + $0x28] sm:$0xff] }
 0x71d   :  { %1782 = vmatpush.msra.mxu2 %v1753_v31  ;;  %v1750_v41 = vld [vmem:[%s3116_s21 + $0x28] sm:$0xff] }
 0x71e   :  { %v1473_v45 = vmax.f32 %v1471_v43, 0.0  ;;  %v1528_v43 = vld [vmem:[%s4267_s23 + $0x10] sm:$0xff] }
 0x71f   :  { %1783 = vmatpush.msra.mxu2 %v1752_v34 }
 0x720   :  { %v1475_v44 = vsel %vm1474_vm12, %v1473_v45, 0.0  ;;  %v1749_v45 = vld [vmem:[%s3116_s21 + $0x20] sm:$0xff] }
 0x721   :  { %v1476_v47 = vadd.f32 %v1475_v44, %v1472_v33  ;;  %1784 = vmatpush.msra.mxu2 %v1751_v40  ;;  %v1527_v33 = vld [vmem:[%s4267_s23 + $0x8] sm:$0xff]  ;;  %v1748_v44 = vld [vmem:[%s3116_s21 + $0x18] sm:$0xff] }
 0x723   :  { %v1477_v49 = vrot.slane %v1476_v47, 4  ;;  %1785 = vmatpush.msra.mxu2 %v1750_v41 }
 0x725   :  { %v1478_v48 = vadd.f32 %v1477_v49, %v1476_v47  ;;  %1786 = vmatpush.msra.mxu2 %v1749_v45  ;;  %v1526_v47 = vld [vmem:[%s4267_s23] sm:$0xff]  ;;  %v1747_v49 = vld [vmem:[%s3116_s21 + $0x10] sm:$0xff] }
 0x727   :  { %v1479_v51 = vrot.slane %v1478_v48, 2  ;;  %1787 = vmatpush.msra.mxu2 %v1748_v44 }
 0x729   :  { %v1480_v52 = vadd.f32 %v1479_v51, %v1478_v48  ;;  %v1746_v48 = vld [vmem:[%s3116_s21 + $0x8] sm:$0xff]  ;;  %1788 = vmatpush.msra.mxu2 %v1747_v49 }
 0x72b   :  { %v1481_v53 = vrot.slane %v1480_v52, 1  ;;  %1789 = vmatpush.msra.mxu2 %v1746_v48 }
 0x72d   :  { %v1482_v37 = vadd.f32 %v1481_v53, %v1480_v52  ;;  %v1745_v52 = vld [vmem:[%s3116_s21] sm:$0xff] }
 0x72e   :  { %1790 = vmatpush.msra.mxu2 %v1745_v52 }
 0x72f   :  { %v3807_v18 = vmul.f32 %v1482_v37, %v3668_v50 }
 0x731   :  { %v1485_v55 = vmul.f32 %v1484_v54, %v3807_v18  ;;  %v3878_v54 = vpop.permute.xlu1 %2920 }
 0x733   :  { %1486 = vadd.xlane.f32.xlu2 %v1485_v55 }
 0x74b   :  { %2910 = vrot.lane.b32.xlu2 %v2909_v19, %s3077_s0 }
 0x753   :  { %1725 = vrot.lane.b32.xlu2 %v1664_v59, %s3077_s0 }
 0x75b   :  { %2955 = vrot.lane.b32.xlu2 %v2954_v62, %s4241_s17  ;;  %s4270_s17 = sld [smem:[#allocation22_spill]] }
 0x763   :  { %2970 = vrot.lane.b32.xlu2 %v2969_v35, %s4239_s9  ;;  %v3882_v35 = vpop.permute.xlu1 %2930 }
 0x76b   :  { %1875 = vrot.lane.b32.xlu2 %v1826_v39, %s3077_s0 }
 0x7a6   :  { %v1487_v0 = vpop.xlane.xlu2 %1486 }
 0x7a7   :  { %v1489_v1 = vadd.f32 %v1488_v63, %v1487_v0 }
 0x7a9   :  { %v1490_v2 = vmax.f32 %v1489_v1, 0.0 }
 0x7ab   :  { %1494 = vperm.xlu0 %2908, %v1490_v2  }
 0x7ae   :  { %v2911_v62 = vpop.permute.xlu2 %2910 }
 0x7af   :  { %v2912_v0 = vunpack.i.l.bf16 %v2911_v62 }
 0x7b3   :  { %2915 = vrot.lane.b32.xlu0 %v2914_v5, %s3078_s5  ;;  %v1645_v5 = vld [vmem:[#allocation3 + $0x40] sm:$0xff] }
 0x7bb   :  { %2925 = vrot.lane.b32.xlu0 %v2924_v7, %s3080_s13  ;;  %v1729_v7 = vsel %vm483_vm2, %v1645_v5, %v2912_v0 }
 0x7c3   :  { %2935 = vrot.lane.b32.xlu0 %v2934_v20, %s4239_s9  ;;  %s4269_s9 = sld [smem:[#allocation20_spill]]  ;;  %v2932_v20 = vunpack.i.l.bf16 %v3882_v35 }
 0x7c9   :  { %v1504_v39 = vld [vmem:[%s4269_s9] sm:$0x1] }
 0x7cb   :  { %2945 = vrot.lane.b32.xlu0 %v2944_v22, %s3077_s0 }
 0x7d3   :  { %2960 = vrot.lane.b32.xlu0 %v2959_v11, %s3080_s13  ;;  %v1534_v11 = vld [vmem:[%s4267_s23 + $0x40] sm:$0xff] }
 0x7d4   :  { %1549 = vmatpush.msra.mxu3 %v1534_v11 }
 0x7d6   :  { %1550 = vmatpush.msra.mxu3 %v1533_v57 }
 0x7d8   :  { %1551 = vmatpush.msra.mxu3 %v1532_v30 }
 0x7da   :  { %1552 = vmatpush.msra.mxu3 %v1531_v46  ;;  %v2913_v46 = vunpack.i.h.bf16 %v2911_v62 }
 0x7db   :  { %2975 = vrot.lane.b32.xlu0 %v2974_v23, %s3082_s22  ;;  %s4268_s22 = sld [smem:[#allocation19_spill]]  ;;  %v3899_v23 = vpop.permute.xlu2 %1725 }
 0x7dc   :  { %1553 = vmatpush.msra.mxu3 %v1530_v38 }
 0x7de   :  { %1554 = vmatpush.msra.mxu3 %v1529_v27 }
 0x7e0   :  { %1555 = vmatpush.msra.mxu3 %v1528_v43 }
 0x7e1   :  { %v1491_v51 = vld [vmem:[%s4268_s22] sm:$0xff] }
 0x7e2   :  { %1556 = vmatpush.msra.mxu3 %v1527_v33 }
 0x7e3   :  { %v2956_v30 = vpop.permute.xlu2 %2955 }
 0x7e4   :  { %1557 = vmatpush.msra.mxu3 %v1526_v47 }
 0x7e6   :  { %1901 = vmatpush.msrb.mxu3 %v3827_v12  ;;  %v2922_v12 = vunpack.i.l.bf16 %v3878_v54 }
 0x7e8   :  { %1902 = vmatpush.msrb.mxu3 %v3830_v13  ;;  %v3892_v13 = vpop.permute.xlu1 %2940 }
 0x7ea   :  { %1903 = vmatpush.msrb.mxu3 %v1758_v25  ;;  %v2942_v25 = vunpack.i.l.bf16 %v3892_v13 }
 0x7ec   :  { %1904 = vmatpush.msrb.mxu3 %v1757_v28 }
 0x7ee   :  { %1905 = vmatpush.msrb.mxu3 %v1756_v9 }
 0x7f0   :  { %1906 = vmatpush.msrb.mxu3 %v1755_v16  ;;  %v2951_v11 = vpop.permute.xlu1 %2950 }
 0x7f1   :  { %v2952_v27 = vunpack.i.l.bf16 %v2951_v11 }
 0x7f2   :  { %1907 = vmatpush.msrb.mxu3 %v1754_v29 }
 0x7f4   :  { %1908 = vmatpush.msrb.mxu3 %v1753_v31 }
 0x7f6   :  { %1909 = vmatpush.msrb.mxu3 %v1752_v34  ;;  %v1646_v34 = vld [vmem:[#allocation3 + $0x48] sm:$0x1f] }
 0x7f8   :  { %1910 = vmatpush.msrb.mxu3 %v1751_v40 }
 0x7fa   :  { %1911 = vmatpush.msrb.mxu3 %v1750_v41 }
 0x7fc   :  { %1912 = vmatpush.msrb.mxu3 %v1749_v45 }
 0x7fe   :  { %1913 = vmatpush.msrb.mxu3 %v1748_v44  ;;  %v1879_v44 = vsel %vm483_vm2, %v3819_v3, %v2913_v46  ;;  %v2923_v3 = vunpack.i.h.bf16 %v3878_v54  ;;  %v1570_v46 = vld [vmem:[%s3241_s4 + $0x18] sm:$0xff] }
 0x800   :  { %1914 = vmatpush.msrb.mxu3 %v1747_v49 }
 0x802   :  { %1915 = vmatpush.msrb.mxu3 %v1746_v48  ;;  %v2957_v48 = vunpack.i.l.bf16 %v2956_v30 }
 0x804   :  { %1916 = vmatpush.msrb.mxu3 %v1745_v52 }
 0x81d   :  { %v1495_v53 = vpop.permute.xlu0 %1494 }
 0x81e   :  { %v1497_v37 = vmul.f32 %v1495_v53, %v1491_v51  ;;  %v2966_v53 = vpop.permute.xlu1 %2965 }
 0x820   :  { %v1498_v55 = vrot.slane %v1497_v37, 4 }
 0x822   :  { %v1499_v58 = vadd.f32 %v1498_v55, %v1497_v37 }
 0x824   :  { %v1500_v19 = vrot.slane %v1499_v58, 2 }
 0x825   :  { %v3880_v59 = vpop.permute.xlu0 %2915 }
 0x826   :  { %v1501_v61 = vadd.f32 %v1500_v19, %v1499_v58  ;;  %v2917_v2 = vunpack.i.l.bf16 %v3880_v59  ;;  %v2918_v41 = vunpack.i.h.bf16 %v3880_v59 }
 0x828   :  { %v1502_v32 = vrot.slane %v1501_v61, 1  ;;  %v1731_v10 = vsel %vm516_vm3, %v1729_v7, %v2917_v2  ;;  %v1881_v37 = vsel %vm516_vm3, %v1879_v44, %v2918_v41  ;;  %v1763_v41 = vld [vmem:[%s3116_s21 + $0x90] sm:$0xff] }
 0x829   :  { %v1733_v15 = vsel %vm652_vm4, %v1731_v10, %v2922_v12 }
 0x82a   :  { %v1503_v63 = vadd.f32 %v1502_v32, %v1501_v61 }
 0x82c   :  { %v1505_v1 = vadd.f32 %v1504_v39, %v1503_v63  ;;  %v2967_v39 = vunpack.i.l.bf16 %v2966_v53  ;;  %v2971_v63 = vpop.permute.xlu2 %2970 }
 0x82d   :  { %v3886_v60 = vpop.permute.xlu0 %2925  ;;  %v2972_v54 = vunpack.i.l.bf16 %v2971_v63 }
 0x82e   :  { %v2781_v6 = vmul.f32 -1.442695, %v1505_v1  ;;  %v2927_v4 = vunpack.i.l.bf16 %v3886_v60  ;;  %v2928_v58 = vunpack.i.h.bf16 %v3886_v60  ;;  %v1883_v1 = vsel %vm652_vm4, %v1881_v37, %v2923_v3  ;;  %v1874_v37 = vpop.permute.xlu1 %1873  ;;  %v2001_v3 = vld [vmem:[%s3126_s29 + $0x8] sm:$0xff] }
 0x830   :  { %2998 = vpow2.f32 %v2781_v6  ;;  %v1735_v56 = vsel %vm524_vm5, %v1733_v15, %v2927_v4  ;;  %v1885_v2 = vsel %vm524_vm5, %v1883_v1, %v2928_v58  ;;  %v2933_v6 = vunpack.i.h.bf16 %v3882_v35  ;;  %v2113_v1 = vld [vmem:[%s3141_s14] sm:$0xff] }
 0x831   :  { %v1737_v28 = vsel %vm657_vm6, %v1735_v56, %v2932_v20  ;;  %v2953_v4 = vunpack.i.h.bf16 %v2951_v11  ;;  %v2943_v35 = vunpack.i.h.bf16 %v3892_v13  ;;  %v2973_v11 = vunpack.i.h.bf16 %v2971_v63  ;;  %v2114_v63 = vld [vmem:[%s3141_s14 + $0x8] sm:$0xff] }
 0x832   :  { %v1887_v15 = vsel %vm657_vm6, %v1885_v2, %v2933_v6  ;;  %v2987_v2 = vld [vmem:[%s3121_s25] ss:$0 sm:$0xff]  ;;  %s4272_s25 = smov 96  }
 0x835   :  { %v3897_v21 = vpop.permute.xlu0 %2935 }
 0x836   :  { %v2999_v22 = vpop.eup %2998  ;;  %v2937_v24 = vunpack.i.l.bf16 %v3897_v21  ;;  %v2938_v60 = vunpack.i.h.bf16 %v3897_v21 }
 0x837   :  { %v1509_v26 = vadd.f32 1.0, %v2999_v22 }
 0x838   :  { %v1739_v8 = vsel %vm660_vm7, %v1737_v28, %v2937_v24  ;;  %v1889_v22 = vsel %vm660_vm7, %v1887_v15, %v2938_v60  ;;  %v2958_v24 = vunpack.i.h.bf16 %v2956_v30  ;;  %v2968_v28 = vunpack.i.h.bf16 %v2966_v53  ;;  %v1572_v30 = vld [vmem:[%s3241_s4 + $0x28] sm:$0xff] }
 0x839   :  { %3000 = vrcp.f32 %v1509_v26  ;;  %v1741_v9 = vsel %vm663_vm8, %v1739_v8, %v2942_v25  ;;  %v1521_v43 = vand.u32 2147483648, %v1509_v26  ;;  %v1519_v33 = vand.u32 2147483647, %v1509_v26 }
 0x83a   :  { %1791 = vmatmul.f32.vlgmr.msra.gmra.mxu2 %v1741_v9  ;;  %vm1515_vm15 = vweird.f32 %v1509_v26  ;;  %v1891_v25 = vsel %vm663_vm8, %v1889_v22, %v2943_v35  ;;  %v1744_v53 = vsel %vm483_vm2, %v3813_v36, %v3899_v23  ;;  %v2003_v36 = vld [vmem:[%s3126_s29 + $0x18] sm:$0xff]  ;;  %v2002_v23 = vld [vmem:[%s3126_s29 + $0x10] sm:$0xff] }
 0x83b   :  { %v1522_v55 = vor.u32 1.1754944e-38, %v1521_v43  ;;  %vm1520_vm1 = vcmp.eq.f32.partialorder %v1519_v33, 8.507059e+37  ;;  %v1762_v43 = vld [vmem:[%s3116_s21 + $0x88] sm:$0xff]  ;;  %v1562_v33 = vld [vmem:[%s4270_s17] sm:$0x1]  ;;  %2020 = vmatpush.msrb.mxu2 %v2003_v36 }
 0x83c   :  { %v2031_v36 = vld [vmem:[%s3131_s3] sm:$0xff] }
 0x83d   :  { %v2946_v16 = vpop.permute.xlu0 %2945  ;;  %2021 = vmatpush.msrb.mxu2 %v2002_v23  ;;  %v2075_v23 = vld [vmem:[%s3136_s8 + $0x18] sm:$0xff] }
 0x83e   :  { %v2947_v57 = vunpack.i.l.bf16 %v2946_v16  ;;  %v2948_v61 = vunpack.i.h.bf16 %v2946_v16 }
 0x83f   :  { %v3001_v29 = vpop.eup %3000  ;;  %2022 = vmatpush.msrb.mxu2 %v2001_v3  ;;  %v2074_v3 = vld [vmem:[%s3136_s8 + $0x10] sm:$0xff] }
 0x840   :  { %v1511_v31 = vmul.f32 %v3001_v29, %v1509_v26  ;;  %v1730_v38 = vsel %vm483_vm2, %v1646_v34, %v2947_v57  ;;  %vm1516_vm14 = vweird.f32 %v3001_v29  ;;  %v1880_v7 = vsel %vm483_vm2, %v3787_v14, %v2948_v61  ;;  %v1574_v57 = vld [vmem:[%s3241_s4 + $0x38] sm:$0xff]  ;;  %v1569_v34 = vld [vmem:[%s3241_s4 + $0x10] sm:$0xff] }
 0x841   :  { %v1732_v47 = vsel %vm516_vm3, %v1730_v38, %v2952_v27  ;;  %vm1517_vm0 = vmor %vm1515_vm15, %vm1516_vm14  ;;  %v1882_v56 = vsel %vm516_vm3, %v1880_v7, %v2953_v4  ;;  %1587 = vmatpush.msra.mxu1 %v1574_v57  ;;  %v1568_v38 = vld [vmem:[%s3241_s4 + $0x8] sm:$0xff]  ;;  %v1764_v27 = vld [vmem:[%s3116_s21 + $0x98] sm:$0xff] }
 0x842   :  { %v1512_v40 = vsub.f32 1.0, %v1511_v31  ;;  %v1734_v19 = vsel %vm652_vm4, %v1732_v47, %v2957_v48  ;;  %v1884_v14 = vsel %vm652_vm4, %v1882_v56, %v2958_v24  ;;  %v1571_v31 = vld [vmem:[%s3241_s4 + $0x20] sm:$0xff] }
 0x843   :  { %v1564_v47 = vld [vmem:[%s3236_s27] sm:$0x1] }
 0x844   :  { %v1513_v45 = vmul.f32 %v3001_v29, %v1512_v40  ;;  %v1567_v40 = vld [vmem:[%s3241_s4] sm:$0xff] }
 0x845   :  { %v2961_v49 = vpop.permute.xlu0 %2960 }
 0x846   :  { %v2962_v51 = vunpack.i.l.bf16 %v2961_v49  ;;  %v1514_v52 = vadd.f32 %v3001_v29, %v1513_v45  ;;  %v2963_v20 = vunpack.i.h.bf16 %v2961_v49  ;;  %v1761_v45 = vld [vmem:[%s3116_s21 + $0x80] sm:$0xff]  ;;  %s4271_s21 = smov 48  }
 0x848   :  { %v1518_v59 = vsel %vm1517_vm0, %v3001_v29, %v1514_v52  ;;  %v1736_v62 = vsel %vm524_vm5, %v1734_v19, %v2962_v51  ;;  %v1886_v26 = vsel %vm524_vm5, %v1884_v14, %v2963_v20  ;;  %v1573_v29 = vld [vmem:[%s3241_s4 + $0x30] sm:$0xff]  ;;  %v1743_v52 = vsel %vm483_vm2, %v3836_v17, %v3865_v42  ;;  %v1876_v17 = vpop.permute.xlu2 %1875  ;;  %v1824_v42 = vld [vmem:[#allocation3 + $0x6a] sm:$0x1f] }
 0x849   :  { %v1523_v32 = vsel %vm1520_vm1, %v1522_v55, %v1518_v59  ;;  %v1738_v5 = vsel %vm657_vm6, %v1736_v62, %v2967_v39  ;;  %v1888_v9 = vsel %vm657_vm6, %v1886_v26, %v2968_v28  ;;  %1588 = vmatpush.msra.mxu1 %v1573_v29  ;;  %v1823_v55 = vld [vmem:[#allocation3 + $0x62] sm:$0xff]  ;;  %v1894_v19 = vsel %vm483_vm2, %v1824_v42, %v1876_v17  ;;  %v2116_v62 = vld [vmem:[%s3141_s14 + $0x18] sm:$0xff] }
 0x84a   :  { %v1525_v0 = vmul.f32 %v1523_v32, %v3807_v18  ;;  %v1740_v18 = vsel %vm660_vm7, %v1738_v5, %v2972_v54  ;;  %v1890_v13 = vsel %vm660_vm7, %v1888_v9, %v2973_v11  ;;  %v1893_v58 = vsel %vm483_vm2, %v1823_v55, %v1874_v37  ;;  %v2115_v32 = vld [vmem:[%s3141_s14 + $0x10] sm:$0xff]  ;;  %v2000_v39 = vld [vmem:[%s3126_s29] sm:$0xff]  ;;  %v2034_v37 = vld [vmem:[%s3131_s3 + $0x18] sm:$0xff]  ;;  %s3087_s29 = smov [#allocation6]  }
 0x84b   :  { %1589 = vmatpush.msra.mxu1 %v1572_v30  ;;  %2023 = vmatpush.msrb.mxu2 %v2000_v39  ;;  %v2078_v55 = vld [vmem:[%s3136_s8 + $0x30] sm:$0xff]  ;;  %v2077_v17 = vld [vmem:[%s3136_s8 + $0x28] sm:$0xff] }
 0x84c   :  { %1558 = vmatmul.f32.vlgmr.msra.gmra.mxu3 %v1525_v0  ;;  %v2032_v42 = vld [vmem:[%s3131_s3 + $0x8] sm:$0xff] }
 0x84d   :  { %v2976_v10 = vpop.permute.xlu0 %2975  ;;  %1590 = vmatpush.msra.mxu1 %v1571_v31  ;;  %2135 = vmatpush.msra.mxu3 %v2116_v62  ;;  %v2072_v62 = vld [vmem:[%s3136_s8] sm:$0xff] }
 0x84e   :  { %v2977_v12 = vunpack.i.l.bf16 %v2976_v10  ;;  %v2978_v8 = vunpack.i.h.bf16 %v2976_v10 }
 0x84f   :  { %1591 = vmatpush.msra.mxu1 %v1570_v46  ;;  %2136 = vmatpush.msra.mxu3 %v2115_v32 }
 0x850   :  { %v1742_v21 = vsel %vm663_vm8, %v1740_v18, %v2977_v12  ;;  %v1892_v16 = vsel %vm663_vm8, %v1890_v13, %v2978_v8  ;;  %v2042_v12 = vld [vmem:[%s3131_s3 + $0x58] sm:$0xff]  ;;  %v2041_v18 = vld [vmem:[%s3131_s3 + $0x50] sm:$0xff] }
 0x851   :  { %1794 = vmatmul.f32.gmra.mxu2 %v1742_v21  ;;  %1592 = vmatpush.msra.mxu1 %v1569_v34  ;;  %v2040_v21 = vld [vmem:[%s3131_s3 + $0x48] sm:$0xff] }
 0x852   :  { %2137 = vmatpush.msra.mxu3 %v2114_v63 }
 0x853   :  { %1593 = vmatpush.msra.mxu1 %v1568_v38 }
 0x854   :  { %1917 = vmatmul.f32.vlgmr.msrb.gmra.mxu3 %v1891_v25 }
 0x855   :  { %1594 = vmatpush.msra.mxu1 %v1567_v40  ;;  %2138 = vmatpush.msra.mxu3 %v2113_v1 }
 0x857   :  { %1810 = vmatpush.msrb.mxu1 %v1764_v27 }
 0x859   :  { %1811 = vmatpush.msrb.mxu1 %v1763_v41 }
 0x85b   :  { %1812 = vmatpush.msrb.mxu1 %v1762_v43 }
 0x85c   :  { %1920 = vmatmul.f32.gmra.mxu3 %v1892_v16 }
 0x85d   :  { %1813 = vmatpush.msrb.mxu1 %v1761_v45 }
 0x8bd   :  { %v1792_v60 = vpop.f32.mrf.mxu2 }
 0x8be   :  { %v1793_v6 = vadd.f32 %v2987_v2, %v1792_v60 }
 0x8cf   :  { %v1559_v44 = vpop.f32.mrf.mxu3 }
 0x8d0   :  { %v1563_v49 = vmul.f32 %v1562_v33, %v1559_v44  ;;  %v2038_v33 = vld [vmem:[%s3131_s3 + $0x38] sm:$0xff]  ;;  %v2082_v44 = vld [vmem:[%s3136_s8 + $0x50] sm:$0xff] }
 0x8d2   :  { %v1565_v48 = vadd.f32 %v1564_v47, %v1563_v49  ;;  %v2037_v47 = vld [vmem:[%s3131_s3 + $0x30] sm:$0xff]  ;;  %v2081_v49 = vld [vmem:[%s3136_s8 + $0x48] sm:$0xff] }
 0x8d4   :  { %v1566_v51 = vmax.f32 %v1565_v48, 0.0  ;;  %v1795_v15 = vpop.f32.mrf.mxu2  ;;  %v2036_v48 = vld [vmem:[%s3131_s3 + $0x28] sm:$0xff] }
 0x8d5   :  { %v1796_v35 = vadd.f32 %v2987_v2, %v1795_v15 }
 0x8d6   :  { %2782 = vmatmul.msk.f32.vlgmr.msra.gmra.mxu1 %vm524_vm5, %v1566_v51  ;;  %v2080_v51 = vld [vmem:[%s3136_s8 + $0x40] sm:$0xff] }
 0x8d7   :  { %1936 = vmatpush.msra.mxu1 %v1764_v27  ;;  %v1918_v5 = vpop.f32.mrf.mxu3 }
 0x8d8   :  { %v1919_v54 = vadd.f32 %v2987_v2, %v1918_v5 }
 0x8d9   :  { %1937 = vmatpush.msra.mxu1 %v1763_v41 }
 0x8db   :  { %1938 = vmatpush.msra.mxu1 %v1762_v43  ;;  %v2039_v43 = vld [vmem:[%s3131_s3 + $0x40] sm:$0xff] }
 0x8dd   :  { %1939 = vmatpush.msra.mxu1 %v1761_v45  ;;  %v2083_v45 = vld [vmem:[%s3136_s8 + $0x58] sm:$0xff] }
 0x8de   :  { %2783 = vmatmul.msk.f32.vlgmr.msrb.gmra.mxu1 %vm516_vm3, %v1743_v52  ;;  %2094 = vmatpush.msra.mxu2 %v2083_v45  ;;  %v2035_v52 = vld [vmem:[%s3131_s3 + $0x20] sm:$0xff] }
 0x8df   :  { %2053 = vmatpush.msrb.mxu1 %v2042_v12  ;;  %v1921_v22 = vpop.f32.mrf.mxu3 }
 0x8e0   :  { %v1922_v14 = vadd.f32 %v2987_v2, %v1921_v22  ;;  %2095 = vmatpush.msra.mxu2 %v2082_v44 }
 0x8e1   :  { %2054 = vmatpush.msrb.mxu1 %v2041_v18 }
 0x8e2   :  { %2096 = vmatpush.msra.mxu2 %v2081_v49 }
 0x8e3   :  { %2055 = vmatpush.msrb.mxu1 %v2040_v21 }
 0x8e4   :  { %2097 = vmatpush.msra.mxu2 %v2080_v51 }
 0x8e5   :  { %2056 = vmatpush.msrb.mxu1 %v2039_v43 }
 0x8e6   :  { %2784 = vmatmul.msk.f32.gmra.mxu1 %vm516_vm3, %v1744_v53  ;;  %v2079_v53 = vld [vmem:[%s3136_s8 + $0x38] sm:$0xff] }
 0x8e7   :  { %2057 = vmatpush.msrb.mxu1 %v2038_v33  ;;  %2098 = vmatpush.msra.mxu2 %v2079_v53 }
 0x8e9   :  { %2058 = vmatpush.msrb.mxu1 %v2037_v47  ;;  %2099 = vmatpush.msra.mxu2 %v2078_v55 }
 0x8eb   :  { %2059 = vmatpush.msrb.mxu1 %v2036_v48  ;;  %2100 = vmatpush.msra.mxu2 %v2077_v17 }
 0x8ed   :  { %2060 = vmatpush.msrb.mxu1 %v2035_v52 }
 0x8ee   :  { %2785 = vmatmul.msk.f32.vlgmr.msra.gmra.mxu1 %vm516_vm3, %v1893_v58  ;;  %v2033_v58 = vld [vmem:[%s3131_s3 + $0x10] sm:$0xff]  ;;  %s2685_s3 = sshll.u32 %s3087_s29, 4  ;;  %s2686_s3 = int_to_ptr.vmem [resolvable:$true] %s2685_s3 }
 0x8ef   :  { %2061 = vmatpush.msrb.mxu1 %v2034_v37 }
 0x8f1   :  { %2062 = vmatpush.msrb.mxu1 %v2033_v58  ;;  %v2200_v58 = vld [vmem:[%s3156_s30] sm:$0xf] }
 0x8f3   :  { %2063 = vmatpush.msrb.mxu1 %v2032_v42 }
 0x8f5   :  { %2064 = vmatpush.msrb.mxu1 %v2031_v36  ;;  %v1575_v36 = vld [vmem:[%s3246_s12] sm:$0x1] }
 0x8f6   :  { %2786 = vmatmul.msk.f32.gmra.mxu1 %vm516_vm3, %v1894_v19  ;;  %v2076_v19 = vld [vmem:[%s3136_s8 + $0x20] sm:$0xff] }
 0x8f7   :  { %2101 = vmatpush.msra.mxu2 %v2076_v19 }
 0x8f9   :  { %2102 = vmatpush.msra.mxu2 %v2075_v23 }
 0x8fb   :  { %2103 = vmatpush.msra.mxu2 %v2074_v3 }
 0x953   :  { %v3963_v59 = vpop.f32.mrf.mxu1 }
 0x954   :  { %v1597_v23 = vadd.f32 %v3963_v59, %v1575_v36  ;;  %v2403_v36 = vld [vmem:[%s4261_s7 + $0x88] sm:$0xff] }
 0x95b   :  { %v1815_v61 = vpop.f32.mrf.mxu1 }
 0x95c   :  { %v1816_v7 = vadd.f32 %v1815_v61, %v1793_v6  ;;  %v2073_v61 = vld [vmem:[%s3136_s8 + $0x8] sm:$0xff]  ;;  %s2687_s8 = sshll.u32 %s3251_s20, 4  ;;  %s2688_s8 = int_to_ptr.hbm [resolvable:$true] %s2687_s8 }
 0x95d   :  { %2104 = vmatpush.msra.mxu2 %v2073_v61  ;;  %v2205_v61 = vld [vmem:[%s3161_s6] sm:$0xf]  ;;  %s3032_s14 = sshra.s32 %s2688_s8, 4  ;;  %s3033_s14 = int_to_ptr.hbm [resolvable:$true] %s3032_s14 }
 0x95e   :  { %v1821_v56 = vmax.f32 %v1816_v7, 0.0  ;;  %p3037_p1 = scmp.lt.s32.totalorder %s3033_s14, %s3251_s20 }
 0x95f   :  { %2105 = vmatpush.msra.mxu2 %v2072_v62 }
 0x963   :  { %v1818_v0 = vpop.f32.mrf.mxu1 }
 0x964   :  { %v1819_v25 = vadd.f32 %v1818_v0, %v1796_v35 }
 0x966   :  { %v1822_v8 = vmax.f32 %v1819_v25, 0.0 }
 0x96b   :  { %v1941_v10 = vpop.f32.mrf.mxu1 }
 0x96c   :  { %v1942_v4 = vadd.f32 %v1941_v10, %v1919_v54 }
 0x96e   :  { %v1947_v20 = vmax.f32 %v1942_v4, 0.0 }
 0x970   :  { %v1949_v24 = vmax.f32 %v1821_v56, %v1947_v20 }
 0x972   :  { %1952 = vst.msk [vmem:[#allocation4 + $0x1a] sm:$0xff] %vm516_vm3, %v1949_v24 }
 0x973   :  { %v1944_v26 = vpop.f32.mrf.mxu1 }
 0x974   :  { %v1945_v28 = vadd.f32 %v1944_v26, %v1922_v14 }
 0x976   :  { %v1948_v9 = vmax.f32 %v1945_v28, 0.0 }
 0x978   :  { %v1950_v11 = vmax.f32 %v1822_v8, %v1948_v9 }
 0x979   :  { %v1954_v13 = vld [vmem:[#allocation4 + $0x1a] sm:$0xff] }
 0x97a   :  { %1953 = vst.msk [vmem:[#allocation4 + $0x22] sm:$0x1f] %vm875_vm10, %v1950_v11  ;;  %1966 = vrot.lane.b32.xlu0 %v1954_v13, %s3078_s5  ;;  %2787 = vmatmul.msk.f32.vlgmr.msrb.gmra.mxu2 %vm516_vm3, %v1954_v13  ;;  %v3981_v16 = vld [vmem:[#allocation4 + $0x19] sm:$0xff] }
 0x97b   :  { %v1996_v57 = vmax.f32 %v3981_v16, %v1954_v13  ;;  %v1960_v1 = vld [vmem:[#allocation4 + $0x18] sm:$0xff]  ;;  %v2988_v11 = vld [vmem:[%s3146_s19] ss:$0 sm:$0xff]  ;;  %s3034_s19 = scalar_lea.hbm %s3033_s14, 2 }
 0x97c   :  { %p3035_p0 = scmp.ne.s32.totalorder %s3033_s14, %s3034_s19 }
 0x981   :  { %v1962_v29 = vld [vmem:[#allocation4 + $0x1c] sm:$0xff]  ;;  %v1963_v40 = vld [vmem:[#allocation4 + $0x24] sm:$0x1f] }
 0x982   :  { %v1958_v30 = vld [vmem:[#allocation4 + $0x1b] sm:$0xff]  ;;  %1986 = vrot.lane.b32.xlu1 %v1962_v29, %s3080_s13  ;;  %v1959_v27 = vld [vmem:[#allocation4 + $0x23] sm:$0x1f] }
 0x983   :  { %v1955_v31 = vld [vmem:[#allocation4 + $0x22] sm:$0x1f]  ;;  %1974 = vrot.lane.b32.xlu2 %v1958_v30, %s3080_s13  ;;  %v1998_v46 = vmax.f32 %v1996_v57, %v1958_v30  ;;  %v2989_v57 = vld [vmem:[%s3151_s24] ss:$0 sm:$0xff]  ;;  %s3036_s24 = scalar_lea.hbm %s3251_s20, 2 }
 0x984   :  { %v3986_v34 = vld [vmem:[#allocation4 + $0x21] sm:$0x1f]  ;;  %1968 = vrot.lane.b32.xlu0 %v1955_v31, %s3078_s5  ;;  %2788 = vmatmul.msk.f32.gmra.mxu2 %vm516_vm3, %v1955_v31  ;;  %p3038_p2 = scmp.lt.s32.totalorder %s3036_s24, %s3034_s19 }
 0x985   :  { %2793 = vmatmul.msk.f32.vlgmr.msra.gmra.mxu3 %vm516_vm3, %v1998_v46  ;;  %v1997_v38 = vmax.f32 %v3986_v34, %v1955_v31  ;;  %v1961_v4 = vld [vmem:[#allocation4 + $0x20] sm:$0x1f] }
 0x986   :  { %p3039_p3 = por %p3038_p2, %p3037_p1 }
 0x987   :  { %v1999_v41 = vmax.f32 %v1997_v38, %v1959_v27 }
 0x988   :  { %p3040_p4 = pnand %p3039_p3, %p3035_p0 }
 0x98a   :  { %1988 = vrot.lane.b32.xlu1 %v1963_v40, %s3080_s13 }
 0x98b   :  { %1976 = vrot.lane.b32.xlu2 %v1959_v27, %s3080_s13 }
 0x98d   :  { %2794 = vmatmul.msk.f32.gmra.mxu3 %vm516_vm3, %v1999_v41 }
 0x9dd   :  { %v1975_v32 = vpop.permute.xlu2 %1974 }
 0x9e5   :  { %v1977_v54 = vpop.permute.xlu2 %1976 }
 0x9ec   :  { %v1967_v39 = vpop.permute.xlu0 %1966 }
 0x9ed   :  { %v1980_v63 = vsel %vm516_vm3, %v3981_v16, %v1967_v39  ;;  %v1992_v2 = vsel %vm516_vm3, %v1960_v1, %v1967_v39 }
 0x9ee   :  { %v1982_v0 = vsel %vm524_vm5, %v1980_v63, %v1975_v32 }
 0x9ef   :  { %2789 = vmatmul.msk.f32.vlgmr.msrb.gmra.mxu1 %vm660_vm7, %v1982_v0 }
 0x9f4   :  { %v1987_v60 = vpop.permute.xlu1 %1986 }
 0x9f5   :  { %v1994_v5 = vsel %vm524_vm5, %v1992_v2, %v1987_v60  ;;  %v2208_v60 = vld [vmem:[%s4257_s26] sm:$0xf] }
 0x9f6   :  { %v1969_v6 = vpop.permute.xlu0 %1968  ;;  %2791 = vmatmul.msk.f32.vlgmr.msra.gmra.mxu2 %vm660_vm7, %v1994_v5 }
 0x9f7   :  { %v1981_v7 = vsel %vm516_vm3, %v3986_v34, %v1969_v6  ;;  %v1993_v12 = vsel %vm516_vm3, %v1961_v4, %v1969_v6 }
 0x9f8   :  { %v1983_v10 = vsel %vm524_vm5, %v1981_v7, %v1977_v54 }
 0x9f9   :  { %2790 = vmatmul.msk.f32.gmra.mxu1 %vm660_vm7, %v1983_v10 }
 0x9fc   :  { %v1989_v18 = vpop.permute.xlu1 %1988 }
 0x9fd   :  { %v1995_v15 = vsel %vm524_vm5, %v1993_v12, %v1989_v18  ;;  %v2025_v56 = vpop.f32.mrf.mxu2 }
 0x9fe   :  { %2792 = vmatmul.msk.f32.gmra.mxu2 %vm660_vm7, %v1995_v15  ;;  %v2222_v15 = vld [vmem:[%s4260_s2] sm:$0x1] }
 0xa07   :  { %v2028_v21 = vpop.f32.mrf.mxu2 }
 0xa08   :  { %v2140_v35 = vpop.f32.mrf.mxu3 }
 0xa10   :  { %v2143_v14 = vpop.f32.mrf.mxu3 }
 0xa6c   :  { %v2066_v20 = vpop.f32.mrf.mxu1 }
 0xa6d   :  { %2148 = vrot.lane.b32.xlu0 %v2066_v20, %s3077_s0 }
 0xa76   :  { %v2069_v22 = vpop.f32.mrf.mxu1 }
 0xa77   :  { %2150 = vrot.lane.b32.xlu1 %v2069_v22, %s3077_s0  ;;  %v2333_v22 = vld [vmem:[%s4259_s1 + $0xb8] sm:$0xff] }
 0xa78   :  { %2371 = vmatpush.msrb.mxu2 %v2333_v22  ;;  %v2320_v22 = vld [vmem:[%s4259_s1 + $0x50] sm:$0xff] }
 0xa79   :  { %v2107_v24 = vpop.f32.mrf.mxu2 }
 0xa7a   :  { %2156 = vrot.lane.b32.xlu2 %v2107_v24, %s3078_s5 }
 0xa7f   :  { %2164 = vrot.lane.b32.xlu1 %v2140_v35, %s4271_s21 }
 0xa81   :  { %v2110_v25 = vpop.f32.mrf.mxu2 }
 0xa82   :  { %2158 = vrot.lane.b32.xlu0 %v2110_v25, %s3078_s5  ;;  %2166 = vrot.lane.b32.xlu2 %v2143_v14, %s4271_s21  ;;  %v2281_v14 = vld [vmem:[%s4258_s28 + $0x30] sm:$0xff] }
 0xa83   :  { %v2332_v25 = vld [vmem:[%s4259_s1 + $0xb0] sm:$0xff] }
 0xa84   :  { %2372 = vmatpush.msrb.mxu2 %v2332_v25  ;;  %v2318_v25 = vld [vmem:[%s4259_s1 + $0x40] sm:$0xff] }
 0xad4   :  { %v2157_v8 = vpop.permute.xlu2 %2156 }
 0xadc   :  { %v2167_v34 = vpop.permute.xlu2 %2166 }
 0xadf   :  { %v2149_v28 = vpop.permute.xlu0 %2148 }
 0xae0   :  { %v2170_v9 = vsel %vm483_vm2, %v2025_v56, %v2149_v28  ;;  %v2331_v28 = vld [vmem:[%s4259_s1 + $0xa8] sm:$0xff] }
 0xae1   :  { %v2172_v16 = vsel %vm516_vm3, %v2170_v9, %v2157_v8  ;;  %v2279_v8 = vld [vmem:[%s4258_s28 + $0x20] sm:$0xff]  ;;  %2373 = vmatpush.msrb.mxu2 %v2331_v28  ;;  %v2317_v28 = vld [vmem:[%s4259_s1 + $0x38] sm:$0xff] }
 0xae2   :  { %v2330_v9 = vld [vmem:[%s4259_s1 + $0xa0] sm:$0xff] }
 0xae3   :  { %2374 = vmatpush.msrb.mxu2 %v2330_v9  ;;  %v2316_v9 = vld [vmem:[%s4259_s1 + $0x30] sm:$0xff] }
 0xae9   :  { %v2151_v26 = vpop.permute.xlu1 %2150 }
 0xaea   :  { %v2171_v31 = vsel %vm483_vm2, %v2028_v21, %v2151_v26  ;;  %vm1599_vm2 = vcmask 8192   ;;  %v2282_v21 = vld [vmem:[%s4258_s28 + $0x38] sm:$0xff]  ;;  %v2280_v26 = vld [vmem:[%s4258_s28 + $0x28] sm:$0xff] }
 0xaeb   :  { %v1600_v3 = vsel %vm1599_vm2, %v1597_v23, -inf  ;;  %2295 = vmatpush.msra.mxu1 %v2282_v21 }
 0xaed   :  { %2296 = vmatpush.msra.mxu1 %v2281_v14  ;;  %v2395_v14 = vld [vmem:[%s4261_s7 + $0x48] sm:$0xff] }
 0xaef   :  { %2297 = vmatpush.msra.mxu1 %v2280_v26  ;;  %v2394_v26 = vld [vmem:[%s4261_s7 + $0x40] sm:$0xff] }
 0xaf1   :  { %v2165_v13 = vpop.permute.xlu1 %2164  ;;  %2298 = vmatpush.msra.mxu1 %v2279_v8  ;;  %v2393_v8 = vld [vmem:[%s4261_s7 + $0x38] sm:$0xff] }
 0xaf2   :  { %v2174_v29 = vsel %vm652_vm4, %v2172_v16, %v2165_v13  ;;  %v2329_v13 = vld [vmem:[%s4259_s1 + $0x98] sm:$0xff] }
 0xaf3   :  { %v2180_v30 = vmul.f32 %v2988_v11, %v2174_v29  ;;  %v2328_v29 = vld [vmem:[%s4259_s1 + $0x90] sm:$0xff]  ;;  %2375 = vmatpush.msrb.mxu2 %v2329_v13  ;;  %v2315_v13 = vld [vmem:[%s4259_s1 + $0x28] sm:$0xff] }
 0xaf4   :  { %v2159_v46 = vpop.permute.xlu0 %2158 }
 0xaf5   :  { %v4042_v38 = vadd.f32 %v2989_v57, %v2180_v30  ;;  %v2173_v40 = vsel %vm516_vm3, %v2171_v31, %v2159_v46  ;;  %v2276_v46 = vld [vmem:[%s4258_s28 + $0x8] sm:$0xff]  ;;  %2376 = vmatpush.msrb.mxu2 %v2328_v29 }
 0xaf6   :  { %v2175_v27 = vsel %vm652_vm4, %v2173_v40, %v2167_v34  ;;  %v2327_v34 = vld [vmem:[%s4259_s1 + $0x88] sm:$0xff] }
 0xaf7   :  { %v2181_v41 = vmul.f32 %v2988_v11, %v2175_v27  ;;  %v2188_v43 = vmax.f32 %v4042_v38, 0.0  ;;  %v2278_v11 = vld [vmem:[%s4258_s28 + $0x18] sm:$0xff]  ;;  %2377 = vmatpush.msrb.mxu2 %v2327_v34  ;;  %v2322_v38 = vld [vmem:[%s4259_s1 + $0x60] sm:$0xff]  ;;  %v2312_v34 = vld [vmem:[%s4259_s1 + $0x10] sm:$0xff] }
 0xaf8   :  { %2299 = vmatpush.msra.mxu1 %v2278_v11  ;;  %v2392_v11 = vld [vmem:[%s4261_s7 + $0x30] sm:$0xff] }
 0xaf9   :  { %v4047_v45 = vadd.f32 %v2989_v57, %v2181_v41  ;;  %v2190_v44 = vsel %vm524_vm5, %v2188_v43, 0.0  ;;  %v2277_v57 = vld [vmem:[%s4258_s28 + $0x10] sm:$0xff]  ;;  %v2275_v41 = vld [vmem:[%s4258_s28] sm:$0xff] }
 0xafa   :  { %2300 = vmatpush.msra.mxu1 %v2277_v57  ;;  %v2314_v57 = vld [vmem:[%s4259_s1 + $0x20] sm:$0xff] }
 0xafb   :  { %v2189_v33 = vmax.f32 %v4047_v45, 0.0 }
 0xafc   :  { %2301 = vmatpush.msra.mxu1 %v2276_v46  ;;  %v2389_v46 = vld [vmem:[%s4261_s7 + $0x18] sm:$0xff] }
 0xafd   :  { %v2191_v47 = vsel %vm1114_vm11, %v2189_v33, 0.0 }
 0xafe   :  { %v2192_v49 = vadd.f32 %v2191_v47, %v2190_v44  ;;  %v2326_v44 = vld [vmem:[%s4259_s1 + $0x80] sm:$0xff]  ;;  %v2409_v47 = vld [vmem:[%s4261_s7 + $0xb8] sm:$0xff]  ;;  %2302 = vmatpush.msra.mxu1 %v2275_v41  ;;  %v2387_v41 = vld [vmem:[%s4261_s7 + $0x8] sm:$0xff] }
 0xaff   :  { %2378 = vmatpush.msrb.mxu2 %v2326_v44 }
 0xb00   :  { %v2193_v48 = vrot.slane %v2192_v49, 4 }
 0xb01   :  { %2447 = vmatpush.msra.mxu2 %v2409_v47  ;;  %v2310_v47 = vld [vmem:[%s4259_s1] sm:$0xff] }
 0xb02   :  { %v2194_v51 = vadd.f32 %v2193_v48, %v2192_v49  ;;  %v2408_v49 = vld [vmem:[%s4261_s7 + $0xb0] sm:$0xff]  ;;  %v2407_v48 = vld [vmem:[%s4261_s7 + $0xa8] sm:$0xff] }
 0xb03   :  { %2448 = vmatpush.msra.mxu2 %v2408_v49  ;;  %v2386_v49 = vld [vmem:[%s4261_s7] sm:$0xff] }
 0xb04   :  { %v2195_v52 = vrot.slane %v2194_v51, 2 }
 0xb05   :  { %2449 = vmatpush.msra.mxu2 %v2407_v48  ;;  %v2469_v48 = vld [vmem:[%s4262_s10 + $0x38] sm:$0xff] }
 0xb06   :  { %v2196_v53 = vadd.f32 %v2195_v52, %v2194_v51  ;;  %v2406_v52 = vld [vmem:[%s4261_s7 + $0xa0] sm:$0xff] }
 0xb07   :  { %2450 = vmatpush.msra.mxu2 %v2406_v52  ;;  %v2467_v52 = vld [vmem:[%s4262_s10 + $0x28] sm:$0xff] }
 0xb08   :  { %v2197_v37 = vrot.slane %v2196_v53, 1 }
 0xb0a   :  { %v2198_v55 = vadd.f32 %v2197_v37, %v2196_v53  ;;  %v2405_v37 = vld [vmem:[%s4261_s7 + $0x98] sm:$0xff] }
 0xb0b   :  { %2451 = vmatpush.msra.mxu2 %v2405_v37  ;;  %v2465_v37 = vld [vmem:[%s4262_s10 + $0x18] sm:$0xff] }
 0xb0c   :  { %v2199_v17 = vmul.f32 %v2198_v55, %v3668_v50 }
 0xb0e   :  { %v2201_v42 = vmul.f32 %v2200_v58, %v2199_v17  ;;  %v2404_v17 = vld [vmem:[%s4261_s7 + $0x90] sm:$0xff] }
 0xb0f   :  { %2452 = vmatpush.msra.mxu2 %v2404_v17 }
 0xb10   :  { %v2202_v19 = vsel %vm1133_vm13, %v2201_v42, 0.0 }
 0xb11   :  { %2203 = vadd.xlane.f32.xlu0 %v2202_v19  ;;  %2453 = vmatpush.msra.mxu2 %v2403_v36 }
 0xb19   :  { %1601 = vmax.xlane.f32.xlu0 %v1600_v3 }
 0xb84   :  { %v2204_v62 = vpop.xlane.xlu0 %2203 }
 0xb85   :  { %v2206_v32 = vadd.f32 %v2205_v61, %v2204_v62  ;;  %v2402_v61 = vld [vmem:[%s4261_s7 + $0x80] sm:$0xff] }
 0xb86   :  { %2454 = vmatpush.msra.mxu2 %v2402_v61 }
 0xb87   :  { %v2207_v39 = vmax.f32 %v2206_v32, 0.0 }
 0xb89   :  { %2211 = vperm.xlu1 %2979, %v2207_v39  }
 0xb8c   :  { %v1602_v63 = vpop.xlane.xlu0 %1601 }
 0xb8d   :  { %v1603_v0 = vsub.f32 %v1597_v23, %v1602_v63 }
 0xb8f   :  { %v1604_v1 = vmul.f32 1.442695, %v1603_v0 }
 0xb91   :  { %3002 = vpow2.f32 %v1604_v1  ;;  %v2325_v1 = vld [vmem:[%s4259_s1 + $0x78] sm:$0xff] }
 0xb92   :  { %2340 = vmatpush.msrb.mxu3 %v2325_v1 }
 0xb97   :  { %v3003_v2 = vpop.eup %3002 }
 0xb98   :  { %v1606_v59 = vsel %vm1599_vm2, %v3003_v2, 0.0  ;;  %v2401_v2 = vld [vmem:[%s4261_s7 + $0x78] sm:$0xff] }
 0xb99   :  { %1607 = vadd.xlane.f32.xlu0 %v1606_v59  ;;  %v2324_v59 = vld [vmem:[%s4259_s1 + $0x70] sm:$0xff]  ;;  %2416 = vmatpush.msrb.mxu1 %v2401_v2 }
 0xb9a   :  { %2341 = vmatpush.msrb.mxu3 %v2324_v59 }
 0xbfb   :  { %v2212_v5 = vpop.permute.xlu1 %2211 }
 0xbfc   :  { %v2214_v6 = vmul.f32 %v2212_v5, %v2208_v60  ;;  %v2400_v60 = vld [vmem:[%s4261_s7 + $0x70] sm:$0xff]  ;;  %v2323_v5 = vld [vmem:[%s4259_s1 + $0x68] sm:$0xff] }
 0xbfd   :  { %2417 = vmatpush.msrb.mxu1 %v2400_v60  ;;  %2342 = vmatpush.msrb.mxu3 %v2323_v5 }
 0xbfe   :  { %v2215_v54 = vsel %vm1133_vm13, %v2214_v6, 0.0  ;;  %v2399_v6 = vld [vmem:[%s4261_s7 + $0x68] sm:$0xff] }
 0xbff   :  { %v2216_v7 = vrot.slane %v2215_v54, 4  ;;  %2418 = vmatpush.msrb.mxu1 %v2399_v6  ;;  %2343 = vmatpush.msrb.mxu3 %v2322_v38 }
 0xc01   :  { %v2217_v10 = vadd.f32 %v2216_v7, %v2215_v54 }
 0xc03   :  { %v2218_v4 = vrot.slane %v2217_v10, 2 }
 0xc05   :  { %v2219_v12 = vadd.f32 %v2218_v4, %v2217_v10 }
 0xc07   :  { %v2220_v18 = vrot.slane %v2219_v12, 1 }
 0xc09   :  { %v2221_v56 = vadd.f32 %v2220_v18, %v2219_v12  ;;  %v2321_v18 = vld [vmem:[%s4259_s1 + $0x58] sm:$0xff] }
 0xc0a   :  { %2344 = vmatpush.msrb.mxu3 %v2321_v18 }
 0xc0b   :  { %v2223_v20 = vadd.f32 %v2222_v15, %v2221_v56  ;;  %v2397_v15 = vld [vmem:[%s4261_s7 + $0x58] sm:$0xff] }
 0xc0c   :  { %v1608_v35 = vpop.xlane.xlu0 %1607  ;;  %2345 = vmatpush.msrb.mxu3 %v2320_v22 }
 0xc0d   :  { %v2795_v24 = vmul.f32 -1.442695, %v2223_v20  ;;  %3004 = vlog2.f32 %v1608_v35  ;;  %v2396_v35 = vld [vmem:[%s4261_s7 + $0x50] sm:$0xff] }
 0xc0f   :  { %3006 = vpow2.f32 %v2795_v24  ;;  %v2319_v24 = vld [vmem:[%s4259_s1 + $0x48] sm:$0xff] }
 0xc10   :  { %2346 = vmatpush.msrb.mxu3 %v2319_v24  ;;  %v2991_v24 = vld [vmem:[%s4264_s15] ss:$0 sm:$0xff] }
 0xc12   :  { %2347 = vmatpush.msrb.mxu3 %v2318_v25 }
 0xc13   :  { %v3005_v16 = vpop.eup %3004 }
 0xc14   :  { %v1610_v30 = vmul.f32 0.6931472, %v3005_v16  ;;  %2348 = vmatpush.msrb.mxu3 %v2317_v28  ;;  %v2391_v16 = vld [vmem:[%s4261_s7 + $0x28] sm:$0xff] }
 0xc15   :  { %v3007_v31 = vpop.eup %3006 }
 0xc16   :  { %v2227_v40 = vadd.f32 1.0, %v3007_v31  ;;  %v1611_v27 = vsub.f32 %v1603_v0, %v1610_v30  ;;  %2349 = vmatpush.msrb.mxu3 %v2316_v9  ;;  %v2390_v30 = vld [vmem:[%s4261_s7 + $0x20] sm:$0xff]  ;;  %v2313_v31 = vld [vmem:[%s4259_s1 + $0x18] sm:$0xff] }
 0xc18   :  { %3008 = vrcp.f32 %v2227_v40  ;;  %1612 = vst.msk [vmem:[#allocation6] sm:$0x1] %vm1599_vm2, %v1611_v27  ;;  %v2239_v58 = vand.u32 2147483648, %v2227_v40  ;;  %v2237_v19 = vand.u32 2147483647, %v2227_v40  ;;  %vm2233_vm6 = vweird.f32 %v2227_v40  ;;  %2350 = vmatpush.msrb.mxu3 %v2315_v13  ;;  %v2311_v27 = vld [vmem:[%s4259_s1 + $0x8] sm:$0xff] }
 0xc1a   :  { %v2240_v3 = vor.u32 1.1754944e-38, %v2239_v58  ;;  %vm2238_vm10 = vcmp.eq.f32.partialorder %v2237_v19, 8.507059e+37  ;;  %2351 = vmatpush.msrb.mxu3 %v2314_v57  ;;  %v2463_v58 = vld [vmem:[%s4262_s10 + $0x8] sm:$0xff]  ;;  %v2462_v19 = vld [vmem:[%s4262_s10] sm:$0xff] }
 0xc1c   :  { %2352 = vmatpush.msrb.mxu3 %v2313_v31 }
 0xc1e   :  { %v3009_v51 = vpop.eup %3008  ;;  %2353 = vmatpush.msrb.mxu3 %v2312_v34 }
 0xc1f   :  { %v2229_v53 = vmul.f32 %v3009_v51, %v2227_v40  ;;  %vm2234_vm4 = vweird.f32 %v3009_v51  ;;  %v2388_v40 = vld [vmem:[%s4261_s7 + $0x10] sm:$0xff] }
 0xc20   :  { %vm2235_vm8 = vmor %vm2233_vm6, %vm2234_vm4  ;;  %2354 = vmatpush.msrb.mxu3 %v2311_v27 }
 0xc21   :  { %v2230_v55 = vsub.f32 1.0, %v2229_v53  ;;  %v2466_v53 = vld [vmem:[%s4262_s10 + $0x20] sm:$0xff] }
 0xc22   :  { %2355 = vmatpush.msrb.mxu3 %v2310_v47 }
 0xc23   :  { %v2231_v42 = vmul.f32 %v3009_v51, %v2230_v55  ;;  %v2464_v55 = vld [vmem:[%s4262_s10 + $0x10] sm:$0xff] }
 0xc24   :  { %2484 = vmatpush.msra.mxu3 %v2469_v48  ;;  %v2556_v48 = vld [vmem:[%s4266_s18] sm:$0xff] }
 0xc25   :  { %v2232_v23 = vadd.f32 %v3009_v51, %v2231_v42 }
 0xc27   :  { %v2236_v62 = vsel %vm2235_vm8, %v3009_v51, %v2232_v23  ;;  %v2468_v51 = vld [vmem:[%s4262_s10 + $0x30] sm:$0xff] }
 0xc28   :  { %v2241_v32 = vsel %vm2238_vm10, %v2240_v3, %v2236_v62  ;;  %2485 = vmatpush.msra.mxu3 %v2468_v51 }
 0xc29   :  { %v2243_v39 = vperm.slane %v2241_v32, 0 }
 0xc2a   :  { %2486 = vmatpush.msra.mxu3 %v2467_v52 }
 0xc2b   :  { %v2244_v63 = vmul.f32 %v2243_v39, %v2188_v43  ;;  %v2245_v0 = vmul.f32 %v2243_v39, %v2189_v33  ;;  %v2398_v33 = vld [vmem:[%s4261_s7 + $0x60] sm:$0xff] }
 0xc2c   :  { %2419 = vmatpush.msrb.mxu1 %v2398_v33  ;;  %2487 = vmatpush.msra.mxu3 %v2466_v53 }
 0xc2d   :  { %2247 = vst.msk [vmem:[#allocation5 + $0x1a] sm:$0xff] %vm524_vm5, %v2244_v63 }
 0xc2e   :  { %2248 = vst.msk [vmem:[#allocation5 + $0x22] sm:$0x1f] %vm1114_vm11, %v2245_v0  ;;  %2420 = vmatpush.msrb.mxu1 %v2397_v15  ;;  %2488 = vmatpush.msra.mxu3 %v2465_v37  ;;  %v2609_v37 = vld [vmem:[%s4267_s23 + $0x78] sm:$0xff] }
 0xc30   :  { %2421 = vmatpush.msrb.mxu1 %v2396_v35  ;;  %2489 = vmatpush.msra.mxu3 %v2464_v55  ;;  %v2608_v55 = vld [vmem:[%s4267_s23 + $0x70] sm:$0xff] }
 0xc32   :  { %2422 = vmatpush.msrb.mxu1 %v2395_v14  ;;  %2490 = vmatpush.msra.mxu3 %v2463_v58  ;;  %v2606_v58 = vld [vmem:[%s4267_s23 + $0x60] sm:$0xff] }
 0xc34   :  { %v2249_v43 = vld [vmem:[#allocation5 + $0x1a] sm:$0xff]  ;;  %2423 = vmatpush.msrb.mxu1 %v2394_v26  ;;  %2491 = vmatpush.msra.mxu3 %v2462_v19  ;;  %v2559_v19 = vld [vmem:[%s4268_s22] sm:$0xff] }
 0xc35   :  { %v4105_v45 = vld [vmem:[#allocation5 + $0x19] sm:$0xff]  ;;  %v2250_v54 = vld [vmem:[#allocation5 + $0x22] sm:$0x1f]  ;;  %2261 = vrot.lane.b32.xlu2 %v2249_v43, %s3080_s13  ;;  %2796 = vmatmul.msk.f32.vlgmr.msra.gmra.mxu1 %vm524_vm5, %v2249_v43 }
 0xc36   :  { %v2253_v7 = vld [vmem:[#allocation5 + $0x1b] sm:$0xff]  ;;  %v2271_v10 = vmax.f32 %v4105_v45, %v2249_v43  ;;  %2263 = vrot.lane.b32.xlu1 %v2250_v54, %s3080_s13  ;;  %v2254_v20 = vld [vmem:[#allocation5 + $0x23] sm:$0x1f]  ;;  %2424 = vmatpush.msrb.mxu1 %v2393_v8 }
 0xc37   :  { %v4111_v4 = vld [vmem:[#allocation5 + $0x21] sm:$0x1f]  ;;  %2798 = vmatmul.msk.f32.vlgmr.msrb.gmra.mxu2 %vm524_vm5, %v2253_v7  ;;  %v2255_v17 = vld [vmem:[#allocation5 + $0x18] sm:$0xff] }
 0xc38   :  { %v2272_v12 = vmax.f32 %v4111_v4, %v2250_v54  ;;  %v4118_v56 = vmax.f32 %v2271_v10, %v2253_v7  ;;  %2425 = vmatpush.msrb.mxu1 %v2392_v11  ;;  %v2257_v29 = vld [vmem:[#allocation5 + $0x1c] sm:$0xff]  ;;  %v2258_v44 = vld [vmem:[#allocation5 + $0x24] sm:$0x1f]  ;;  %2610 = vmatpush.msrb.mxu2 %v2609_v37 }
 0xc39   :  { %v2256_v61 = vld [vmem:[#allocation5 + $0x20] sm:$0x1f] }
 0xc3a   :  { %v4120_v21 = vmax.f32 %v2272_v12, %v2254_v20  ;;  %2426 = vmatpush.msrb.mxu1 %v2391_v16  ;;  %2611 = vmatpush.msrb.mxu2 %v2608_v55 }
 0xc3c   :  { %2427 = vmatpush.msrb.mxu1 %v2390_v30 }
 0xc3d   :  { %2797 = vmatmul.msk.f32.gmra.mxu1 %vm524_vm5, %v2250_v54 }
 0xc3e   :  { %2428 = vmatpush.msrb.mxu1 %v2389_v46 }
 0xc3f   :  { %2799 = vmatmul.msk.f32.gmra.mxu2 %vm524_vm5, %v2254_v20 }
 0xc40   :  { %2429 = vmatpush.msrb.mxu1 %v2388_v40 }
 0xc42   :  { %2430 = vmatpush.msrb.mxu1 %v2387_v41 }
 0xc44   :  { %2431 = vmatpush.msrb.mxu1 %v2386_v49 }
 0xc47   :  { %2800 = vmatmul.msk.f32.vlgmr.msra.gmra.mxu2 %vm524_vm5, %v2257_v29 }
 0xc4f   :  { %2801 = vmatmul.msk.f32.gmra.mxu2 %vm524_vm5, %v2258_v44  ;;  %v2552_v44 = vld [vmem:[%s4265_s16] sm:$0xff] }
 0xc8f   :  { %v2262_v42 = vpop.permute.xlu2 %2261 }
 0xc90   :  { %v2267_v36 = vsel %vm524_vm5, %v4105_v45, %v2262_v42  ;;  %v2269_v23 = vsel %vm524_vm5, %v2255_v17, %v2262_v42  ;;  %v2605_v17 = vld [vmem:[%s4267_s23 + $0x58] sm:$0xff]  ;;  %v2604_v42 = vld [vmem:[%s4267_s23 + $0x50] sm:$0xff] }
 0xc91   :  { %2356 = vmatmul.f32.vlgmr.msrb.gmra.mxu3 %v2267_v36  ;;  %2432 = vmatmul.f32.vlgmr.msrb.gmra.mxu1 %v2269_v23  ;;  %v2603_v36 = vld [vmem:[%s4267_s23 + $0x48] sm:$0xff] }
 0xca8   :  { %v2264_v3 = vpop.permute.xlu1 %2263 }
 0xca9   :  { %v2268_v62 = vsel %vm524_vm5, %v4111_v4, %v2264_v3  ;;  %v2270_v32 = vsel %vm524_vm5, %v2256_v61, %v2264_v3  ;;  %v2602_v61 = vld [vmem:[%s4267_s23 + $0x40] sm:$0xff] }
 0xcaa   :  { %2359 = vmatmul.f32.gmra.mxu3 %v2268_v62  ;;  %2435 = vmatmul.f32.gmra.mxu1 %v2270_v32  ;;  %v2601_v32 = vld [vmem:[%s4267_s23 + $0x38] sm:$0xff] }
 0xcb2   :  { %2802 = vmatmul.msk.f32.vlgmr.msra.gmra.mxu3 %vm524_vm5, %v4118_v56  ;;  %v2304_v63 = vpop.f32.mrf.mxu1 }
 0xcba   :  { %2803 = vmatmul.msk.f32.gmra.mxu3 %vm524_vm5, %v4120_v21  ;;  %v2380_v39 = vpop.f32.mrf.mxu2  ;;  %v2307_v1 = vpop.f32.mrf.mxu1  ;;  %v2990_v21 = vld [vmem:[%s4263_s11] ss:$0 sm:$0xff] }
 0xcc2   :  { %v2383_v0 = vpop.f32.mrf.mxu2 }
 0xcca   :  { %v2456_v2 = vpop.f32.mrf.mxu2 }
 0xcd2   :  { %v2459_v38 = vpop.f32.mrf.mxu2 }
 0xd0e   :  { %v2433_v59 = vpop.f32.mrf.mxu1 }
 0xd0f   :  { %v2457_v60 = vadd.f32 %v2456_v2, %v2433_v59  ;;  %v2598_v59 = vld [vmem:[%s4267_s23 + $0x20] sm:$0xff] }
 0xd11   :  { %2509 = vrot.lane.b32.xlu1 %v2457_v60, %s3080_s13 }
 0xd14   :  { %v2357_v5 = vpop.f32.mrf.mxu3 }
 0xd15   :  { %v2381_v6 = vadd.f32 %v2380_v39, %v2357_v5  ;;  %v2597_v5 = vld [vmem:[%s4267_s23 + $0x18] sm:$0xff] }
 0xd19   :  { %2501 = vrot.lane.b32.xlu1 %v2381_v6, %s3078_s5  ;;  %v2572_v6 = vld [vmem:[%s4269_s9] sm:$0x1] }
 0xd27   :  { %v2436_v43 = vpop.f32.mrf.mxu1 }
 0xd28   :  { %v2460_v45 = vadd.f32 %v2459_v38, %v2436_v43  ;;  %v2596_v43 = vld [vmem:[%s4267_s23 + $0x10] sm:$0xff] }
 0xd2a   :  { %2511 = vrot.lane.b32.xlu2 %v2460_v45, %s3080_s13 }
 0xd2d   :  { %v2360_v33 = vpop.f32.mrf.mxu3 }
 0xd2e   :  { %v2384_v54 = vadd.f32 %v2383_v0, %v2360_v33  ;;  %v2595_v33 = vld [vmem:[%s4267_s23 + $0x8] sm:$0xff] }
 0xd32   :  { %2503 = vrot.lane.b32.xlu2 %v2384_v54, %s3078_s5  ;;  %v2642_v54 = vld [vmem:[%s3241_s4 + $0x38] sm:$0xff] }
 0xd33   :  { %2655 = vmatpush.msra.mxu1 %v2642_v54 }
 0xd35   :  { %v2493_v7 = vpop.f32.mrf.mxu3 }
 0xd36   :  { %2517 = vrot.lane.b32.xlu1 %v2493_v7, %s4272_s25  ;;  %v2641_v7 = vld [vmem:[%s3241_s4 + $0x30] sm:$0xff] }
 0xd37   :  { %2656 = vmatpush.msra.mxu1 %v2641_v7 }
 0xd3d   :  { %v2496_v10 = vpop.f32.mrf.mxu3 }
 0xd3e   :  { %2519 = vrot.lane.b32.xlu2 %v2496_v10, %s4272_s25 }
 0xd83   :  { %v2510_v18 = vpop.permute.xlu1 %2509 }
 0xd84   :  { %v2512_v4 = vpop.permute.xlu2 %2511 }
 0xd8b   :  { %v2502_v22 = vpop.permute.xlu1 %2501 }
 0xd8c   :  { %v2504_v12 = vpop.permute.xlu2 %2503  ;;  %v2523_v25 = vsel %vm516_vm3, %v2304_v63, %v2502_v22  ;;  %v2600_v63 = vld [vmem:[%s4267_s23 + $0x30] sm:$0xff] }
 0xd8d   :  { %v2524_v15 = vsel %vm516_vm3, %v2307_v1, %v2504_v12  ;;  %v2525_v28 = vsel %vm524_vm5, %v2523_v25, %v2510_v18  ;;  %v2599_v1 = vld [vmem:[%s4267_s23 + $0x28] sm:$0xff]  ;;  %v2639_v18 = vld [vmem:[%s3241_s4 + $0x20] sm:$0xff] }
 0xd8e   :  { %v2526_v20 = vsel %vm524_vm5, %v2524_v15, %v2512_v4  ;;  %v2594_v4 = vld [vmem:[%s4267_s23] sm:$0xff]  ;;  %v2640_v12 = vld [vmem:[%s3241_s4 + $0x28] sm:$0xff]  ;;  %v2638_v15 = vld [vmem:[%s3241_s4 + $0x18] sm:$0xff] }
 0xd8f   :  { %2657 = vmatpush.msra.mxu1 %v2640_v12 }
 0xd91   :  { %2658 = vmatpush.msra.mxu1 %v2639_v18 }
 0xd93   :  { %2659 = vmatpush.msra.mxu1 %v2638_v15 }
 0xd98   :  { %v2520_v56 = vpop.permute.xlu2 %2519 }
 0xd99   :  { %v2528_v35 = vsel %vm660_vm7, %v2526_v20, %v2520_v56 }
 0xd9a   :  { %v2534_v14 = vmul.f32 %v2990_v21, %v2528_v35 }
 0xd9c   :  { %v2540_v26 = vadd.f32 %v2991_v24, %v2534_v14 }
 0xd9e   :  { %v2542_v13 = vmax.f32 %v2540_v26, 0.0 }
 0xda0   :  { %v2543_v29 = vsel %vm1474_vm12, %v2542_v13, 0.0  ;;  %v2637_v13 = vld [vmem:[%s3241_s4 + $0x10] sm:$0xff] }
 0xda1   :  { %2660 = vmatpush.msra.mxu1 %v2637_v13 }
 0xda8   :  { %v2518_v8 = vpop.permute.xlu1 %2517 }
 0xda9   :  { %v2527_v9 = vsel %vm660_vm7, %v2525_v28, %v2518_v8 }
 0xdaa   :  { %v2533_v11 = vmul.f32 %v2990_v21, %v2527_v9 }
 0xdac   :  { %v2539_v16 = vadd.f32 %v2991_v24, %v2533_v11 }
 0xdae   :  { %v2541_v57 = vmax.f32 %v2539_v16, 0.0  ;;  %v2636_v16 = vld [vmem:[%s3241_s4 + $0x8] sm:$0xff] }
 0xdaf   :  { %2661 = vmatpush.msra.mxu1 %v2636_v16 }
 0xdb0   :  { %v2544_v30 = vadd.f32 %v2543_v29, %v2541_v57  ;;  %v2635_v57 = vld [vmem:[%s3241_s4] sm:$0xff] }
 0xdb1   :  { %2662 = vmatpush.msra.mxu1 %v2635_v57  ;;  %v2630_v29 = vld [vmem:[%s4270_s17] sm:$0x1] }
 0xdb2   :  { %v2545_v31 = vrot.slane %v2544_v30, 4 }
 0xdb4   :  { %v2546_v46 = vadd.f32 %v2545_v31, %v2544_v30  ;;  %v2632_v31 = vld [vmem:[%s3236_s27] sm:$0x1] }
 0xdb6   :  { %v2547_v34 = vrot.slane %v2546_v46, 2 }
 0xdb8   :  { %v2548_v40 = vadd.f32 %v2547_v34, %v2546_v46 }
 0xdba   :  { %v2549_v27 = vrot.slane %v2548_v40, 1 }
 0xdbc   :  { %v2550_v41 = vadd.f32 %v2549_v27, %v2548_v40  ;;  %v2643_v27 = vld [vmem:[%s3246_s12] sm:$0x1] }
 0xdbe   :  { %v4183_v47 = vmul.f32 %v2550_v41, %v3668_v50  ;;  %v2607_v50 = vld [vmem:[%s4267_s23 + $0x68] sm:$0xff] }
 0xdbf   :  { %2612 = vmatpush.msrb.mxu2 %v2607_v50 }
 0xdc0   :  { %v2553_v49 = vmul.f32 %v2552_v44, %v4183_v47 }
 0xdc1   :  { %2613 = vmatpush.msrb.mxu2 %v2606_v58 }
 0xdc2   :  { %2554 = vadd.xlane.f32.xlu2 %v2553_v49 }
 0xdc3   :  { %2614 = vmatpush.msrb.mxu2 %v2605_v17 }
 0xdc5   :  { %2615 = vmatpush.msrb.mxu2 %v2604_v42 }
 0xdc7   :  { %2616 = vmatpush.msrb.mxu2 %v2603_v36 }
 0xdc9   :  { %2617 = vmatpush.msrb.mxu2 %v2602_v61 }
 0xdcb   :  { %2618 = vmatpush.msrb.mxu2 %v2601_v32 }
 0xdcd   :  { %2619 = vmatpush.msrb.mxu2 %v2600_v63 }
 0xdcf   :  { %2620 = vmatpush.msrb.mxu2 %v2599_v1 }
 0xdd1   :  { %2621 = vmatpush.msrb.mxu2 %v2598_v59 }
 0xdd3   :  { %2622 = vmatpush.msrb.mxu2 %v2597_v5 }
 0xdd5   :  { %2623 = vmatpush.msrb.mxu2 %v2596_v43 }
 0xdd7   :  { %2624 = vmatpush.msrb.mxu2 %v2595_v33 }
 0xdd9   :  { %2625 = vmatpush.msrb.mxu2 %v2594_v4 }
 0xe35   :  { %v2555_v51 = vpop.xlane.xlu2 %2554 }
 0xe36   :  { %v2557_v52 = vadd.f32 %v2556_v48, %v2555_v51 }
 0xe38   :  { %v2558_v53 = vmax.f32 %v2557_v52, 0.0 }
 0xe3a   :  { %2562 = vperm.xlu1 %2979, %v2558_v53  }
 0xeac   :  { %v2563_v23 = vpop.permute.xlu1 %2562 }
 0xead   :  { %v2565_v3 = vmul.f32 %v2563_v23, %v2559_v19 }
 0xeaf   :  { %v2566_v62 = vrot.slane %v2565_v3, 4 }
 0xeb1   :  { %v2567_v39 = vadd.f32 %v2566_v62, %v2565_v3 }
 0xeb3   :  { %v2568_v0 = vrot.slane %v2567_v39, 2 }
 0xeb5   :  { %v2569_v2 = vadd.f32 %v2568_v0, %v2567_v39 }
 0xeb7   :  { %v2570_v60 = vrot.slane %v2569_v2, 1 }
 0xeb9   :  { %v2571_v38 = vadd.f32 %v2570_v60, %v2569_v2 }
 0xebb   :  { %v2573_v45 = vadd.f32 %v2572_v6, %v2571_v38 }
 0xebd   :  { %v2804_v10 = vmul.f32 -1.442695, %v2573_v45 }
 0xebf   :  { %3010 = vpow2.f32 %v2804_v10 }
 0xec5   :  { %v3011_v56 = vpop.eup %3010 }
 0xec6   :  { %v2577_v20 = vadd.f32 1.0, %v3011_v56 }
 0xec8   :  { %3012 = vrcp.f32 %v2577_v20  ;;  %v2589_v24 = vand.u32 2147483648, %v2577_v20  ;;  %v2587_v25 = vand.u32 2147483647, %v2577_v20  ;;  %vm2583_vm7 = vweird.f32 %v2577_v20 }
 0xeca   :  { %v2590_v28 = vor.u32 1.1754944e-38, %v2589_v24  ;;  %vm2588_vm13 = vcmp.eq.f32.partialorder %v2587_v25, 8.507059e+37 }
 0xece   :  { %v3013_v21 = vpop.eup %3012 }
 0xecf   :  { %v2579_v22 = vmul.f32 %v3013_v21, %v2577_v20  ;;  %vm2584_vm3 = vweird.f32 %v3013_v21 }
 0xed0   :  { %vm2585_vm11 = vmor %vm2583_vm7, %vm2584_vm3 }
 0xed1   :  { %v2580_v35 = vsub.f32 1.0, %v2579_v22 }
 0xed3   :  { %v2581_v14 = vmul.f32 %v3013_v21, %v2580_v35 }
 0xed5   :  { %v2582_v26 = vadd.f32 %v3013_v21, %v2581_v14 }
 0xed7   :  { %v2586_v8 = vsel %vm2585_vm11, %v3013_v21, %v2582_v26 }
 0xed8   :  { %v2591_v9 = vsel %vm2588_vm13, %v2590_v28, %v2586_v8 }
 0xed9   :  { %v2593_v11 = vmul.f32 %v2591_v9, %v4183_v47 }
 0xedb   :  { %2626 = vmatmul.f32.vlgmr.msrb.gmra.mxu2 %v2593_v11 }
 0xf5e   :  { %v2627_v30 = vpop.f32.mrf.mxu2 }
 0xf5f   :  { %v2631_v46 = vmul.f32 %v2630_v29, %v2627_v30 }
 0xf61   :  { %v2633_v34 = vadd.f32 %v2632_v31, %v2631_v46 }
 0xf63   :  { %v2634_v40 = vmax.f32 %v2633_v34, 0.0 }
 0xf65   :  { %2805 = vmatmul.msk.f32.vlgmr.msra.gmra.mxu1 %vm524_vm5, %v2634_v40 }
 0xfe2   :  { %v2664_v41 = vpop.f32.mrf.mxu1 }
 0xfe3   :  { %v2665_v44 = vadd.f32 %v2664_v41, %v2643_v27 }
 0xfe5   :  { %v2667_v47 = vsel %vm1599_vm2, %v2665_v44, -inf }
 0xfe6   :  { %2668 = vmax.xlane.f32.xlu1 %v2667_v47 }
0x1059   :  { %v2669_v49 = vpop.xlane.xlu1 %2668 }
0x105a   :  { %v2670_v48 = vsub.f32 %v2665_v44, %v2669_v49 }
0x105c   :  { %v2671_v51 = vmul.f32 1.442695, %v2670_v48 }
0x105e   :  { %3014 = vpow2.f32 %v2671_v51 }
0x1064   :  { %v3015_v52 = vpop.eup %3014 }
0x1065   :  { %v2673_v53 = vsel %vm1599_vm2, %v3015_v52, 0.0 }
0x1066   :  { %2674 = vadd.xlane.f32.xlu0 %v2673_v53 }
0x10d9   :  { %v2675_v37 = vpop.xlane.xlu0 %2674 }
0x10da   :  { %3016 = vlog2.f32 %v2675_v37 }
0x10e0   :  { %v3017_v55 = vpop.eup %3016 }
0x10e1   :  { %v2677_v50 = vmul.f32 0.6931472, %v3017_v55 }
0x10e3   :  { %v2678_v58 = vsub.f32 %v2670_v48, %v2677_v50 }
0x10e5   :  { %2679 = vst.msk [vmem:[#allocation6 + $0x1] sm:$0x1] %vm1599_vm2, %v2678_v58 }
0x10e6   :  { %3043 = shalt.err (!%p3040_p4)
}
0x10e7   :  { %2690 = dma.vmem_to_hbm [thread:$0]  %s2686_s3, 32, %s2688_s8, [#allocation7]  }
0x10e8   :  { %3044 = dma.done.wait [#allocation7], 32  }
0x10e9   :  { %3045 = vsyncadd [#allocation7], 4294967264 }
0x10ea   :  { %2695 = vsyncpa [#allocation7], 1 }

</bundles_post_ra>
